<compile_context>
chip_gen: v7x
topology: tpu7x:2x2x1
jax: 0.10.0
libtpu: 0.0.40
codegen_flags: <defaults>
</compile_context>

<pallas_src>
import functools

import jax
import jax.numpy as jnp
from jax import lax
from jax.experimental import pallas as pl
from jax.experimental.pallas import tpu as pltpu


# ---------------------------------------------------------------------------
# Fused Conv_Block kernel:
#   cond-add -> 'same' pad (VMEM scratch) -> 3x3 conv (9 bf16 MXU dots, f32 acc)
#   -> +bias -> BatchNorm2d (batch stats) -> ReLU [-> fused 2x2 MaxPool]
# Everything for the whole (tiny) batch stays resident in VMEM; grid=(1,).
# ---------------------------------------------------------------------------
def conv_block_kernel(*refs, W, eps, do_pool):
    if do_pool:
        (x_ref, cond_ref, w_ref, b_ref, g_ref, bt_ref, m_ref, psel_ref,
         o_ref, e_ref, xpad_ref, opad_ref) = refs
    else:
        (x_ref, cond_ref, w_ref, b_ref, g_ref, bt_ref, m_ref,
         o_ref, xpad_ref) = refs
        psel_ref = e_ref = opad_ref = None

    B, Cin, HW = x_ref.shape
    Cout = o_ref.shape[1]
    pad = W + 1                                   # flattened 'same'-padding margin

    bias = b_ref[...]                             # (Cout, 1) f32
    gamma = g_ref[...]                            # (Cout, 1) f32
    beta = bt_ref[...]                            # (Cout, 1) f32
    w_taps = [w_ref[t] for t in range(9)]         # 9 x (Cout, Cin) bf16
    m_taps = [m_ref[t] for t in range(9)]         # 9 x (1, HW)    f32 validity masks

    # Zero the padded-input scratch once; only the interior is rewritten per batch
    # element, so the padding region stays zero for every tap slice.
    xpad_ref[...] = jnp.zeros(xpad_ref.shape, xpad_ref.dtype)
    if do_pool:
        opad_ref[...] = jnp.zeros(opad_ref.shape, opad_ref.dtype)

    # ---- cond-add + 3x3 'same' conv + bias for every batch element (MXU) ----
    ys = []
    for b in range(B):
        xpad_ref[:, pad:pad + HW] = x_ref[b] + cond_ref[b]        # cond-add in VMEM
        acc = jnp.zeros((Cout, HW), jnp.float32)
        t = 0
        for dy in (-1, 0, 1):
            for dx in (-1, 0, 1):
                d = dy * W + dx
                shifted = xpad_ref[:, pad + d:pad + d + HW]        # (Cin, HW) f32
                patch = (shifted * m_taps[t]).astype(jnp.bfloat16)
                acc = acc + jnp.dot(w_taps[t], patch,              # MXU, f32 accumulate
                                    preferred_element_type=jnp.float32)
                t += 1
        ys.append(acc + bias)                                      # (Cout, HW) f32

    # ---- BatchNorm2d, training-mode batch statistics (two-pass, f32) --------
    inv_n = 1.0 / float(B * HW)
    s = jnp.zeros((Cout, 1), jnp.float32)
    for yb in ys:
        s = s + jnp.sum(yb, axis=1, keepdims=True)
    mean = s * inv_n
    v = jnp.zeros((Cout, 1), jnp.float32)
    for yb in ys:
        dlt = yb - mean
        v = v + jnp.sum(dlt * dlt, axis=1, keepdims=True)
    var = v * inv_n                                # biased variance (PyTorch train fwd)
    scale = lax.rsqrt(var + eps) * gamma

    if do_pool:
        psel = psel_ref[...]                       # (HW, HW//4) f32 anchor one-hots

    # ---- normalize + ReLU (+ fused 2x2 MaxPool), lane-dense stores ----------
    for b in range(B):
        ob = jnp.maximum((ys[b] - mean) * scale + beta, 0.0)       # (Cout, HW)
        o_ref[b] = ob.astype(o_ref.dtype)
        if do_pool:
            opad_ref[:, 0:HW] = ob                 # zero tail never selected (ReLU >= 0)
            mx = jnp.maximum(
                jnp.maximum(opad_ref[:, 0:HW], opad_ref[:, 1:HW + 1]),
                jnp.maximum(opad_ref[:, W:HW + W], opad_ref[:, W + 1:HW + W + 1]))
            e_ref[b] = jnp.dot(mx, psel,
                               preferred_element_type=jnp.float32).astype(e_ref.dtype)


# ---------------------------------------------------------------------------
# Constant helpers (built in glue; folded by jit)
# ---------------------------------------------------------------------------
def _same_conv_masks(H, W):
    """(9, 1, H*W) f32; tap t=(dy+1)*3+(dx+1) marks flattened positions whose (dy, dx)
    neighbour lies inside the image (zero 'same' padding elsewhere)."""
    p = jnp.arange(H * W)
    ph, pw = p // W, p % W
    rows = []
    for dy in (-1, 0, 1):
        for dx in (-1, 0, 1):
            ok = (ph + dy >= 0) & (ph + dy < H) & (pw + dx >= 0) & (pw + dx < W)
            rows.append(ok)
    return jnp.stack(rows, axis=0).astype(jnp.float32).reshape(9, 1, H * W)


def _pool_select(H, W):
    """(H*W, (H//2)*(W//2)) f32 one-hot matrix picking each 2x2 window's top-left anchor."""
    q = jnp.arange((H // 2) * (W // 2))
    anchor = (q // (W // 2)) * (2 * W) + (q % (W // 2)) * 2
    return (jnp.arange(H * W)[:, None] == anchor[None, :]).astype(jnp.float32)


# ---------------------------------------------------------------------------
# Conv_Block / Conv_Block_N / Encoder_Block wrappers
# ---------------------------------------------------------------------------
def init_conv_block(key, cin, cout, temb_dim, k=3):
    k1, k2, k3, k4 = jax.random.split(key, 4)
    return dict(
        w_mlp=jax.random.normal(k1, (cin, temb_dim), jnp.float32) * 0.1,   # nn.Linear(temb, cin)
        b_mlp=jax.random.normal(k2, (cin,), jnp.float32) * 0.1,
        w_conv=jax.random.normal(k3, (cout, cin, k, k), jnp.float32) * 0.1,  # Conv2d weight (OIHW)
        b_conv=jax.random.normal(k4, (cout,), jnp.float32) * 0.1,
        gamma=jnp.ones((cout,), jnp.float32),                                # BatchNorm2d defaults
        beta=jnp.zeros((cout,), jnp.float32),
    )


def conv_block_apply(params, x_flat, time_emb, H, W, *, pool=False, eps=1e-5):
    """x_flat: (B, Cin, H*W) f32 -> (B, Cout, H*W) f32 [, (B, Cout, H*W//4) f32 if pool]."""
    B, Cin, HW = x_flat.shape
    Cout, _, kh, kw = params["w_conv"].shape

    # time-embedding MLP (tiny glue): nn.Sequential(GELU(exact), Linear(temb_dim, Cin))
    cond = jax.nn.gelu(time_emb, approximate=False) @ params["w_mlp"].T + params["b_mlp"]
    cond = cond.reshape(B, Cin, 1).astype(jnp.float32)

    # conv weights as 9 lane-major (Cout, Cin) tap matrices, bf16 operands for the MXU
    w_taps = jnp.transpose(params["w_conv"], (2, 3, 0, 1)).reshape(kh * kw, Cout, Cin)
    w_taps = w_taps.astype(jnp.bfloat16)
    bias = params["b_conv"].reshape(Cout, 1).astype(jnp.float32)
    gamma = params["gamma"].reshape(Cout, 1).astype(jnp.float32)
    beta = params["beta"].reshape(Cout, 1).astype(jnp.float32)
    masks = _same_conv_masks(H, W)

    def full_spec(shape):
        rank = len(shape)
        return pl.BlockSpec(shape, lambda i: (0,) * rank)

    inputs = [x_flat.astype(jnp.float32), cond, w_taps, bias, gamma, beta, masks]
    out_shapes = [jax.ShapeDtypeStruct((B, Cout, HW), jnp.float32)]
    scratch = [pltpu.VMEM((Cin, HW + 2 * W + 2), jnp.float32)]     # flattened padded input
    if pool:
        inputs.append(_pool_select(H, W))
        out_shapes.append(jax.ShapeDtypeStruct((B, Cout, HW // 4), jnp.float32))
        scratch.append(pltpu.VMEM((Cout, HW + W + 2), jnp.float32))

    out = pl.pallas_call(
        functools.partial(conv_block_kernel, W=W, eps=eps, do_pool=pool),
        out_shape=tuple(out_shapes),
        grid=(1,),                      # fully fused; whole problem fits VMEM at these sizes
        in_specs=[full_spec(a.shape) for a in inputs],
        out_specs=tuple(full_spec(s.shape) for s in out_shapes),
        scratch_shapes=scratch,
        compiler_params=pltpu.CompilerParams(dimension_semantics=("arbitrary",)),
    )(*inputs)
    return out if pool else out[0]


def encoder_block_apply(params, x, time_emb):
    """Encoder_Block.forward: returns (Conv_Block_N(x, t), MaxPool2d(2)(Conv_Block_N(x, t)))."""
    B, Cin, H, W = x.shape
    x_flat = x.reshape(B, Cin, H * W)
    h1 = conv_block_apply(params["block1"], x_flat, time_emb, H, W, pool=False)
    h2, e = conv_block_apply(params["block2"], h1, time_emb, H, W, pool=True)
    Cout = h2.shape[1]
    return h2.reshape(B, Cout, H, W), e.reshape(B, Cout, H // 2, W // 2)


# ---------------------------------------------------------------------------
# Plain-JAX reference of the PyTorch forward (for the numerical self-check only)
# ---------------------------------------------------------------------------
def _conv_block_ref(params, x, time_emb, eps=1e-5):
    cond = jax.nn.gelu(time_emb, approximate=False) @ params["w_mlp"].T + params["b_mlp"]
    x = x + cond[:, :, None, None]
    y = lax.conv_general_dilated(x, params["w_conv"], (1, 1), "SAME",
                                 dimension_numbers=("NCHW", "OIHW", "NCHW"))
    y = y + params["b_conv"][None, :, None, None]
    mean = jnp.mean(y, axis=(0, 2, 3), keepdims=True)
    var = jnp.mean((y - mean) ** 2, axis=(0, 2, 3), keepdims=True)
    yhat = (y - mean) * lax.rsqrt(var + eps)
    yhat = yhat * params["gamma"][None, :, None, None] + params["beta"][None, :, None, None]
    return jnp.maximum(yhat, 0.0)


def _encoder_block_ref(params, x, time_emb):
    h = _conv_block_ref(params["block1"], x, time_emb)
    h = _conv_block_ref(params["block2"], h, time_emb)
    B, C, H, W = h.shape
    e = h.reshape(B, C, H // 2, 2, W // 2, 2).max(axis=(3, 5))
    return h, e


if __name__ == "__main__":
    key = jax.random.PRNGKey(0)
    k_x, k_t, k_p1, k_p2 = jax.random.split(key, 4)

    B, Cin, Cout, H, W, T = 2, 4, 8, 16, 16, 32
    x = jax.random.normal(k_x, (B, Cin, H, W), jnp.float32)
    time_emb = jax.random.normal(k_t, (B, T), jnp.float32)

    params = dict(
        block1=init_conv_block(k_p1, Cin, Cout, T),
        block2=init_conv_block(k_p2, Cout, Cout, T),
    )

    fwd = jax.jit(encoder_block_apply)
    x_out, e_out = jax.block_until_ready(fwd(params, x, time_emb))

    assert x_out.shape == (B, Cout, H, W)
    assert e_out.shape == (B, Cout, H // 2, W // 2)
    assert bool(jnp.all(x_out >= 0.0)) and bool(jnp.all(e_out >= 0.0))   # ReLU outputs

    # numerical check vs. an f32 plain-JAX reference of the PyTorch forward;
    # loose tolerance accounts for the intentional bf16 MXU operands (f32 accumulation).
    x_exp, e_exp = _encoder_block_ref(params, x, time_emb)
    assert bool(jnp.allclose(x_out, x_exp, atol=1e-1, rtol=1e-1)), \
        float(jnp.max(jnp.abs(x_out - x_exp)))
    assert bool(jnp.allclose(e_out, e_exp, atol=1e-1, rtol=1e-1))

    print("KERNEL_OK")
</pallas_src>

<mosaic_0001>
module attributes {stable_mosaic.version = 11 : i64} {
  func.func @conv_block_kernel(%arg0: i32, %arg1: memref<2x4x256xf32, #tpu.memory_space<vmem>>, %arg2: memref<2x4x1xf32, #tpu.memory_space<vmem>>, %arg3: memref<9x8x4xbf16, #tpu.memory_space<vmem>>, %arg4: memref<8x1xf32, #tpu.memory_space<vmem>>, %arg5: memref<8x1xf32, #tpu.memory_space<vmem>>, %arg6: memref<8x1xf32, #tpu.memory_space<vmem>>, %arg7: memref<9x1x256xf32, #tpu.memory_space<vmem>>, %arg8: memref<2x8x256xf32, #tpu.memory_space<vmem>>, %arg9: memref<4x290xf32, #tpu.memory_space<vmem>>) attributes {dimension_semantics = [#tpu.dimension_semantics<arbitrary>], iteration_bounds = array<i64: 1>, scalar_prefetch = 0 : i64, scratch_operands = 1 : i64, tpu.core_type = #tpu.core_type<tc>, window_params = [{pipeline_mode = #tpu.pipeline_mode<synchronous>, transform_indices = @transform_0, window_bounds = array<i64: 2, 4, 256>}, {pipeline_mode = #tpu.pipeline_mode<synchronous>, transform_indices = @transform_1, window_bounds = array<i64: 2, 4, 1>}, {pipeline_mode = #tpu.pipeline_mode<synchronous>, transform_indices = @transform_2, window_bounds = array<i64: 9, 8, 4>}, {pipeline_mode = #tpu.pipeline_mode<synchronous>, transform_indices = @transform_3, window_bounds = array<i64: 8, 1>}, {pipeline_mode = #tpu.pipeline_mode<synchronous>, transform_indices = @transform_4, window_bounds = array<i64: 8, 1>}, {pipeline_mode = #tpu.pipeline_mode<synchronous>, transform_indices = @transform_5, window_bounds = array<i64: 8, 1>}, {pipeline_mode = #tpu.pipeline_mode<synchronous>, transform_indices = @transform_6, window_bounds = array<i64: 9, 1, 256>}, {pipeline_mode = #tpu.pipeline_mode<synchronous>, transform_indices = @transform_7, window_bounds = array<i64: 2, 8, 256>}]} {
    %c0 = arith.constant 0 : index
    %c0_0 = arith.constant 0 : index
    %0 = vector.load %arg4[%c0, %c0_0] : memref<8x1xf32, #tpu.memory_space<vmem>>, vector<8x1xf32>
    %c0_1 = arith.constant 0 : index
    %c0_2 = arith.constant 0 : index
    %1 = vector.load %arg5[%c0_1, %c0_2] : memref<8x1xf32, #tpu.memory_space<vmem>>, vector<8x1xf32>
    %c0_3 = arith.constant 0 : index
    %c0_4 = arith.constant 0 : index
    %2 = vector.load %arg6[%c0_3, %c0_4] : memref<8x1xf32, #tpu.memory_space<vmem>>, vector<8x1xf32>
    %c0_5 = arith.constant 0 : index
    %c0_6 = arith.constant 0 : index
    %c0_7 = arith.constant 0 : index
    %3 = vector.load %arg3[%c0_5, %c0_6, %c0_7] : memref<9x8x4xbf16, #tpu.memory_space<vmem>>, vector<1x8x4xbf16>
    %4 = vector.shape_cast %3 : vector<1x8x4xbf16> to vector<8x4xbf16>
    %c1 = arith.constant 1 : index
    %c0_8 = arith.constant 0 : index
    %c0_9 = arith.constant 0 : index
    %5 = vector.load %arg3[%c1, %c0_8, %c0_9] : memref<9x8x4xbf16, #tpu.memory_space<vmem>>, vector<1x8x4xbf16>
    %6 = vector.shape_cast %5 : vector<1x8x4xbf16> to vector<8x4xbf16>
    %c2 = arith.constant 2 : index
    %c0_10 = arith.constant 0 : index
    %c0_11 = arith.constant 0 : index
    %7 = vector.load %arg3[%c2, %c0_10, %c0_11] : memref<9x8x4xbf16, #tpu.memory_space<vmem>>, vector<1x8x4xbf16>
    %8 = vector.shape_cast %7 : vector<1x8x4xbf16> to vector<8x4xbf16>
    %c3 = arith.constant 3 : index
    %c0_12 = arith.constant 0 : index
    %c0_13 = arith.constant 0 : index
    %9 = vector.load %arg3[%c3, %c0_12, %c0_13] : memref<9x8x4xbf16, #tpu.memory_space<vmem>>, vector<1x8x4xbf16>
    %10 = vector.shape_cast %9 : vector<1x8x4xbf16> to vector<8x4xbf16>
    %c4 = arith.constant 4 : index
    %c0_14 = arith.constant 0 : index
    %c0_15 = arith.constant 0 : index
    %11 = vector.load %arg3[%c4, %c0_14, %c0_15] : memref<9x8x4xbf16, #tpu.memory_space<vmem>>, vector<1x8x4xbf16>
    %12 = vector.shape_cast %11 : vector<1x8x4xbf16> to vector<8x4xbf16>
    %c5 = arith.constant 5 : index
    %c0_16 = arith.constant 0 : index
    %c0_17 = arith.constant 0 : index
    %13 = vector.load %arg3[%c5, %c0_16, %c0_17] : memref<9x8x4xbf16, #tpu.memory_space<vmem>>, vector<1x8x4xbf16>
    %14 = vector.shape_cast %13 : vector<1x8x4xbf16> to vector<8x4xbf16>
    %c6 = arith.constant 6 : index
    %c0_18 = arith.constant 0 : index
    %c0_19 = arith.constant 0 : index
    %15 = vector.load %arg3[%c6, %c0_18, %c0_19] : memref<9x8x4xbf16, #tpu.memory_space<vmem>>, vector<1x8x4xbf16>
    %16 = vector.shape_cast %15 : vector<1x8x4xbf16> to vector<8x4xbf16>
    %c7 = arith.constant 7 : index
    %c0_20 = arith.constant 0 : index
    %c0_21 = arith.constant 0 : index
    %17 = vector.load %arg3[%c7, %c0_20, %c0_21] : memref<9x8x4xbf16, #tpu.memory_space<vmem>>, vector<1x8x4xbf16>
    %18 = vector.shape_cast %17 : vector<1x8x4xbf16> to vector<8x4xbf16>
    %c8 = arith.constant 8 : index
    %c0_22 = arith.constant 0 : index
    %c0_23 = arith.constant 0 : index
    %19 = vector.load %arg3[%c8, %c0_22, %c0_23] : memref<9x8x4xbf16, #tpu.memory_space<vmem>>, vector<1x8x4xbf16>
    %20 = vector.shape_cast %19 : vector<1x8x4xbf16> to vector<8x4xbf16>
    %c0_24 = arith.constant 0 : index
    %c0_25 = arith.constant 0 : index
    %c0_26 = arith.constant 0 : index
    %21 = vector.load %arg7[%c0_24, %c0_25, %c0_26] : memref<9x1x256xf32, #tpu.memory_space<vmem>>, vector<1x1x256xf32>
    %22 = vector.shape_cast %21 : vector<1x1x256xf32> to vector<1x256xf32>
    %c1_27 = arith.constant 1 : index
    %c0_28 = arith.constant 0 : index
    %c0_29 = arith.constant 0 : index
    %23 = vector.load %arg7[%c1_27, %c0_28, %c0_29] : memref<9x1x256xf32, #tpu.memory_space<vmem>>, vector<1x1x256xf32>
    %24 = vector.shape_cast %23 : vector<1x1x256xf32> to vector<1x256xf32>
    %c2_30 = arith.constant 2 : index
    %c0_31 = arith.constant 0 : index
    %c0_32 = arith.constant 0 : index
    %25 = vector.load %arg7[%c2_30, %c0_31, %c0_32] : memref<9x1x256xf32, #tpu.memory_space<vmem>>, vector<1x1x256xf32>
    %26 = vector.shape_cast %25 : vector<1x1x256xf32> to vector<1x256xf32>
    %c3_33 = arith.constant 3 : index
    %c0_34 = arith.constant 0 : index
    %c0_35 = arith.constant 0 : index
    %27 = vector.load %arg7[%c3_33, %c0_34, %c0_35] : memref<9x1x256xf32, #tpu.memory_space<vmem>>, vector<1x1x256xf32>
    %28 = vector.shape_cast %27 : vector<1x1x256xf32> to vector<1x256xf32>
    %c4_36 = arith.constant 4 : index
    %c0_37 = arith.constant 0 : index
    %c0_38 = arith.constant 0 : index
    %29 = vector.load %arg7[%c4_36, %c0_37, %c0_38] : memref<9x1x256xf32, #tpu.memory_space<vmem>>, vector<1x1x256xf32>
    %30 = vector.shape_cast %29 : vector<1x1x256xf32> to vector<1x256xf32>
    %c5_39 = arith.constant 5 : index
    %c0_40 = arith.constant 0 : index
    %c0_41 = arith.constant 0 : index
    %31 = vector.load %arg7[%c5_39, %c0_40, %c0_41] : memref<9x1x256xf32, #tpu.memory_space<vmem>>, vector<1x1x256xf32>
    %32 = vector.shape_cast %31 : vector<1x1x256xf32> to vector<1x256xf32>
    %c6_42 = arith.constant 6 : index
    %c0_43 = arith.constant 0 : index
    %c0_44 = arith.constant 0 : index
    %33 = vector.load %arg7[%c6_42, %c0_43, %c0_44] : memref<9x1x256xf32, #tpu.memory_space<vmem>>, vector<1x1x256xf32>
    %34 = vector.shape_cast %33 : vector<1x1x256xf32> to vector<1x256xf32>
    %c7_45 = arith.constant 7 : index
    %c0_46 = arith.constant 0 : index
    %c0_47 = arith.constant 0 : index
    %35 = vector.load %arg7[%c7_45, %c0_46, %c0_47] : memref<9x1x256xf32, #tpu.memory_space<vmem>>, vector<1x1x256xf32>
    %36 = vector.shape_cast %35 : vector<1x1x256xf32> to vector<1x256xf32>
    %c8_48 = arith.constant 8 : index
    %c0_49 = arith.constant 0 : index
    %c0_50 = arith.constant 0 : index
    %37 = vector.load %arg7[%c8_48, %c0_49, %c0_50] : memref<9x1x256xf32, #tpu.memory_space<vmem>>, vector<1x1x256xf32>
    %38 = vector.shape_cast %37 : vector<1x1x256xf32> to vector<1x256xf32>
    %cst = arith.constant 0.000000e+00 : f32
    %39 = vector.broadcast %cst : f32 to vector<4x290xf32>
    %c0_51 = arith.constant 0 : index
    %c0_52 = arith.constant 0 : index
    %40 = vector.load %arg9[%c0_51, %c0_52] : memref<4x290xf32, #tpu.memory_space<vmem>>, vector<4x290xf32>
    tpu.vector_store %arg9[%c0_51, %c0_52], %39 {strides = array<i32>} : memref<4x290xf32, #tpu.memory_space<vmem>>, vector<4x290xf32>,
    %c0_53 = arith.constant 0 : index
    %c0_54 = arith.constant 0 : index
    %c0_55 = arith.constant 0 : index
    %41 = vector.load %arg1[%c0_53, %c0_54, %c0_55] : memref<2x4x256xf32, #tpu.memory_space<vmem>>, vector<1x4x256xf32>
    %42 = vector.shape_cast %41 : vector<1x4x256xf32> to vector<4x256xf32>
    %c0_56 = arith.constant 0 : index
    %c0_57 = arith.constant 0 : index
    %c0_58 = arith.constant 0 : index
    %43 = vector.load %arg2[%c0_56, %c0_57, %c0_58] : memref<2x4x1xf32, #tpu.memory_space<vmem>>, vector<1x4x1xf32>
    %44 = vector.shape_cast %43 : vector<1x4x1xf32> to vector<4x1xf32>
    %45 = vector.broadcast %44 : vector<4x1xf32> to vector<4x256xf32>
    %46 = arith.addf %42, %45 : vector<4x256xf32>
    %c0_59 = arith.constant 0 : index
    %c17 = arith.constant 17 : index
    %47 = vector.load %arg9[%c0_59, %c17] : memref<4x290xf32, #tpu.memory_space<vmem>>, vector<4x256xf32>
    tpu.vector_store %arg9[%c0_59, %c17], %46 {strides = array<i32>} : memref<4x290xf32, #tpu.memory_space<vmem>>, vector<4x256xf32>,
    %cst_60 = arith.constant 0.000000e+00 : f32
    %48 = vector.broadcast %cst_60 : f32 to vector<8x256xf32>
    %c0_61 = arith.constant 0 : index
    %c0_62 = arith.constant 0 : index
    %49 = vector.load %arg9[%c0_61, %c0_62] : memref<4x290xf32, #tpu.memory_space<vmem>>, vector<4x256xf32>
    %50 = vector.broadcast %22 : vector<1x256xf32> to vector<4x256xf32>
    %51 = arith.mulf %49, %50 : vector<4x256xf32>
    %52 = arith.truncf %51 : vector<4x256xf32> to vector<4x256xbf16>
    %cst_63 = arith.constant dense<0.000000e+00> : vector<8x256xf32>
    %53 = tpu.matmul %4, %52, %cst_63 {dimension_numbers = #tpu.dot_dimension_numbers<[1], [0], [0], [1], [0, 0, 1, 1], [], []>} : vector<8x4xbf16>, vector<4x256xbf16>, vector<8x256xf32> -> vector<8x256xf32>
    %54 = arith.addf %48, %53 : vector<8x256xf32>
    %c0_64 = arith.constant 0 : index
    %c1_65 = arith.constant 1 : index
    %55 = vector.load %arg9[%c0_64, %c1_65] : memref<4x290xf32, #tpu.memory_space<vmem>>, vector<4x256xf32>
    %56 = vector.broadcast %24 : vector<1x256xf32> to vector<4x256xf32>
    %57 = arith.mulf %55, %56 : vector<4x256xf32>
    %58 = arith.truncf %57 : vector<4x256xf32> to vector<4x256xbf16>
    %cst_66 = arith.constant dense<0.000000e+00> : vector<8x256xf32>
    %59 = tpu.matmul %6, %58, %cst_66 {dimension_numbers = #tpu.dot_dimension_numbers<[1], [0], [0], [1], [0, 0, 1, 1], [], []>} : vector<8x4xbf16>, vector<4x256xbf16>, vector<8x256xf32> -> vector<8x256xf32>
    %60 = arith.addf %54, %59 : vector<8x256xf32>
    %c0_67 = arith.constant 0 : index
    %c2_68 = arith.constant 2 : index
    %61 = vector.load %arg9[%c0_67, %c2_68] : memref<4x290xf32, #tpu.memory_space<vmem>>, vector<4x256xf32>
    %62 = vector.broadcast %26 : vector<1x256xf32> to vector<4x256xf32>
    %63 = arith.mulf %61, %62 : vector<4x256xf32>
    %64 = arith.truncf %63 : vector<4x256xf32> to vector<4x256xbf16>
    %cst_69 = arith.constant dense<0.000000e+00> : vector<8x256xf32>
    %65 = tpu.matmul %8, %64, %cst_69 {dimension_numbers = #tpu.dot_dimension_numbers<[1], [0], [0], [1], [0, 0, 1, 1], [], []>} : vector<8x4xbf16>, vector<4x256xbf16>, vector<8x256xf32> -> vector<8x256xf32>
    %66 = arith.addf %60, %65 : vector<8x256xf32>
    %c0_70 = arith.constant 0 : index
    %c16 = arith.constant 16 : index
    %67 = vector.load %arg9[%c0_70, %c16] : memref<4x290xf32, #tpu.memory_space<vmem>>, vector<4x256xf32>
    %68 = vector.broadcast %28 : vector<1x256xf32> to vector<4x256xf32>
    %69 = arith.mulf %67, %68 : vector<4x256xf32>
    %70 = arith.truncf %69 : vector<4x256xf32> to vector<4x256xbf16>
    %cst_71 = arith.constant dense<0.000000e+00> : vector<8x256xf32>
    %71 = tpu.matmul %10, %70, %cst_71 {dimension_numbers = #tpu.dot_dimension_numbers<[1], [0], [0], [1], [0, 0, 1, 1], [], []>} : vector<8x4xbf16>, vector<4x256xbf16>, vector<8x256xf32> -> vector<8x256xf32>
    %72 = arith.addf %66, %71 : vector<8x256xf32>
    %c0_72 = arith.constant 0 : index
    %c17_73 = arith.constant 17 : index
    %73 = vector.load %arg9[%c0_72, %c17_73] : memref<4x290xf32, #tpu.memory_space<vmem>>, vector<4x256xf32>
    %74 = vector.broadcast %30 : vector<1x256xf32> to vector<4x256xf32>
    %75 = arith.mulf %73, %74 : vector<4x256xf32>
    %76 = arith.truncf %75 : vector<4x256xf32> to vector<4x256xbf16>
    %cst_74 = arith.constant dense<0.000000e+00> : vector<8x256xf32>
    %77 = tpu.matmul %12, %76, %cst_74 {dimension_numbers = #tpu.dot_dimension_numbers<[1], [0], [0], [1], [0, 0, 1, 1], [], []>} : vector<8x4xbf16>, vector<4x256xbf16>, vector<8x256xf32> -> vector<8x256xf32>
    %78 = arith.addf %72, %77 : vector<8x256xf32>
    %c0_75 = arith.constant 0 : index
    %c18 = arith.constant 18 : index
    %79 = vector.load %arg9[%c0_75, %c18] : memref<4x290xf32, #tpu.memory_space<vmem>>, vector<4x256xf32>
    %80 = vector.broadcast %32 : vector<1x256xf32> to vector<4x256xf32>
    %81 = arith.mulf %79, %80 : vector<4x256xf32>
    %82 = arith.truncf %81 : vector<4x256xf32> to vector<4x256xbf16>
    %cst_76 = arith.constant dense<0.000000e+00> : vector<8x256xf32>
    %83 = tpu.matmul %14, %82, %cst_76 {dimension_numbers = #tpu.dot_dimension_numbers<[1], [0], [0], [1], [0, 0, 1, 1], [], []>} : vector<8x4xbf16>, vector<4x256xbf16>, vector<8x256xf32> -> vector<8x256xf32>
    %84 = arith.addf %78, %83 : vector<8x256xf32>
    %c0_77 = arith.constant 0 : index
    %c32 = arith.constant 32 : index
    %85 = vector.load %arg9[%c0_77, %c32] : memref<4x290xf32, #tpu.memory_space<vmem>>, vector<4x256xf32>
    %86 = vector.broadcast %34 : vector<1x256xf32> to vector<4x256xf32>
    %87 = arith.mulf %85, %86 : vector<4x256xf32>
    %88 = arith.truncf %87 : vector<4x256xf32> to vector<4x256xbf16>
    %cst_78 = arith.constant dense<0.000000e+00> : vector<8x256xf32>
    %89 = tpu.matmul %16, %88, %cst_78 {dimension_numbers = #tpu.dot_dimension_numbers<[1], [0], [0], [1], [0, 0, 1, 1], [], []>} : vector<8x4xbf16>, vector<4x256xbf16>, vector<8x256xf32> -> vector<8x256xf32>
    %90 = arith.addf %84, %89 : vector<8x256xf32>
    %c0_79 = arith.constant 0 : index
    %c33 = arith.constant 33 : index
    %91 = vector.load %arg9[%c0_79, %c33] : memref<4x290xf32, #tpu.memory_space<vmem>>, vector<4x256xf32>
    %92 = vector.broadcast %36 : vector<1x256xf32> to vector<4x256xf32>
    %93 = arith.mulf %91, %92 : vector<4x256xf32>
    %94 = arith.truncf %93 : vector<4x256xf32> to vector<4x256xbf16>
    %cst_80 = arith.constant dense<0.000000e+00> : vector<8x256xf32>
    %95 = tpu.matmul %18, %94, %cst_80 {dimension_numbers = #tpu.dot_dimension_numbers<[1], [0], [0], [1], [0, 0, 1, 1], [], []>} : vector<8x4xbf16>, vector<4x256xbf16>, vector<8x256xf32> -> vector<8x256xf32>
    %96 = arith.addf %90, %95 : vector<8x256xf32>
    %c0_81 = arith.constant 0 : index
    %c34 = arith.constant 34 : index
    %97 = vector.load %arg9[%c0_81, %c34] : memref<4x290xf32, #tpu.memory_space<vmem>>, vector<4x256xf32>
    %98 = vector.broadcast %38 : vector<1x256xf32> to vector<4x256xf32>
    %99 = arith.mulf %97, %98 : vector<4x256xf32>
    %100 = arith.truncf %99 : vector<4x256xf32> to vector<4x256xbf16>
    %cst_82 = arith.constant dense<0.000000e+00> : vector<8x256xf32>
    %101 = tpu.matmul %20, %100, %cst_82 {dimension_numbers = #tpu.dot_dimension_numbers<[1], [0], [0], [1], [0, 0, 1, 1], [], []>} : vector<8x4xbf16>, vector<4x256xbf16>, vector<8x256xf32> -> vector<8x256xf32>
    %102 = arith.addf %96, %101 : vector<8x256xf32>
    %103 = vector.broadcast %0 : vector<8x1xf32> to vector<8x256xf32>
    %104 = arith.addf %102, %103 : vector<8x256xf32>
    %c1_83 = arith.constant 1 : index
    %c0_84 = arith.constant 0 : index
    %c0_85 = arith.constant 0 : index
    %105 = vector.load %arg1[%c1_83, %c0_84, %c0_85] : memref<2x4x256xf32, #tpu.memory_space<vmem>>, vector<1x4x256xf32>
    %106 = vector.shape_cast %105 : vector<1x4x256xf32> to vector<4x256xf32>
    %c1_86 = arith.constant 1 : index
    %c0_87 = arith.constant 0 : index
    %c0_88 = arith.constant 0 : index
    %107 = vector.load %arg2[%c1_86, %c0_87, %c0_88] : memref<2x4x1xf32, #tpu.memory_space<vmem>>, vector<1x4x1xf32>
    %108 = vector.shape_cast %107 : vector<1x4x1xf32> to vector<4x1xf32>
    %109 = vector.broadcast %108 : vector<4x1xf32> to vector<4x256xf32>
    %110 = arith.addf %106, %109 : vector<4x256xf32>
    %c0_89 = arith.constant 0 : index
    %c17_90 = arith.constant 17 : index
    %111 = vector.load %arg9[%c0_89, %c17_90] : memref<4x290xf32, #tpu.memory_space<vmem>>, vector<4x256xf32>
    tpu.vector_store %arg9[%c0_89, %c17_90], %110 {strides = array<i32>} : memref<4x290xf32, #tpu.memory_space<vmem>>, vector<4x256xf32>,
    %cst_91 = arith.constant 0.000000e+00 : f32
    %112 = vector.broadcast %cst_91 : f32 to vector<8x256xf32>
    %c0_92 = arith.constant 0 : index
    %c0_93 = arith.constant 0 : index
    %113 = vector.load %arg9[%c0_92, %c0_93] : memref<4x290xf32, #tpu.memory_space<vmem>>, vector<4x256xf32>
    %114 = vector.broadcast %22 : vector<1x256xf32> to vector<4x256xf32>
    %115 = arith.mulf %113, %114 : vector<4x256xf32>
    %116 = arith.truncf %115 : vector<4x256xf32> to vector<4x256xbf16>
    %cst_94 = arith.constant dense<0.000000e+00> : vector<8x256xf32>
    %117 = tpu.matmul %4, %116, %cst_94 {dimension_numbers = #tpu.dot_dimension_numbers<[1], [0], [0], [1], [0, 0, 1, 1], [], []>} : vector<8x4xbf16>, vector<4x256xbf16>, vector<8x256xf32> -> vector<8x256xf32>
    %118 = arith.addf %112, %117 : vector<8x256xf32>
    %c0_95 = arith.constant 0 : index
    %c1_96 = arith.constant 1 : index
    %119 = vector.load %arg9[%c0_95, %c1_96] : memref<4x290xf32, #tpu.memory_space<vmem>>, vector<4x256xf32>
    %120 = vector.broadcast %24 : vector<1x256xf32> to vector<4x256xf32>
    %121 = arith.mulf %119, %120 : vector<4x256xf32>
    %122 = arith.truncf %121 : vector<4x256xf32> to vector<4x256xbf16>
    %cst_97 = arith.constant dense<0.000000e+00> : vector<8x256xf32>
    %123 = tpu.matmul %6, %122, %cst_97 {dimension_numbers = #tpu.dot_dimension_numbers<[1], [0], [0], [1], [0, 0, 1, 1], [], []>} : vector<8x4xbf16>, vector<4x256xbf16>, vector<8x256xf32> -> vector<8x256xf32>
    %124 = arith.addf %118, %123 : vector<8x256xf32>
    %c0_98 = arith.constant 0 : index
    %c2_99 = arith.constant 2 : index
    %125 = vector.load %arg9[%c0_98, %c2_99] : memref<4x290xf32, #tpu.memory_space<vmem>>, vector<4x256xf32>
    %126 = vector.broadcast %26 : vector<1x256xf32> to vector<4x256xf32>
    %127 = arith.mulf %125, %126 : vector<4x256xf32>
    %128 = arith.truncf %127 : vector<4x256xf32> to vector<4x256xbf16>
    %cst_100 = arith.constant dense<0.000000e+00> : vector<8x256xf32>
    %129 = tpu.matmul %8, %128, %cst_100 {dimension_numbers = #tpu.dot_dimension_numbers<[1], [0], [0], [1], [0, 0, 1, 1], [], []>} : vector<8x4xbf16>, vector<4x256xbf16>, vector<8x256xf32> -> vector<8x256xf32>
    %130 = arith.addf %124, %129 : vector<8x256xf32>
    %c0_101 = arith.constant 0 : index
    %c16_102 = arith.constant 16 : index
    %131 = vector.load %arg9[%c0_101, %c16_102] : memref<4x290xf32, #tpu.memory_space<vmem>>, vector<4x256xf32>
    %132 = vector.broadcast %28 : vector<1x256xf32> to vector<4x256xf32>
    %133 = arith.mulf %131, %132 : vector<4x256xf32>
    %134 = arith.truncf %133 : vector<4x256xf32> to vector<4x256xbf16>
    %cst_103 = arith.constant dense<0.000000e+00> : vector<8x256xf32>
    %135 = tpu.matmul %10, %134, %cst_103 {dimension_numbers = #tpu.dot_dimension_numbers<[1], [0], [0], [1], [0, 0, 1, 1], [], []>} : vector<8x4xbf16>, vector<4x256xbf16>, vector<8x256xf32> -> vector<8x256xf32>
    %136 = arith.addf %130, %135 : vector<8x256xf32>
    %c0_104 = arith.constant 0 : index
    %c17_105 = arith.constant 17 : index
    %137 = vector.load %arg9[%c0_104, %c17_105] : memref<4x290xf32, #tpu.memory_space<vmem>>, vector<4x256xf32>
    %138 = vector.broadcast %30 : vector<1x256xf32> to vector<4x256xf32>
    %139 = arith.mulf %137, %138 : vector<4x256xf32>
    %140 = arith.truncf %139 : vector<4x256xf32> to vector<4x256xbf16>
    %cst_106 = arith.constant dense<0.000000e+00> : vector<8x256xf32>
    %141 = tpu.matmul %12, %140, %cst_106 {dimension_numbers = #tpu.dot_dimension_numbers<[1], [0], [0], [1], [0, 0, 1, 1], [], []>} : vector<8x4xbf16>, vector<4x256xbf16>, vector<8x256xf32> -> vector<8x256xf32>
    %142 = arith.addf %136, %141 : vector<8x256xf32>
    %c0_107 = arith.constant 0 : index
    %c18_108 = arith.constant 18 : index
    %143 = vector.load %arg9[%c0_107, %c18_108] : memref<4x290xf32, #tpu.memory_space<vmem>>, vector<4x256xf32>
    %144 = vector.broadcast %32 : vector<1x256xf32> to vector<4x256xf32>
    %145 = arith.mulf %143, %144 : vector<4x256xf32>
    %146 = arith.truncf %145 : vector<4x256xf32> to vector<4x256xbf16>
    %cst_109 = arith.constant dense<0.000000e+00> : vector<8x256xf32>
    %147 = tpu.matmul %14, %146, %cst_109 {dimension_numbers = #tpu.dot_dimension_numbers<[1], [0], [0], [1], [0, 0, 1, 1], [], []>} : vector<8x4xbf16>, vector<4x256xbf16>, vector<8x256xf32> -> vector<8x256xf32>
    %148 = arith.addf %142, %147 : vector<8x256xf32>
    %c0_110 = arith.constant 0 : index
    %c32_111 = arith.constant 32 : index
    %149 = vector.load %arg9[%c0_110, %c32_111] : memref<4x290xf32, #tpu.memory_space<vmem>>, vector<4x256xf32>
    %150 = vector.broadcast %34 : vector<1x256xf32> to vector<4x256xf32>
    %151 = arith.mulf %149, %150 : vector<4x256xf32>
    %152 = arith.truncf %151 : vector<4x256xf32> to vector<4x256xbf16>
    %cst_112 = arith.constant dense<0.000000e+00> : vector<8x256xf32>
    %153 = tpu.matmul %16, %152, %cst_112 {dimension_numbers = #tpu.dot_dimension_numbers<[1], [0], [0], [1], [0, 0, 1, 1], [], []>} : vector<8x4xbf16>, vector<4x256xbf16>, vector<8x256xf32> -> vector<8x256xf32>
    %154 = arith.addf %148, %153 : vector<8x256xf32>
    %c0_113 = arith.constant 0 : index
    %c33_114 = arith.constant 33 : index
    %155 = vector.load %arg9[%c0_113, %c33_114] : memref<4x290xf32, #tpu.memory_space<vmem>>, vector<4x256xf32>
    %156 = vector.broadcast %36 : vector<1x256xf32> to vector<4x256xf32>
    %157 = arith.mulf %155, %156 : vector<4x256xf32>
    %158 = arith.truncf %157 : vector<4x256xf32> to vector<4x256xbf16>
    %cst_115 = arith.constant dense<0.000000e+00> : vector<8x256xf32>
    %159 = tpu.matmul %18, %158, %cst_115 {dimension_numbers = #tpu.dot_dimension_numbers<[1], [0], [0], [1], [0, 0, 1, 1], [], []>} : vector<8x4xbf16>, vector<4x256xbf16>, vector<8x256xf32> -> vector<8x256xf32>
    %160 = arith.addf %154, %159 : vector<8x256xf32>
    %c0_116 = arith.constant 0 : index
    %c34_117 = arith.constant 34 : index
    %161 = vector.load %arg9[%c0_116, %c34_117] : memref<4x290xf32, #tpu.memory_space<vmem>>, vector<4x256xf32>
    %162 = vector.broadcast %38 : vector<1x256xf32> to vector<4x256xf32>
    %163 = arith.mulf %161, %162 : vector<4x256xf32>
    %164 = arith.truncf %163 : vector<4x256xf32> to vector<4x256xbf16>
    %cst_118 = arith.constant dense<0.000000e+00> : vector<8x256xf32>
    %165 = tpu.matmul %20, %164, %cst_118 {dimension_numbers = #tpu.dot_dimension_numbers<[1], [0], [0], [1], [0, 0, 1, 1], [], []>} : vector<8x4xbf16>, vector<4x256xbf16>, vector<8x256xf32> -> vector<8x256xf32>
    %166 = arith.addf %160, %165 : vector<8x256xf32>
    %167 = vector.broadcast %0 : vector<8x1xf32> to vector<8x256xf32>
    %168 = arith.addf %166, %167 : vector<8x256xf32>
    %cst_119 = arith.constant 0.000000e+00 : f32
    %169 = vector.broadcast %cst_119 : f32 to vector<8x1xf32>
    %cst_120 = arith.constant dense<0.000000e+00> : vector<8xf32>
    %170 = vector.multi_reduction <add>, %104, %cst_120 [1] : vector<8x256xf32> to vector<8xf32>
    %171 = vector.shape_cast %170 : vector<8xf32> to vector<8x1xf32>
    %172 = arith.addf %169, %171 : vector<8x1xf32>
    %cst_121 = arith.constant dense<0.000000e+00> : vector<8xf32>
    %173 = vector.multi_reduction <add>, %168, %cst_121 [1] : vector<8x256xf32> to vector<8xf32>
    %174 = vector.shape_cast %173 : vector<8xf32> to vector<8x1xf32>
    %175 = arith.addf %172, %174 : vector<8x1xf32>
    %cst_122 = arith.constant 0.001953125 : f32
    %176 = vector.broadcast %cst_122 : f32 to vector<8x1xf32>
    %177 = arith.mulf %175, %176 : vector<8x1xf32>
    %cst_123 = arith.constant 0.000000e+00 : f32
    %178 = vector.broadcast %cst_123 : f32 to vector<8x1xf32>
    %179 = vector.broadcast %177 : vector<8x1xf32> to vector<8x256xf32>
    %180 = arith.subf %104, %179 : vector<8x256xf32>
    %181 = arith.mulf %180, %180 : vector<8x256xf32>
    %cst_124 = arith.constant dense<0.000000e+00> : vector<8xf32>
    %182 = vector.multi_reduction <add>, %181, %cst_124 [1] : vector<8x256xf32> to vector<8xf32>
    %183 = vector.shape_cast %182 : vector<8xf32> to vector<8x1xf32>
    %184 = arith.addf %178, %183 : vector<8x1xf32>
    %185 = vector.broadcast %177 : vector<8x1xf32> to vector<8x256xf32>
    %186 = arith.subf %168, %185 : vector<8x256xf32>
    %187 = arith.mulf %186, %186 : vector<8x256xf32>
    %cst_125 = arith.constant dense<0.000000e+00> : vector<8xf32>
    %188 = vector.multi_reduction <add>, %187, %cst_125 [1] : vector<8x256xf32> to vector<8xf32>
    %189 = vector.shape_cast %188 : vector<8xf32> to vector<8x1xf32>
    %190 = arith.addf %184, %189 : vector<8x1xf32>
    %cst_126 = arith.constant 0.001953125 : f32
    %191 = vector.broadcast %cst_126 : f32 to vector<8x1xf32>
    %192 = arith.mulf %190, %191 : vector<8x1xf32>
    %cst_127 = arith.constant 9.99999974E-6 : f32
    %193 = vector.broadcast %cst_127 : f32 to vector<8x1xf32>
    %194 = arith.addf %192, %193 : vector<8x1xf32>
    %195 = math.rsqrt %194 : vector<8x1xf32>
    %196 = arith.mulf %195, %1 : vector<8x1xf32>
    %197 = vector.broadcast %177 : vector<8x1xf32> to vector<8x256xf32>
    %198 = arith.subf %104, %197 : vector<8x256xf32>
    %199 = vector.broadcast %196 : vector<8x1xf32> to vector<8x256xf32>
    %200 = arith.mulf %198, %199 : vector<8x256xf32>
    %201 = vector.broadcast %2 : vector<8x1xf32> to vector<8x256xf32>
    %202 = arith.addf %200, %201 : vector<8x256xf32>
    %cst_128 = arith.constant 0.000000e+00 : f32
    %203 = vector.broadcast %cst_128 : f32 to vector<8x256xf32>
    %204 = arith.maximumf %202, %203 : vector<8x256xf32>
    %c0_129 = arith.constant 0 : index
    %c0_130 = arith.constant 0 : index
    %c0_131 = arith.constant 0 : index
    %205 = vector.load %arg8[%c0_129, %c0_130, %c0_131] : memref<2x8x256xf32, #tpu.memory_space<vmem>>, vector<1x8x256xf32>
    %206 = vector.shape_cast %205 : vector<1x8x256xf32> to vector<8x256xf32>
    %207 = vector.shape_cast %204 : vector<8x256xf32> to vector<1x8x256xf32>
    tpu.vector_store %arg8[%c0_129, %c0_130, %c0_131], %207 {strides = array<i32>} : memref<2x8x256xf32, #tpu.memory_space<vmem>>, vector<1x8x256xf32>,
    %208 = vector.broadcast %177 : vector<8x1xf32> to vector<8x256xf32>
    %209 = arith.subf %168, %208 : vector<8x256xf32>
    %210 = vector.broadcast %196 : vector<8x1xf32> to vector<8x256xf32>
    %211 = arith.mulf %209, %210 : vector<8x256xf32>
    %212 = vector.broadcast %2 : vector<8x1xf32> to vector<8x256xf32>
    %213 = arith.addf %211, %212 : vector<8x256xf32>
    %cst_132 = arith.constant 0.000000e+00 : f32
    %214 = vector.broadcast %cst_132 : f32 to vector<8x256xf32>
    %215 = arith.maximumf %213, %214 : vector<8x256xf32>
    %c1_133 = arith.constant 1 : index
    %c0_134 = arith.constant 0 : index
    %c0_135 = arith.constant 0 : index
    %216 = vector.load %arg8[%c1_133, %c0_134, %c0_135] : memref<2x8x256xf32, #tpu.memory_space<vmem>>, vector<1x8x256xf32>
    %217 = vector.shape_cast %216 : vector<1x8x256xf32> to vector<8x256xf32>
    %218 = vector.shape_cast %215 : vector<8x256xf32> to vector<1x8x256xf32>
    tpu.vector_store %arg8[%c1_133, %c0_134, %c0_135], %218 {strides = array<i32>} : memref<2x8x256xf32, #tpu.memory_space<vmem>>, vector<1x8x256xf32>,
    return
  }
  func.func @transform_0(%arg0: i32) -> (i32, i32, i32) {
    %c0_i32 = arith.constant 0 : i32
    %c0_i32_0 = arith.constant 0 : i32
    %c0_i32_1 = arith.constant 0 : i32
    %c0_i32_2 = arith.constant 0 : i32
    return %c0_i32, %c0_i32_0, %c0_i32_1 : i32, i32, i32
  }
  func.func @transform_1(%arg0: i32) -> (i32, i32, i32) {
    %c0_i32 = arith.constant 0 : i32
    %c0_i32_0 = arith.constant 0 : i32
    %c0_i32_1 = arith.constant 0 : i32
    %c0_i32_2 = arith.constant 0 : i32
    return %c0_i32, %c0_i32_0, %c0_i32_1 : i32, i32, i32
  }
  func.func @transform_2(%arg0: i32) -> (i32, i32, i32) {
    %c0_i32 = arith.constant 0 : i32
    %c0_i32_0 = arith.constant 0 : i32
    %c0_i32_1 = arith.constant 0 : i32
    %c0_i32_2 = arith.constant 0 : i32
    return %c0_i32, %c0_i32_0, %c0_i32_1 : i32, i32, i32
  }
  func.func @transform_3(%arg0: i32) -> (i32, i32) {
    %c0_i32 = arith.constant 0 : i32
    %c0_i32_0 = arith.constant 0 : i32
    %c0_i32_1 = arith.constant 0 : i32
    return %c0_i32, %c0_i32_0 : i32, i32
  }
  func.func @transform_4(%arg0: i32) -> (i32, i32) {
    %c0_i32 = arith.constant 0 : i32
    %c0_i32_0 = arith.constant 0 : i32
    %c0_i32_1 = arith.constant 0 : i32
    return %c0_i32, %c0_i32_0 : i32, i32
  }
  func.func @transform_5(%arg0: i32) -> (i32, i32) {
    %c0_i32 = arith.constant 0 : i32
    %c0_i32_0 = arith.constant 0 : i32
    %c0_i32_1 = arith.constant 0 : i32
    return %c0_i32, %c0_i32_0 : i32, i32
  }
  func.func @transform_6(%arg0: i32) -> (i32, i32, i32) {
    %c0_i32 = arith.constant 0 : i32
    %c0_i32_0 = arith.constant 0 : i32
    %c0_i32_1 = arith.constant 0 : i32
    %c0_i32_2 = arith.constant 0 : i32
    return %c0_i32, %c0_i32_0, %c0_i32_1 : i32, i32, i32
  }
  func.func @transform_7(%arg0: i32) -> (i32, i32, i32) {
    %c0_i32 = arith.constant 0 : i32
    %c0_i32_0 = arith.constant 0 : i32
    %c0_i32_1 = arith.constant 0 : i32
    %c0_i32_2 = arith.constant 0 : i32
    return %c0_i32, %c0_i32_0, %c0_i32_1 : i32, i32, i32
  }
}

module attributes {stable_mosaic.version = 11 : i64} {
  func.func @conv_block_kernel(%arg0: i32, %arg1: memref<2x8x256xf32, #tpu.memory_space<vmem>>, %arg2: memref<2x8x1xf32, #tpu.memory_space<vmem>>, %arg3: memref<9x8x8xbf16, #tpu.memory_space<vmem>>, %arg4: memref<8x1xf32, #tpu.memory_space<vmem>>, %arg5: memref<8x1xf32, #tpu.memory_space<vmem>>, %arg6: memref<8x1xf32, #tpu.memory_space<vmem>>, %arg7: memref<9x1x256xf32, #tpu.memory_space<vmem>>, %arg8: memref<256x64xf32, #tpu.memory_space<vmem>>, %arg9: memref<2x8x256xf32, #tpu.memory_space<vmem>>, %arg10: memref<2x8x64xf32, #tpu.memory_space<vmem>>, %arg11: memref<8x290xf32, #tpu.memory_space<vmem>>, %arg12: memref<8x274xf32, #tpu.memory_space<vmem>>) attributes {dimension_semantics = [#tpu.dimension_semantics<arbitrary>], iteration_bounds = array<i64: 1>, scalar_prefetch = 0 : i64, scratch_operands = 2 : i64, tpu.core_type = #tpu.core_type<tc>, window_params = [{pipeline_mode = #tpu.pipeline_mode<synchronous>, transform_indices = @transform_0, window_bounds = array<i64: 2, 8, 256>}, {pipeline_mode = #tpu.pipeline_mode<synchronous>, transform_indices = @transform_1, window_bounds = array<i64: 2, 8, 1>}, {pipeline_mode = #tpu.pipeline_mode<synchronous>, transform_indices = @transform_2, window_bounds = array<i64: 9, 8, 8>}, {pipeline_mode = #tpu.pipeline_mode<synchronous>, transform_indices = @transform_3, window_bounds = array<i64: 8, 1>}, {pipeline_mode = #tpu.pipeline_mode<synchronous>, transform_indices = @transform_4, window_bounds = array<i64: 8, 1>}, {pipeline_mode = #tpu.pipeline_mode<synchronous>, transform_indices = @transform_5, window_bounds = array<i64: 8, 1>}, {pipeline_mode = #tpu.pipeline_mode<synchronous>, transform_indices = @transform_6, window_bounds = array<i64: 9, 1, 256>}, {pipeline_mode = #tpu.pipeline_mode<synchronous>, transform_indices = @transform_7, window_bounds = array<i64: 256, 64>}, {pipeline_mode = #tpu.pipeline_mode<synchronous>, transform_indices = @transform_8, window_bounds = array<i64: 2, 8, 256>}, {pipeline_mode = #tpu.pipeline_mode<synchronous>, transform_indices = @transform_9, window_bounds = array<i64: 2, 8, 64>}]} {
    %c0 = arith.constant 0 : index
    %c0_0 = arith.constant 0 : index
    %0 = vector.load %arg4[%c0, %c0_0] : memref<8x1xf32, #tpu.memory_space<vmem>>, vector<8x1xf32>
    %c0_1 = arith.constant 0 : index
    %c0_2 = arith.constant 0 : index
    %1 = vector.load %arg5[%c0_1, %c0_2] : memref<8x1xf32, #tpu.memory_space<vmem>>, vector<8x1xf32>
    %c0_3 = arith.constant 0 : index
    %c0_4 = arith.constant 0 : index
    %2 = vector.load %arg6[%c0_3, %c0_4] : memref<8x1xf32, #tpu.memory_space<vmem>>, vector<8x1xf32>
    %c0_5 = arith.constant 0 : index
    %c0_6 = arith.constant 0 : index
    %c0_7 = arith.constant 0 : index
    %3 = vector.load %arg3[%c0_5, %c0_6, %c0_7] : memref<9x8x8xbf16, #tpu.memory_space<vmem>>, vector<1x8x8xbf16>
    %4 = vector.shape_cast %3 : vector<1x8x8xbf16> to vector<8x8xbf16>
    %c1 = arith.constant 1 : index
    %c0_8 = arith.constant 0 : index
    %c0_9 = arith.constant 0 : index
    %5 = vector.load %arg3[%c1, %c0_8, %c0_9] : memref<9x8x8xbf16, #tpu.memory_space<vmem>>, vector<1x8x8xbf16>
    %6 = vector.shape_cast %5 : vector<1x8x8xbf16> to vector<8x8xbf16>
    %c2 = arith.constant 2 : index
    %c0_10 = arith.constant 0 : index
    %c0_11 = arith.constant 0 : index
    %7 = vector.load %arg3[%c2, %c0_10, %c0_11] : memref<9x8x8xbf16, #tpu.memory_space<vmem>>, vector<1x8x8xbf16>
    %8 = vector.shape_cast %7 : vector<1x8x8xbf16> to vector<8x8xbf16>
    %c3 = arith.constant 3 : index
    %c0_12 = arith.constant 0 : index
    %c0_13 = arith.constant 0 : index
    %9 = vector.load %arg3[%c3, %c0_12, %c0_13] : memref<9x8x8xbf16, #tpu.memory_space<vmem>>, vector<1x8x8xbf16>
    %10 = vector.shape_cast %9 : vector<1x8x8xbf16> to vector<8x8xbf16>
    %c4 = arith.constant 4 : index
    %c0_14 = arith.constant 0 : index
    %c0_15 = arith.constant 0 : index
    %11 = vector.load %arg3[%c4, %c0_14, %c0_15] : memref<9x8x8xbf16, #tpu.memory_space<vmem>>, vector<1x8x8xbf16>
    %12 = vector.shape_cast %11 : vector<1x8x8xbf16> to vector<8x8xbf16>
    %c5 = arith.constant 5 : index
    %c0_16 = arith.constant 0 : index
    %c0_17 = arith.constant 0 : index
    %13 = vector.load %arg3[%c5, %c0_16, %c0_17] : memref<9x8x8xbf16, #tpu.memory_space<vmem>>, vector<1x8x8xbf16>
    %14 = vector.shape_cast %13 : vector<1x8x8xbf16> to vector<8x8xbf16>
    %c6 = arith.constant 6 : index
    %c0_18 = arith.constant 0 : index
    %c0_19 = arith.constant 0 : index
    %15 = vector.load %arg3[%c6, %c0_18, %c0_19] : memref<9x8x8xbf16, #tpu.memory_space<vmem>>, vector<1x8x8xbf16>
    %16 = vector.shape_cast %15 : vector<1x8x8xbf16> to vector<8x8xbf16>
    %c7 = arith.constant 7 : index
    %c0_20 = arith.constant 0 : index
    %c0_21 = arith.constant 0 : index
    %17 = vector.load %arg3[%c7, %c0_20, %c0_21] : memref<9x8x8xbf16, #tpu.memory_space<vmem>>, vector<1x8x8xbf16>
    %18 = vector.shape_cast %17 : vector<1x8x8xbf16> to vector<8x8xbf16>
    %c8 = arith.constant 8 : index
    %c0_22 = arith.constant 0 : index
    %c0_23 = arith.constant 0 : index
    %19 = vector.load %arg3[%c8, %c0_22, %c0_23] : memref<9x8x8xbf16, #tpu.memory_space<vmem>>, vector<1x8x8xbf16>
    %20 = vector.shape_cast %19 : vector<1x8x8xbf16> to vector<8x8xbf16>
    %c0_24 = arith.constant 0 : index
    %c0_25 = arith.constant 0 : index
    %c0_26 = arith.constant 0 : index
    %21 = vector.load %arg7[%c0_24, %c0_25, %c0_26] : memref<9x1x256xf32, #tpu.memory_space<vmem>>, vector<1x1x256xf32>
    %22 = vector.shape_cast %21 : vector<1x1x256xf32> to vector<1x256xf32>
    %c1_27 = arith.constant 1 : index
    %c0_28 = arith.constant 0 : index
    %c0_29 = arith.constant 0 : index
    %23 = vector.load %arg7[%c1_27, %c0_28, %c0_29] : memref<9x1x256xf32, #tpu.memory_space<vmem>>, vector<1x1x256xf32>
    %24 = vector.shape_cast %23 : vector<1x1x256xf32> to vector<1x256xf32>
    %c2_30 = arith.constant 2 : index
    %c0_31 = arith.constant 0 : index
    %c0_32 = arith.constant 0 : index
    %25 = vector.load %arg7[%c2_30, %c0_31, %c0_32] : memref<9x1x256xf32, #tpu.memory_space<vmem>>, vector<1x1x256xf32>
    %26 = vector.shape_cast %25 : vector<1x1x256xf32> to vector<1x256xf32>
    %c3_33 = arith.constant 3 : index
    %c0_34 = arith.constant 0 : index
    %c0_35 = arith.constant 0 : index
    %27 = vector.load %arg7[%c3_33, %c0_34, %c0_35] : memref<9x1x256xf32, #tpu.memory_space<vmem>>, vector<1x1x256xf32>
    %28 = vector.shape_cast %27 : vector<1x1x256xf32> to vector<1x256xf32>
    %c4_36 = arith.constant 4 : index
    %c0_37 = arith.constant 0 : index
    %c0_38 = arith.constant 0 : index
    %29 = vector.load %arg7[%c4_36, %c0_37, %c0_38] : memref<9x1x256xf32, #tpu.memory_space<vmem>>, vector<1x1x256xf32>
    %30 = vector.shape_cast %29 : vector<1x1x256xf32> to vector<1x256xf32>
    %c5_39 = arith.constant 5 : index
    %c0_40 = arith.constant 0 : index
    %c0_41 = arith.constant 0 : index
    %31 = vector.load %arg7[%c5_39, %c0_40, %c0_41] : memref<9x1x256xf32, #tpu.memory_space<vmem>>, vector<1x1x256xf32>
    %32 = vector.shape_cast %31 : vector<1x1x256xf32> to vector<1x256xf32>
    %c6_42 = arith.constant 6 : index
    %c0_43 = arith.constant 0 : index
    %c0_44 = arith.constant 0 : index
    %33 = vector.load %arg7[%c6_42, %c0_43, %c0_44] : memref<9x1x256xf32, #tpu.memory_space<vmem>>, vector<1x1x256xf32>
    %34 = vector.shape_cast %33 : vector<1x1x256xf32> to vector<1x256xf32>
    %c7_45 = arith.constant 7 : index
    %c0_46 = arith.constant 0 : index
    %c0_47 = arith.constant 0 : index
    %35 = vector.load %arg7[%c7_45, %c0_46, %c0_47] : memref<9x1x256xf32, #tpu.memory_space<vmem>>, vector<1x1x256xf32>
    %36 = vector.shape_cast %35 : vector<1x1x256xf32> to vector<1x256xf32>
    %c8_48 = arith.constant 8 : index
    %c0_49 = arith.constant 0 : index
    %c0_50 = arith.constant 0 : index
    %37 = vector.load %arg7[%c8_48, %c0_49, %c0_50] : memref<9x1x256xf32, #tpu.memory_space<vmem>>, vector<1x1x256xf32>
    %38 = vector.shape_cast %37 : vector<1x1x256xf32> to vector<1x256xf32>
    %cst = arith.constant 0.000000e+00 : f32
    %39 = vector.broadcast %cst : f32 to vector<8x290xf32>
    %c0_51 = arith.constant 0 : index
    %c0_52 = arith.constant 0 : index
    %40 = vector.load %arg11[%c0_51, %c0_52] : memref<8x290xf32, #tpu.memory_space<vmem>>, vector<8x290xf32>
    tpu.vector_store %arg11[%c0_51, %c0_52], %39 {strides = array<i32>} : memref<8x290xf32, #tpu.memory_space<vmem>>, vector<8x290xf32>,
    %cst_53 = arith.constant 0.000000e+00 : f32
    %41 = vector.broadcast %cst_53 : f32 to vector<8x274xf32>
    %c0_54 = arith.constant 0 : index
    %c0_55 = arith.constant 0 : index
    %42 = vector.load %arg12[%c0_54, %c0_55] : memref<8x274xf32, #tpu.memory_space<vmem>>, vector<8x274xf32>
    tpu.vector_store %arg12[%c0_54, %c0_55], %41 {strides = array<i32>} : memref<8x274xf32, #tpu.memory_space<vmem>>, vector<8x274xf32>,
    %c0_56 = arith.constant 0 : index
    %c0_57 = arith.constant 0 : index
    %c0_58 = arith.constant 0 : index
    %43 = vector.load %arg1[%c0_56, %c0_57, %c0_58] : memref<2x8x256xf32, #tpu.memory_space<vmem>>, vector<1x8x256xf32>
    %44 = vector.shape_cast %43 : vector<1x8x256xf32> to vector<8x256xf32>
    %c0_59 = arith.constant 0 : index
    %c0_60 = arith.constant 0 : index
    %c0_61 = arith.constant 0 : index
    %45 = vector.load %arg2[%c0_59, %c0_60, %c0_61] : memref<2x8x1xf32, #tpu.memory_space<vmem>>, vector<1x8x1xf32>
    %46 = vector.shape_cast %45 : vector<1x8x1xf32> to vector<8x1xf32>
    %47 = vector.broadcast %46 : vector<8x1xf32> to vector<8x256xf32>
    %48 = arith.addf %44, %47 : vector<8x256xf32>
    %c0_62 = arith.constant 0 : index
    %c17 = arith.constant 17 : index
    %49 = vector.load %arg11[%c0_62, %c17] : memref<8x290xf32, #tpu.memory_space<vmem>>, vector<8x256xf32>
    tpu.vector_store %arg11[%c0_62, %c17], %48 {strides = array<i32>} : memref<8x290xf32, #tpu.memory_space<vmem>>, vector<8x256xf32>,
    %cst_63 = arith.constant 0.000000e+00 : f32
    %50 = vector.broadcast %cst_63 : f32 to vector<8x256xf32>
    %c0_64 = arith.constant 0 : index
    %c0_65 = arith.constant 0 : index
    %51 = vector.load %arg11[%c0_64, %c0_65] : memref<8x290xf32, #tpu.memory_space<vmem>>, vector<8x256xf32>
    %52 = vector.broadcast %22 : vector<1x256xf32> to vector<8x256xf32>
    %53 = arith.mulf %51, %52 : vector<8x256xf32>
    %54 = arith.truncf %53 : vector<8x256xf32> to vector<8x256xbf16>
    %cst_66 = arith.constant dense<0.000000e+00> : vector<8x256xf32>
    %55 = tpu.matmul %4, %54, %cst_66 {dimension_numbers = #tpu.dot_dimension_numbers<[1], [0], [0], [1], [0, 0, 1, 1], [], []>} : vector<8x8xbf16>, vector<8x256xbf16>, vector<8x256xf32> -> vector<8x256xf32>
    %56 = arith.addf %50, %55 : vector<8x256xf32>
    %c0_67 = arith.constant 0 : index
    %c1_68 = arith.constant 1 : index
    %57 = vector.load %arg11[%c0_67, %c1_68] : memref<8x290xf32, #tpu.memory_space<vmem>>, vector<8x256xf32>
    %58 = vector.broadcast %24 : vector<1x256xf32> to vector<8x256xf32>
    %59 = arith.mulf %57, %58 : vector<8x256xf32>
    %60 = arith.truncf %59 : vector<8x256xf32> to vector<8x256xbf16>
    %cst_69 = arith.constant dense<0.000000e+00> : vector<8x256xf32>
    %61 = tpu.matmul %6, %60, %cst_69 {dimension_numbers = #tpu.dot_dimension_numbers<[1], [0], [0], [1], [0, 0, 1, 1], [], []>} : vector<8x8xbf16>, vector<8x256xbf16>, vector<8x256xf32> -> vector<8x256xf32>
    %62 = arith.addf %56, %61 : vector<8x256xf32>
    %c0_70 = arith.constant 0 : index
    %c2_71 = arith.constant 2 : index
    %63 = vector.load %arg11[%c0_70, %c2_71] : memref<8x290xf32, #tpu.memory_space<vmem>>, vector<8x256xf32>
    %64 = vector.broadcast %26 : vector<1x256xf32> to vector<8x256xf32>
    %65 = arith.mulf %63, %64 : vector<8x256xf32>
    %66 = arith.truncf %65 : vector<8x256xf32> to vector<8x256xbf16>
    %cst_72 = arith.constant dense<0.000000e+00> : vector<8x256xf32>
    %67 = tpu.matmul %8, %66, %cst_72 {dimension_numbers = #tpu.dot_dimension_numbers<[1], [0], [0], [1], [0, 0, 1, 1], [], []>} : vector<8x8xbf16>, vector<8x256xbf16>, vector<8x256xf32> -> vector<8x256xf32>
    %68 = arith.addf %62, %67 : vector<8x256xf32>
    %c0_73 = arith.constant 0 : index
    %c16 = arith.constant 16 : index
    %69 = vector.load %arg11[%c0_73, %c16] : memref<8x290xf32, #tpu.memory_space<vmem>>, vector<8x256xf32>
    %70 = vector.broadcast %28 : vector<1x256xf32> to vector<8x256xf32>
    %71 = arith.mulf %69, %70 : vector<8x256xf32>
    %72 = arith.truncf %71 : vector<8x256xf32> to vector<8x256xbf16>
    %cst_74 = arith.constant dense<0.000000e+00> : vector<8x256xf32>
    %73 = tpu.matmul %10, %72, %cst_74 {dimension_numbers = #tpu.dot_dimension_numbers<[1], [0], [0], [1], [0, 0, 1, 1], [], []>} : vector<8x8xbf16>, vector<8x256xbf16>, vector<8x256xf32> -> vector<8x256xf32>
    %74 = arith.addf %68, %73 : vector<8x256xf32>
    %c0_75 = arith.constant 0 : index
    %c17_76 = arith.constant 17 : index
    %75 = vector.load %arg11[%c0_75, %c17_76] : memref<8x290xf32, #tpu.memory_space<vmem>>, vector<8x256xf32>
    %76 = vector.broadcast %30 : vector<1x256xf32> to vector<8x256xf32>
    %77 = arith.mulf %75, %76 : vector<8x256xf32>
    %78 = arith.truncf %77 : vector<8x256xf32> to vector<8x256xbf16>
    %cst_77 = arith.constant dense<0.000000e+00> : vector<8x256xf32>
    %79 = tpu.matmul %12, %78, %cst_77 {dimension_numbers = #tpu.dot_dimension_numbers<[1], [0], [0], [1], [0, 0, 1, 1], [], []>} : vector<8x8xbf16>, vector<8x256xbf16>, vector<8x256xf32> -> vector<8x256xf32>
    %80 = arith.addf %74, %79 : vector<8x256xf32>
    %c0_78 = arith.constant 0 : index
    %c18 = arith.constant 18 : index
    %81 = vector.load %arg11[%c0_78, %c18] : memref<8x290xf32, #tpu.memory_space<vmem>>, vector<8x256xf32>
    %82 = vector.broadcast %32 : vector<1x256xf32> to vector<8x256xf32>
    %83 = arith.mulf %81, %82 : vector<8x256xf32>
    %84 = arith.truncf %83 : vector<8x256xf32> to vector<8x256xbf16>
    %cst_79 = arith.constant dense<0.000000e+00> : vector<8x256xf32>
    %85 = tpu.matmul %14, %84, %cst_79 {dimension_numbers = #tpu.dot_dimension_numbers<[1], [0], [0], [1], [0, 0, 1, 1], [], []>} : vector<8x8xbf16>, vector<8x256xbf16>, vector<8x256xf32> -> vector<8x256xf32>
    %86 = arith.addf %80, %85 : vector<8x256xf32>
    %c0_80 = arith.constant 0 : index
    %c32 = arith.constant 32 : index
    %87 = vector.load %arg11[%c0_80, %c32] : memref<8x290xf32, #tpu.memory_space<vmem>>, vector<8x256xf32>
    %88 = vector.broadcast %34 : vector<1x256xf32> to vector<8x256xf32>
    %89 = arith.mulf %87, %88 : vector<8x256xf32>
    %90 = arith.truncf %89 : vector<8x256xf32> to vector<8x256xbf16>
    %cst_81 = arith.constant dense<0.000000e+00> : vector<8x256xf32>
    %91 = tpu.matmul %16, %90, %cst_81 {dimension_numbers = #tpu.dot_dimension_numbers<[1], [0], [0], [1], [0, 0, 1, 1], [], []>} : vector<8x8xbf16>, vector<8x256xbf16>, vector<8x256xf32> -> vector<8x256xf32>
    %92 = arith.addf %86, %91 : vector<8x256xf32>
    %c0_82 = arith.constant 0 : index
    %c33 = arith.constant 33 : index
    %93 = vector.load %arg11[%c0_82, %c33] : memref<8x290xf32, #tpu.memory_space<vmem>>, vector<8x256xf32>
    %94 = vector.broadcast %36 : vector<1x256xf32> to vector<8x256xf32>
    %95 = arith.mulf %93, %94 : vector<8x256xf32>
    %96 = arith.truncf %95 : vector<8x256xf32> to vector<8x256xbf16>
    %cst_83 = arith.constant dense<0.000000e+00> : vector<8x256xf32>
    %97 = tpu.matmul %18, %96, %cst_83 {dimension_numbers = #tpu.dot_dimension_numbers<[1], [0], [0], [1], [0, 0, 1, 1], [], []>} : vector<8x8xbf16>, vector<8x256xbf16>, vector<8x256xf32> -> vector<8x256xf32>
    %98 = arith.addf %92, %97 : vector<8x256xf32>
    %c0_84 = arith.constant 0 : index
    %c34 = arith.constant 34 : index
    %99 = vector.load %arg11[%c0_84, %c34] : memref<8x290xf32, #tpu.memory_space<vmem>>, vector<8x256xf32>
    %100 = vector.broadcast %38 : vector<1x256xf32> to vector<8x256xf32>
    %101 = arith.mulf %99, %100 : vector<8x256xf32>
    %102 = arith.truncf %101 : vector<8x256xf32> to vector<8x256xbf16>
    %cst_85 = arith.constant dense<0.000000e+00> : vector<8x256xf32>
    %103 = tpu.matmul %20, %102, %cst_85 {dimension_numbers = #tpu.dot_dimension_numbers<[1], [0], [0], [1], [0, 0, 1, 1], [], []>} : vector<8x8xbf16>, vector<8x256xbf16>, vector<8x256xf32> -> vector<8x256xf32>
    %104 = arith.addf %98, %103 : vector<8x256xf32>
    %105 = vector.broadcast %0 : vector<8x1xf32> to vector<8x256xf32>
    %106 = arith.addf %104, %105 : vector<8x256xf32>
    %c1_86 = arith.constant 1 : index
    %c0_87 = arith.constant 0 : index
    %c0_88 = arith.constant 0 : index
    %107 = vector.load %arg1[%c1_86, %c0_87, %c0_88] : memref<2x8x256xf32, #tpu.memory_space<vmem>>, vector<1x8x256xf32>
    %108 = vector.shape_cast %107 : vector<1x8x256xf32> to vector<8x256xf32>
    %c1_89 = arith.constant 1 : index
    %c0_90 = arith.constant 0 : index
    %c0_91 = arith.constant 0 : index
    %109 = vector.load %arg2[%c1_89, %c0_90, %c0_91] : memref<2x8x1xf32, #tpu.memory_space<vmem>>, vector<1x8x1xf32>
    %110 = vector.shape_cast %109 : vector<1x8x1xf32> to vector<8x1xf32>
    %111 = vector.broadcast %110 : vector<8x1xf32> to vector<8x256xf32>
    %112 = arith.addf %108, %111 : vector<8x256xf32>
    %c0_92 = arith.constant 0 : index
    %c17_93 = arith.constant 17 : index
    %113 = vector.load %arg11[%c0_92, %c17_93] : memref<8x290xf32, #tpu.memory_space<vmem>>, vector<8x256xf32>
    tpu.vector_store %arg11[%c0_92, %c17_93], %112 {strides = array<i32>} : memref<8x290xf32, #tpu.memory_space<vmem>>, vector<8x256xf32>,
    %cst_94 = arith.constant 0.000000e+00 : f32
    %114 = vector.broadcast %cst_94 : f32 to vector<8x256xf32>
    %c0_95 = arith.constant 0 : index
    %c0_96 = arith.constant 0 : index
    %115 = vector.load %arg11[%c0_95, %c0_96] : memref<8x290xf32, #tpu.memory_space<vmem>>, vector<8x256xf32>
    %116 = vector.broadcast %22 : vector<1x256xf32> to vector<8x256xf32>
    %117 = arith.mulf %115, %116 : vector<8x256xf32>
    %118 = arith.truncf %117 : vector<8x256xf32> to vector<8x256xbf16>
    %cst_97 = arith.constant dense<0.000000e+00> : vector<8x256xf32>
    %119 = tpu.matmul %4, %118, %cst_97 {dimension_numbers = #tpu.dot_dimension_numbers<[1], [0], [0], [1], [0, 0, 1, 1], [], []>} : vector<8x8xbf16>, vector<8x256xbf16>, vector<8x256xf32> -> vector<8x256xf32>
    %120 = arith.addf %114, %119 : vector<8x256xf32>
    %c0_98 = arith.constant 0 : index
    %c1_99 = arith.constant 1 : index
    %121 = vector.load %arg11[%c0_98, %c1_99] : memref<8x290xf32, #tpu.memory_space<vmem>>, vector<8x256xf32>
    %122 = vector.broadcast %24 : vector<1x256xf32> to vector<8x256xf32>
    %123 = arith.mulf %121, %122 : vector<8x256xf32>
    %124 = arith.truncf %123 : vector<8x256xf32> to vector<8x256xbf16>
    %cst_100 = arith.constant dense<0.000000e+00> : vector<8x256xf32>
    %125 = tpu.matmul %6, %124, %cst_100 {dimension_numbers = #tpu.dot_dimension_numbers<[1], [0], [0], [1], [0, 0, 1, 1], [], []>} : vector<8x8xbf16>, vector<8x256xbf16>, vector<8x256xf32> -> vector<8x256xf32>
    %126 = arith.addf %120, %125 : vector<8x256xf32>
    %c0_101 = arith.constant 0 : index
    %c2_102 = arith.constant 2 : index
    %127 = vector.load %arg11[%c0_101, %c2_102] : memref<8x290xf32, #tpu.memory_space<vmem>>, vector<8x256xf32>
    %128 = vector.broadcast %26 : vector<1x256xf32> to vector<8x256xf32>
    %129 = arith.mulf %127, %128 : vector<8x256xf32>
    %130 = arith.truncf %129 : vector<8x256xf32> to vector<8x256xbf16>
    %cst_103 = arith.constant dense<0.000000e+00> : vector<8x256xf32>
    %131 = tpu.matmul %8, %130, %cst_103 {dimension_numbers = #tpu.dot_dimension_numbers<[1], [0], [0], [1], [0, 0, 1, 1], [], []>} : vector<8x8xbf16>, vector<8x256xbf16>, vector<8x256xf32> -> vector<8x256xf32>
    %132 = arith.addf %126, %131 : vector<8x256xf32>
    %c0_104 = arith.constant 0 : index
    %c16_105 = arith.constant 16 : index
    %133 = vector.load %arg11[%c0_104, %c16_105] : memref<8x290xf32, #tpu.memory_space<vmem>>, vector<8x256xf32>
    %134 = vector.broadcast %28 : vector<1x256xf32> to vector<8x256xf32>
    %135 = arith.mulf %133, %134 : vector<8x256xf32>
    %136 = arith.truncf %135 : vector<8x256xf32> to vector<8x256xbf16>
    %cst_106 = arith.constant dense<0.000000e+00> : vector<8x256xf32>
    %137 = tpu.matmul %10, %136, %cst_106 {dimension_numbers = #tpu.dot_dimension_numbers<[1], [0], [0], [1], [0, 0, 1, 1], [], []>} : vector<8x8xbf16>, vector<8x256xbf16>, vector<8x256xf32> -> vector<8x256xf32>
    %138 = arith.addf %132, %137 : vector<8x256xf32>
    %c0_107 = arith.constant 0 : index
    %c17_108 = arith.constant 17 : index
    %139 = vector.load %arg11[%c0_107, %c17_108] : memref<8x290xf32, #tpu.memory_space<vmem>>, vector<8x256xf32>
    %140 = vector.broadcast %30 : vector<1x256xf32> to vector<8x256xf32>
    %141 = arith.mulf %139, %140 : vector<8x256xf32>
    %142 = arith.truncf %141 : vector<8x256xf32> to vector<8x256xbf16>
    %cst_109 = arith.constant dense<0.000000e+00> : vector<8x256xf32>
    %143 = tpu.matmul %12, %142, %cst_109 {dimension_numbers = #tpu.dot_dimension_numbers<[1], [0], [0], [1], [0, 0, 1, 1], [], []>} : vector<8x8xbf16>, vector<8x256xbf16>, vector<8x256xf32> -> vector<8x256xf32>
    %144 = arith.addf %138, %143 : vector<8x256xf32>
    %c0_110 = arith.constant 0 : index
    %c18_111 = arith.constant 18 : index
    %145 = vector.load %arg11[%c0_110, %c18_111] : memref<8x290xf32, #tpu.memory_space<vmem>>, vector<8x256xf32>
    %146 = vector.broadcast %32 : vector<1x256xf32> to vector<8x256xf32>
    %147 = arith.mulf %145, %146 : vector<8x256xf32>
    %148 = arith.truncf %147 : vector<8x256xf32> to vector<8x256xbf16>
    %cst_112 = arith.constant dense<0.000000e+00> : vector<8x256xf32>
    %149 = tpu.matmul %14, %148, %cst_112 {dimension_numbers = #tpu.dot_dimension_numbers<[1], [0], [0], [1], [0, 0, 1, 1], [], []>} : vector<8x8xbf16>, vector<8x256xbf16>, vector<8x256xf32> -> vector<8x256xf32>
    %150 = arith.addf %144, %149 : vector<8x256xf32>
    %c0_113 = arith.constant 0 : index
    %c32_114 = arith.constant 32 : index
    %151 = vector.load %arg11[%c0_113, %c32_114] : memref<8x290xf32, #tpu.memory_space<vmem>>, vector<8x256xf32>
    %152 = vector.broadcast %34 : vector<1x256xf32> to vector<8x256xf32>
    %153 = arith.mulf %151, %152 : vector<8x256xf32>
    %154 = arith.truncf %153 : vector<8x256xf32> to vector<8x256xbf16>
    %cst_115 = arith.constant dense<0.000000e+00> : vector<8x256xf32>
    %155 = tpu.matmul %16, %154, %cst_115 {dimension_numbers = #tpu.dot_dimension_numbers<[1], [0], [0], [1], [0, 0, 1, 1], [], []>} : vector<8x8xbf16>, vector<8x256xbf16>, vector<8x256xf32> -> vector<8x256xf32>
    %156 = arith.addf %150, %155 : vector<8x256xf32>
    %c0_116 = arith.constant 0 : index
    %c33_117 = arith.constant 33 : index
    %157 = vector.load %arg11[%c0_116, %c33_117] : memref<8x290xf32, #tpu.memory_space<vmem>>, vector<8x256xf32>
    %158 = vector.broadcast %36 : vector<1x256xf32> to vector<8x256xf32>
    %159 = arith.mulf %157, %158 : vector<8x256xf32>
    %160 = arith.truncf %159 : vector<8x256xf32> to vector<8x256xbf16>
    %cst_118 = arith.constant dense<0.000000e+00> : vector<8x256xf32>
    %161 = tpu.matmul %18, %160, %cst_118 {dimension_numbers = #tpu.dot_dimension_numbers<[1], [0], [0], [1], [0, 0, 1, 1], [], []>} : vector<8x8xbf16>, vector<8x256xbf16>, vector<8x256xf32> -> vector<8x256xf32>
    %162 = arith.addf %156, %161 : vector<8x256xf32>
    %c0_119 = arith.constant 0 : index
    %c34_120 = arith.constant 34 : index
    %163 = vector.load %arg11[%c0_119, %c34_120] : memref<8x290xf32, #tpu.memory_space<vmem>>, vector<8x256xf32>
    %164 = vector.broadcast %38 : vector<1x256xf32> to vector<8x256xf32>
    %165 = arith.mulf %163, %164 : vector<8x256xf32>
    %166 = arith.truncf %165 : vector<8x256xf32> to vector<8x256xbf16>
    %cst_121 = arith.constant dense<0.000000e+00> : vector<8x256xf32>
    %167 = tpu.matmul %20, %166, %cst_121 {dimension_numbers = #tpu.dot_dimension_numbers<[1], [0], [0], [1], [0, 0, 1, 1], [], []>} : vector<8x8xbf16>, vector<8x256xbf16>, vector<8x256xf32> -> vector<8x256xf32>
    %168 = arith.addf %162, %167 : vector<8x256xf32>
    %169 = vector.broadcast %0 : vector<8x1xf32> to vector<8x256xf32>
    %170 = arith.addf %168, %169 : vector<8x256xf32>
    %cst_122 = arith.constant 0.000000e+00 : f32
    %171 = vector.broadcast %cst_122 : f32 to vector<8x1xf32>
    %cst_123 = arith.constant dense<0.000000e+00> : vector<8xf32>
    %172 = vector.multi_reduction <add>, %106, %cst_123 [1] : vector<8x256xf32> to vector<8xf32>
    %173 = vector.shape_cast %172 : vector<8xf32> to vector<8x1xf32>
    %174 = arith.addf %171, %173 : vector<8x1xf32>
    %cst_124 = arith.constant dense<0.000000e+00> : vector<8xf32>
    %175 = vector.multi_reduction <add>, %170, %cst_124 [1] : vector<8x256xf32> to vector<8xf32>
    %176 = vector.shape_cast %175 : vector<8xf32> to vector<8x1xf32>
    %177 = arith.addf %174, %176 : vector<8x1xf32>
    %cst_125 = arith.constant 0.001953125 : f32
    %178 = vector.broadcast %cst_125 : f32 to vector<8x1xf32>
    %179 = arith.mulf %177, %178 : vector<8x1xf32>
    %cst_126 = arith.constant 0.000000e+00 : f32
    %180 = vector.broadcast %cst_126 : f32 to vector<8x1xf32>
    %181 = vector.broadcast %179 : vector<8x1xf32> to vector<8x256xf32>
    %182 = arith.subf %106, %181 : vector<8x256xf32>
    %183 = arith.mulf %182, %182 : vector<8x256xf32>
    %cst_127 = arith.constant dense<0.000000e+00> : vector<8xf32>
    %184 = vector.multi_reduction <add>, %183, %cst_127 [1] : vector<8x256xf32> to vector<8xf32>
    %185 = vector.shape_cast %184 : vector<8xf32> to vector<8x1xf32>
    %186 = arith.addf %180, %185 : vector<8x1xf32>
    %187 = vector.broadcast %179 : vector<8x1xf32> to vector<8x256xf32>
    %188 = arith.subf %170, %187 : vector<8x256xf32>
    %189 = arith.mulf %188, %188 : vector<8x256xf32>
    %cst_128 = arith.constant dense<0.000000e+00> : vector<8xf32>
    %190 = vector.multi_reduction <add>, %189, %cst_128 [1] : vector<8x256xf32> to vector<8xf32>
    %191 = vector.shape_cast %190 : vector<8xf32> to vector<8x1xf32>
    %192 = arith.addf %186, %191 : vector<8x1xf32>
    %cst_129 = arith.constant 0.001953125 : f32
    %193 = vector.broadcast %cst_129 : f32 to vector<8x1xf32>
    %194 = arith.mulf %192, %193 : vector<8x1xf32>
    %cst_130 = arith.constant 9.99999974E-6 : f32
    %195 = vector.broadcast %cst_130 : f32 to vector<8x1xf32>
    %196 = arith.addf %194, %195 : vector<8x1xf32>
    %197 = math.rsqrt %196 : vector<8x1xf32>
    %198 = arith.mulf %197, %1 : vector<8x1xf32>
    %c0_131 = arith.constant 0 : index
    %c0_132 = arith.constant 0 : index
    %199 = vector.load %arg8[%c0_131, %c0_132] : memref<256x64xf32, #tpu.memory_space<vmem>>, vector<256x64xf32>
    %200 = vector.broadcast %179 : vector<8x1xf32> to vector<8x256xf32>
    %201 = arith.subf %106, %200 : vector<8x256xf32>
    %202 = vector.broadcast %198 : vector<8x1xf32> to vector<8x256xf32>
    %203 = arith.mulf %201, %202 : vector<8x256xf32>
    %204 = vector.broadcast %2 : vector<8x1xf32> to vector<8x256xf32>
    %205 = arith.addf %203, %204 : vector<8x256xf32>
    %cst_133 = arith.constant 0.000000e+00 : f32
    %206 = vector.broadcast %cst_133 : f32 to vector<8x256xf32>
    %207 = arith.maximumf %205, %206 : vector<8x256xf32>
    %c0_134 = arith.constant 0 : index
    %c0_135 = arith.constant 0 : index
    %c0_136 = arith.constant 0 : index
    %208 = vector.load %arg9[%c0_134, %c0_135, %c0_136] : memref<2x8x256xf32, #tpu.memory_space<vmem>>, vector<1x8x256xf32>
    %209 = vector.shape_cast %208 : vector<1x8x256xf32> to vector<8x256xf32>
    %210 = vector.shape_cast %207 : vector<8x256xf32> to vector<1x8x256xf32>
    tpu.vector_store %arg9[%c0_134, %c0_135, %c0_136], %210 {strides = array<i32>} : memref<2x8x256xf32, #tpu.memory_space<vmem>>, vector<1x8x256xf32>,
    %c0_137 = arith.constant 0 : index
    %c0_138 = arith.constant 0 : index
    %211 = vector.load %arg12[%c0_137, %c0_138] : memref<8x274xf32, #tpu.memory_space<vmem>>, vector<8x256xf32>
    tpu.vector_store %arg12[%c0_137, %c0_138], %207 {strides = array<i32>} : memref<8x274xf32, #tpu.memory_space<vmem>>, vector<8x256xf32>,
    %c0_139 = arith.constant 0 : index
    %c0_140 = arith.constant 0 : index
    %212 = vector.load %arg12[%c0_139, %c0_140] : memref<8x274xf32, #tpu.memory_space<vmem>>, vector<8x256xf32>
    %c0_141 = arith.constant 0 : index
    %c1_142 = arith.constant 1 : index
    %213 = vector.load %arg12[%c0_141, %c1_142] : memref<8x274xf32, #tpu.memory_space<vmem>>, vector<8x256xf32>
    %214 = arith.maximumf %212, %213 : vector<8x256xf32>
    %c0_143 = arith.constant 0 : index
    %c16_144 = arith.constant 16 : index
    %215 = vector.load %arg12[%c0_143, %c16_144] : memref<8x274xf32, #tpu.memory_space<vmem>>, vector<8x256xf32>
    %c0_145 = arith.constant 0 : index
    %c17_146 = arith.constant 17 : index
    %216 = vector.load %arg12[%c0_145, %c17_146] : memref<8x274xf32, #tpu.memory_space<vmem>>, vector<8x256xf32>
    %217 = arith.maximumf %215, %216 : vector<8x256xf32>
    %218 = arith.maximumf %214, %217 : vector<8x256xf32>
    %cst_147 = arith.constant dense<0.000000e+00> : vector<8x64xf32>
    %219 = tpu.matmul %218, %199, %cst_147 {dimension_numbers = #tpu.dot_dimension_numbers<[1], [0], [0], [1], [0, 0, 1, 1], [], []>} : vector<8x256xf32>, vector<256x64xf32>, vector<8x64xf32> -> vector<8x64xf32>
    %c0_148 = arith.constant 0 : index
    %c0_149 = arith.constant 0 : index
    %c0_150 = arith.constant 0 : index
    %220 = vector.load %arg10[%c0_148, %c0_149, %c0_150] : memref<2x8x64xf32, #tpu.memory_space<vmem>>, vector<1x8x64xf32>
    %221 = vector.shape_cast %220 : vector<1x8x64xf32> to vector<8x64xf32>
    %222 = vector.shape_cast %219 : vector<8x64xf32> to vector<1x8x64xf32>
    tpu.vector_store %arg10[%c0_148, %c0_149, %c0_150], %222 {strides = array<i32>} : memref<2x8x64xf32, #tpu.memory_space<vmem>>, vector<1x8x64xf32>,
    %223 = vector.broadcast %179 : vector<8x1xf32> to vector<8x256xf32>
    %224 = arith.subf %170, %223 : vector<8x256xf32>
    %225 = vector.broadcast %198 : vector<8x1xf32> to vector<8x256xf32>
    %226 = arith.mulf %224, %225 : vector<8x256xf32>
    %227 = vector.broadcast %2 : vector<8x1xf32> to vector<8x256xf32>
    %228 = arith.addf %226, %227 : vector<8x256xf32>
    %cst_151 = arith.constant 0.000000e+00 : f32
    %229 = vector.broadcast %cst_151 : f32 to vector<8x256xf32>
    %230 = arith.maximumf %228, %229 : vector<8x256xf32>
    %c1_152 = arith.constant 1 : index
    %c0_153 = arith.constant 0 : index
    %c0_154 = arith.constant 0 : index
    %231 = vector.load %arg9[%c1_152, %c0_153, %c0_154] : memref<2x8x256xf32, #tpu.memory_space<vmem>>, vector<1x8x256xf32>
    %232 = vector.shape_cast %231 : vector<1x8x256xf32> to vector<8x256xf32>
    %233 = vector.shape_cast %230 : vector<8x256xf32> to vector<1x8x256xf32>
    tpu.vector_store %arg9[%c1_152, %c0_153, %c0_154], %233 {strides = array<i32>} : memref<2x8x256xf32, #tpu.memory_space<vmem>>, vector<1x8x256xf32>,
    %c0_155 = arith.constant 0 : index
    %c0_156 = arith.constant 0 : index
    %234 = vector.load %arg12[%c0_155, %c0_156] : memref<8x274xf32, #tpu.memory_space<vmem>>, vector<8x256xf32>
    tpu.vector_store %arg12[%c0_155, %c0_156], %230 {strides = array<i32>} : memref<8x274xf32, #tpu.memory_space<vmem>>, vector<8x256xf32>,
    %c0_157 = arith.constant 0 : index
    %c0_158 = arith.constant 0 : index
    %235 = vector.load %arg12[%c0_157, %c0_158] : memref<8x274xf32, #tpu.memory_space<vmem>>, vector<8x256xf32>
    %c0_159 = arith.constant 0 : index
    %c1_160 = arith.constant 1 : index
    %236 = vector.load %arg12[%c0_159, %c1_160] : memref<8x274xf32, #tpu.memory_space<vmem>>, vector<8x256xf32>
    %237 = arith.maximumf %235, %236 : vector<8x256xf32>
    %c0_161 = arith.constant 0 : index
    %c16_162 = arith.constant 16 : index
    %238 = vector.load %arg12[%c0_161, %c16_162] : memref<8x274xf32, #tpu.memory_space<vmem>>, vector<8x256xf32>
    %c0_163 = arith.constant 0 : index
    %c17_164 = arith.constant 17 : index
    %239 = vector.load %arg12[%c0_163, %c17_164] : memref<8x274xf32, #tpu.memory_space<vmem>>, vector<8x256xf32>
    %240 = arith.maximumf %238, %239 : vector<8x256xf32>
    %241 = arith.maximumf %237, %240 : vector<8x256xf32>
    %cst_165 = arith.constant dense<0.000000e+00> : vector<8x64xf32>
    %242 = tpu.matmul %241, %199, %cst_165 {dimension_numbers = #tpu.dot_dimension_numbers<[1], [0], [0], [1], [0, 0, 1, 1], [], []>} : vector<8x256xf32>, vector<256x64xf32>, vector<8x64xf32> -> vector<8x64xf32>
    %c1_166 = arith.constant 1 : index
    %c0_167 = arith.constant 0 : index
    %c0_168 = arith.constant 0 : index
    %243 = vector.load %arg10[%c1_166, %c0_167, %c0_168] : memref<2x8x64xf32, #tpu.memory_space<vmem>>, vector<1x8x64xf32>
    %244 = vector.shape_cast %243 : vector<1x8x64xf32> to vector<8x64xf32>
    %245 = vector.shape_cast %242 : vector<8x64xf32> to vector<1x8x64xf32>
    tpu.vector_store %arg10[%c1_166, %c0_167, %c0_168], %245 {strides = array<i32>} : memref<2x8x64xf32, #tpu.memory_space<vmem>>, vector<1x8x64xf32>,
    return
  }
  func.func @transform_0(%arg0: i32) -> (i32, i32, i32) {
    %c0_i32 = arith.constant 0 : i32
    %c0_i32_0 = arith.constant 0 : i32
    %c0_i32_1 = arith.constant 0 : i32
    %c0_i32_2 = arith.constant 0 : i32
    return %c0_i32, %c0_i32_0, %c0_i32_1 : i32, i32, i32
  }
  func.func @transform_1(%arg0: i32) -> (i32, i32, i32) {
    %c0_i32 = arith.constant 0 : i32
    %c0_i32_0 = arith.constant 0 : i32
    %c0_i32_1 = arith.constant 0 : i32
    %c0_i32_2 = arith.constant 0 : i32
    return %c0_i32, %c0_i32_0, %c0_i32_1 : i32, i32, i32
  }
  func.func @transform_2(%arg0: i32) -> (i32, i32, i32) {
    %c0_i32 = arith.constant 0 : i32
    %c0_i32_0 = arith.constant 0 : i32
    %c0_i32_1 = arith.constant 0 : i32
    %c0_i32_2 = arith.constant 0 : i32
    return %c0_i32, %c0_i32_0, %c0_i32_1 : i32, i32, i32
  }
  func.func @transform_3(%arg0: i32) -> (i32, i32) {
    %c0_i32 = arith.constant 0 : i32
    %c0_i32_0 = arith.constant 0 : i32
    %c0_i32_1 = arith.constant 0 : i32
    return %c0_i32, %c0_i32_0 : i32, i32
  }
  func.func @transform_4(%arg0: i32) -> (i32, i32) {
    %c0_i32 = arith.constant 0 : i32
    %c0_i32_0 = arith.constant 0 : i32
    %c0_i32_1 = arith.constant 0 : i32
    return %c0_i32, %c0_i32_0 : i32, i32
  }
  func.func @transform_5(%arg0: i32) -> (i32, i32) {
    %c0_i32 = arith.constant 0 : i32
    %c0_i32_0 = arith.constant 0 : i32
    %c0_i32_1 = arith.constant 0 : i32
    return %c0_i32, %c0_i32_0 : i32, i32
  }
  func.func @transform_6(%arg0: i32) -> (i32, i32, i32) {
    %c0_i32 = arith.constant 0 : i32
    %c0_i32_0 = arith.constant 0 : i32
    %c0_i32_1 = arith.constant 0 : i32
    %c0_i32_2 = arith.constant 0 : i32
    return %c0_i32, %c0_i32_0, %c0_i32_1 : i32, i32, i32
  }
  func.func @transform_7(%arg0: i32) -> (i32, i32) {
    %c0_i32 = arith.constant 0 : i32
    %c0_i32_0 = arith.constant 0 : i32
    %c0_i32_1 = arith.constant 0 : i32
    return %c0_i32, %c0_i32_0 : i32, i32
  }
  func.func @transform_8(%arg0: i32) -> (i32, i32, i32) {
    %c0_i32 = arith.constant 0 : i32
    %c0_i32_0 = arith.constant 0 : i32
    %c0_i32_1 = arith.constant 0 : i32
    %c0_i32_2 = arith.constant 0 : i32
    return %c0_i32, %c0_i32_0, %c0_i32_1 : i32, i32, i32
  }
  func.func @transform_9(%arg0: i32) -> (i32, i32, i32) {
    %c0_i32 = arith.constant 0 : i32
    %c0_i32_0 = arith.constant 0 : i32
    %c0_i32_1 = arith.constant 0 : i32
    %c0_i32_2 = arith.constant 0 : i32
    return %c0_i32, %c0_i32_0, %c0_i32_1 : i32, i32, i32
  }
}

</mosaic_0001>

<bundles_post_ra>
// kernel: encoder_block_apply.2
= control target key start
LH: loop header
LB: loop body
LE: loop exit
PB: predicated region body
PF: predicated region fallthrough
CT: control target
= control target key end

     0   :  { %v76_v0 = vlaneseq  ;;  %v1675_v1 = vmov 0   ;;  %s1676_s10 = smov 2   ;;  %s1677_s11 = smov 17   ;;  %v1679_v19 = vmov 0.0   ;;  %vm65_vm0 = vcmask 273408   ;;  %s2190_s1 = inlined_call_operand.vmem [shape: f32[2,4,1], index: 1, kind: input, shape index: {}]   ;;  %s2191_s6 = inlined_call_operand.vmem [shape: f32[9,1,256], index: 6, kind: input, shape index: {}]   ;;  %s2192_s0 = inlined_call_operand.vmem [shape: f32[2,4,256], index: 0, kind: input, shape index: {}]   ;;  %s2193_s2 = inlined_call_operand.vmem [shape: bf16[9,8,4], index: 2, kind: input, shape index: {}]   ;;  %s2194_s3 = inlined_call_operand.vmem [shape: f32[8,1], index: 3, kind: input, shape index: {}]   ;;  %s2195_s5 = inlined_call_operand.vmem [shape: f32[8,1], index: 5, kind: input, shape index: {}]   ;;  %s2196_s4 = inlined_call_operand.vmem [shape: f32[8,1], index: 4, kind: input, shape index: {}]   ;;  %s2197_s7 = inlined_call_operand.vmem [shape: f32[2,8,256], index: 7, kind: output, shape index: {}]  }
   0x1   :  { %1671 = vset.pattern.permute.xlu0 %v1675_v1  ;;  %v68_v2 = vld [vmem:[%s2190_s1] sm:$0xf]  ;;  %195 = vmatprep.mubr.bf16.mxu0 %v1675_v1  ;;  %v1631_v4 = vld [vmem:[%s2190_s1 + $0x4] sm:$0xf]  ;;  %v1607_v6 = vld [vmem:[%s2191_s6 + $0x8] sm:$0x3] }
   0x2   :  { %71 = vperm.xlu0 %1671, %v68_v2   ;;  %v77_v3 = vshrl.u32 %v76_v0, 7  ;;  %245 = vmatprep.mubr.bf16.mxu1 %v1675_v1  ;;  %v1605_v5 = vld [vmem:[%s2191_s6 + $0x4] sm:$0x3]  ;;  %v1609_v13 = vld [vmem:[%s2191_s6 + $0xc] sm:$0x3]  ;;  %s1678_s12 = smov 32  }
   0x3   :  { %1672 = vset.pattern.permute.xlu1 %v1675_v1  ;;  %64 = vst [vmem:[#allocation2] sm:$0xff] %v1679_v19  ;;  %66 = vst.msk [vmem:[#allocation2 + $0x8] sm:$0xf] %vm65_vm0, %v1679_v19  ;;  %v1680_v20 = vmov 839922192   ;;  %v67_v26 = vld [vmem:[%s2192_s0] sm:$0xff] }
   0x4   :  { %v1750_v7 = vsub.s32 0, %v77_v3  ;;  %v1752_v8 = vsub.s32 1, %v77_v3  ;;  %v74_v21 = vunpack.c.l.s4 %v1680_v20  ;;  %v1604_v24 = vld [vmem:[%s2191_s6 + $0x2] sm:$0x3]  ;;  %v1606_v30 = vld [vmem:[%s2191_s6 + $0x6] sm:$0x3] }
   0x5   :  { %v1630_v33 = vld [vmem:[%s2192_s0 + $0x8] sm:$0xff]  ;;  %s1681_s23 = smov 1   ;;  %s1682_s25 = smov 16   ;;  %v1611_v47 = vld [vmem:[%s2191_s6 + $0x10] sm:$0x3]  ;;  %vm90_vm1 = vcmask 1043592  }
   0x6   :  { %903 = vperm.xlu0 %1671, %v1631_v4   ;;  %v260_v9 = vrot.slane %v1605_v5, %v1750_v7  ;;  %v264_v10 = vrot.slane %v1605_v5, %v1752_v8  ;;  %v442_v11 = vrot.slane %v1607_v6, %v1750_v7  ;;  %v446_v12 = vrot.slane %v1607_v6, %v1752_v8  ;;  %v1608_v38 = vld [vmem:[%s2191_s6 + $0xa] sm:$0x3]  ;;  %v1610_v43 = vld [vmem:[%s2191_s6 + $0xe] sm:$0x3]  ;;  %s1683_s28 = smov 18   ;;  %s1684_s29 = smov 33  }
   0x7   :  { %v623_v16 = vrot.slane %v1609_v13, %v1750_v7  ;;  %v627_v17 = vrot.slane %v1609_v13, %v1752_v8  ;;  %v75_v22 = vunpack.c.0.s8 %v74_v21  ;;  %v119_v28 = vrot.slane %v1604_v24, %v1750_v7  ;;  %s1685_s30 = smov 34   ;;  %v47_v58 = vld [vmem:[%s2191_s6] sm:$0x3]  ;;  %s1686_s6 = smov 126  }
   0x8   :  { %v265_v14 = vcombine.low %v260_v9, %v264_v10  ;;  %v447_v15 = vcombine.low %v442_v11, %v446_v12  ;;  %v123_v29 = vrot.slane %v1604_v24, %v1752_v8  ;;  %v351_v36 = vrot.slane %v1606_v30, %v1750_v7  ;;  %s1687_s9 = smov 127   ;;  %s1691_s13 = smov 110  }
   0x9   :  { %v628_v18 = vcombine.low %v623_v16, %v627_v17  ;;  %v78_v23 = vsub.s32 %v75_v22, %v77_v3  ;;  %v355_v37 = vrot.slane %v1606_v30, %v1752_v8  ;;  %v532_v41 = vrot.slane %v1608_v38, %v1750_v7  ;;  %s1692_s14 = smov 95   ;;  %s1693_s17 = smov 94  }
   0xa   :  { %266 = vrot.lane.b32.xlu0 %v265_v14, %s1676_s10  ;;  %v124_v35 = vcombine.low %v119_v28, %v123_v29  ;;  %v536_v42 = vrot.slane %v1608_v38, %v1752_v8  ;;  %v714_v45 = vrot.slane %v1610_v43, %v1750_v7  ;;  %v718_v46 = vrot.slane %v1610_v43, %v1752_v8  ;;  %s1688_s10 = smov 111  }
   0xb   :  { %v356_v40 = vcombine.low %v351_v36, %v355_v37  ;;  %v805_v49 = vrot.slane %v1611_v47, %v1750_v7  ;;  %v809_v50 = vrot.slane %v1611_v47, %v1752_v8  ;;  %vm91_vm2 = vcmask 1047556  }
   0xc   :  { %v537_v44 = vcombine.low %v532_v41, %v536_v42  ;;  %v719_v48 = vcombine.low %v714_v45, %v718_v46  ;;  %vm86_vm3 = vcmask 138240   ;;  %vm94_vm4 = vcmask 134144   ;;  %vm1803_vm5 = vmor %vm91_vm2, %vm90_vm1 }
   0xd   :  { %v810_v51 = vcombine.low %v805_v49, %v809_v50  ;;  %v101_v61 = vrot.slane %v47_v58, %v1750_v7  ;;  %v105_v62 = vrot.slane %v47_v58, %v1752_v8  ;;  %vm156_vm6 = vcmask 1041408  }
   0xe   :  { %448 = vrot.lane.b32.xlu0 %v447_v15, %s1677_s11  ;;  %vm269_vm7 = vcmask 15360   ;;  %vm128_vm8 = vcmask 7168   ;;  %vm632_vm9 = vcmask 261120   ;;  %vm360_vm10 = vcmask 130048  }
   0xf   :  { %v106_v2 = vcombine.low %v101_v61, %v105_v62  ;;  %vm541_vm11 = vcmask 146432   ;;  %vm814_vm12 = vcmask 277504   ;;  %vm723_vm13 = vcmask 269312  }
  0x10   :  { %vm152_vm14 = vcmask 31744   ;;  %vm149_vm15 = vcmask 1039360   ;;  %vm290_vm0 = vcmask 1031168   ;;  %vm381_vm1 = vcmask 916480  }
  0x11   :  { %vm471_vm2 = vcmask 908288  }
  0x12   :  { %629 = vrot.lane.b32.xlu0 %v628_v18, %s1678_s12  ;;  %s1690_s12 = smov 96  }
  0x81   :  { %v72_v25 = vpop.permute.xlu0 %71 }
  0x82   :  { %v79_v27 = vrot.slane %v72_v25, %v78_v23 }
  0x84   :  { %v81_v31 = vadd.f32 %v79_v27, %v67_v26 }
  0x85   :  { %v904_v32 = vpop.permute.xlu0 %903 }
  0x86   :  { %v911_v34 = vrot.slane %v904_v32, %v78_v23  ;;  %83 = vrot.lane.b32.xlu1 %v81_v31, %s1677_s11 }
  0x88   :  { %v913_v39 = vadd.f32 %v1630_v33, %v911_v34 }
  0x89   :  { %v1797_v52 = vpop.permute.xlu0 %266 }
  0x8a   :  { %915 = vrot.lane.b32.xlu0 %v913_v39, %s1677_s11  ;;  %125 = vrot.lane.b32.xlu1 %v124_v35, %s1681_s23  ;;  %v1821_v4 = vrot.slane %v1797_v52, 4  ;;  %s1689_s11 = smov 112  }
  0x8c   :  { %v1866_v39 = vsel %vm269_vm7, %v1821_v4, %v1797_v52  ;;  %vm835_vm7 = vcmask 769024  }
  0x8d   :  { %v1799_v53 = vpop.permute.xlu0 %448 }
  0x8e   :  { %357 = vrot.lane.b32.xlu1 %v356_v40, %s1682_s25  ;;  %v1824_v5 = vrot.slane %v1799_v53, 4 }
  0x90   :  { %v1877_v43 = vsel %vm86_vm3, %v1824_v5, %v1799_v53 }
  0x91   :  { %v1801_v54 = vpop.permute.xlu0 %629 }
  0x92   :  { %538 = vrot.lane.b32.xlu1 %v537_v44, %s1683_s28  ;;  %v1845_v22 = vrot.slane %v1801_v54, 4 }
  0x94   :  { %v1890_v49 = vsel %vm632_vm9, %v1845_v22, %v1801_v54 }
  0x96   :  { %720 = vrot.lane.b32.xlu1 %v719_v48, %s1684_s29 }
  0x9a   :  { %811 = vrot.lane.b32.xlu1 %v810_v51, %s1685_s30 }
  0xf8   :  { %v84_v55 = vpop.permute.xlu1 %83 }
  0xf9   :  { %v85_v57 = vrot.slane %v84_v55, 4 }
  0xfb   :  { %v87_v59 = vsel %vm86_vm3, %v85_v57, %v84_v55  ;;  %95 = vst.msk [vmem:[#allocation2 + $0x8] sm:$0xf] %vm94_vm4, %v85_v57 }
  0xfc   :  { %93 = vst.msk [vmem:[#allocation2] sm:$0xff] %vm1803_vm5, %v87_v59  ;;  %v916_v60 = vpop.permute.xlu0 %915  ;;  %v1816_v63 = vpop.permute.xlu1 %125 }
  0xfd   :  { %v917_v0 = vrot.slane %v916_v60, 4  ;;  %v1827_v6 = vrot.slane %v1816_v63, 4 }
  0xff   :  { %v918_v12 = vsel %vm86_vm3, %v917_v0, %v916_v60  ;;  %v1884_v46 = vsel %vm128_vm8, %v1827_v6, %v1816_v63  ;;  %vm562_vm3 = vcmask 900096  }
 0x100   :  { %v1818_v3 = vpop.permute.xlu1 %357 }
 0x101   :  { %v1830_v9 = vrot.slane %v1818_v3, 4 }
 0x102   :  { %v255_v7 = vld [vmem:[#allocation2 + $0x8] sm:$0xf] }
 0x103   :  { %v114_v8 = vld [vmem:[#allocation2 + $0x8] sm:$0xf]  ;;  %v1832_v11 = vld [vmem:[#allocation2] sm:$0xff]  ;;  %v274_v13 = vmul.f32 %v1821_v4, %v255_v7  ;;  %v1896_v52 = vsel %vm360_vm10, %v1830_v9, %v1818_v3 }
 0x104   :  { %v437_v10 = vld [vmem:[#allocation2 + $0x8] sm:$0xf]  ;;  %v133_v14 = vmul.f32 %v1827_v6, %v114_v8  ;;  %921 = vst.msk [vmem:[#allocation2] sm:$0xff] %vm1803_vm5, %v918_v12  ;;  %v1839_v17 = vpop.permute.xlu1 %538  ;;  %v108_v18 = vmul.f32 %v1832_v11, %v106_v2  ;;  %v273_v42 = vmul.f32 %v1866_v39, %v1832_v11  ;;  %v454_v48 = vmul.f32 %v1877_v43, %v1832_v11  ;;  %v1927_v8 = vld [vmem:[%s2193_s2] sm:$0xf] }
 0x105   :  { %v346_v15 = vld [vmem:[#allocation2 + $0x8] sm:$0xf]  ;;  %v280_v23 = vpack.c.bf16 %v274_v13, %v274_v13  ;;  %v455_v25 = vmul.f32 %v1824_v5, %v437_v10  ;;  %v1850_v26 = vrot.slane %v1839_v17, 4  ;;  %v132_v50 = vmul.f32 %v1832_v11, %v1884_v46 }
 0x106   :  { %v618_v16 = vld [vmem:[#allocation2 + $0x8] sm:$0xf]  ;;  %v139_v24 = vpack.c.bf16 %v133_v14, %v133_v14  ;;  %v110_v27 = vcombine.high %v108_v18, %v108_v18  ;;  %v112_v28 = vpack.c.bf16 %v108_v18, %v108_v18  ;;  %v365_v29 = vmul.f32 %v1830_v9, %v346_v15 }
 0x107   :  { %v527_v19 = vld [vmem:[#allocation2 + $0x8] sm:$0xf]  ;;  %288 = vrot.lane.b32.xlu1 %v280_v23, %s1686_s6  ;;  %v461_v32 = vpack.c.bf16 %v455_v25, %v455_v25  ;;  %v637_v33 = vmul.f32 %v1845_v22, %v618_v16  ;;  %v278_v47 = vpack.c.bf16 %v273_v42, %v273_v42  ;;  %v459_v55 = vpack.c.bf16 %v454_v48, %v454_v48 }
 0x108   :  { %v709_v20 = vld [vmem:[#allocation2 + $0x8] sm:$0xf]  ;;  %147 = vrot.lane.b32.xlu0 %v139_v24, %s1687_s9  ;;  %v721_v30 = vpop.permute.xlu1 %720  ;;  %v113_v31 = vpack.c.bf16 %v110_v27, %v110_v27  ;;  %v208_v35 = vsel %vm156_vm6, %v112_v28, 0  ;;  %v371_v36 = vpack.c.bf16 %v365_v29, %v365_v29  ;;  %v546_v37 = vmul.f32 %v1850_v26, %v527_v19 }
 0x109   :  { %v1842_v21 = vld [vmem:[#allocation2 + $0x8] sm:$0xf]  ;;  %v1856_v34 = vrot.slane %v721_v30, 4  ;;  %v643_v41 = vpack.c.bf16 %v637_v33, %v637_v33  ;;  %v636_v54 = vmul.f32 %v1890_v49, %v1832_v11  ;;  %v364_v56 = vmul.f32 %v1896_v52, %v1832_v11 }
 0x10a   :  { %922 = vst.msk [vmem:[#allocation2 + $0x8] sm:$0xf] %vm94_vm4, %v917_v0  ;;  %1614 = vmatprep.subr.msk.bf16.mxu1 %vm156_vm6, %v113_v31  ;;  %v552_v44 = vpack.c.bf16 %v546_v37, %v546_v37  ;;  %v137_v58 = vpack.c.bf16 %v132_v50, %v132_v50  ;;  %v1908_v59 = vsel %vm541_vm11, %v1850_v26, %v1839_v17  ;;  %vm653_vm4 = vcmask 785408  }
 0x10b   :  { %v1861_v38 = vld [vmem:[#allocation2] sm:$0xff]  ;;  %469 = vrot.lane.b32.xlu1 %v461_v32, %s1688_s10  ;;  %214 = vmatpush1.bf16.msra.mxu1 %v208_v35  ;;  %v728_v45 = vmul.f32 %v1856_v34, %v709_v20  ;;  %v641_v60 = vpack.c.bf16 %v636_v54, %v636_v54  ;;  %v135_v61 = vcombine.high %v132_v50, %v132_v50  ;;  %vm744_vm5 = vcmask 777216  }
 0x10c   :  { %v1869_v40 = vmul.f32 %v1861_v38, %v106_v2  ;;  %379 = vrot.lane.b32.xlu0 %v371_v36, %s1689_s11  ;;  %v812_v53 = vpop.permute.xlu1 %811  ;;  %v545_v62 = vmul.f32 %v1908_v59, %v1832_v11  ;;  %v369_v0 = vpack.c.bf16 %v364_v56, %v364_v56  ;;  %v1918_v2 = vsel %vm723_vm13, %v1856_v34, %v721_v30 }
 0x10d   :  { %v734_v51 = vpack.c.bf16 %v728_v45, %v728_v45  ;;  %v1904_v57 = vrot.slane %v812_v53, 4  ;;  %v138_v7 = vpack.c.bf16 %v135_v61, %v135_v61  ;;  %v727_v10 = vmul.f32 %v1918_v2, %v1832_v11 }
 0x10e   :  { %v550_v12 = vpack.c.bf16 %v545_v62, %v545_v62  ;;  %1615 = vmatmul.mubr.msk.bf16.vlgmr.msra.gmra.mrb[0].mxu1 %vm152_vm14, %v1927_v8  ;;  %v276_v16 = vcombine.high %v273_v42, %v273_v42  ;;  %v367_v17 = vcombine.high %v364_v56, %v364_v56  ;;  %v457_v19 = vcombine.high %v454_v48, %v454_v48 }
 0x10f   :  { %651 = vrot.lane.b32.xlu1 %v643_v41, %s1690_s12  ;;  %v1915_v63 = vsel %vm814_vm12, %v1904_v57, %v812_v53  ;;  %v819_v14 = vmul.f32 %v1904_v57, %v1842_v21  ;;  %425 = vmatprep.mubr.bf16.mxu1 %v1675_v1  ;;  %v732_v15 = vpack.c.bf16 %v727_v10, %v727_v10 }
 0x110   :  { %560 = vrot.lane.b32.xlu0 %v552_v44, %s1691_s13  ;;  %v818_v3 = vmul.f32 %v1915_v63, %v1832_v11  ;;  %v279_v18 = vpack.c.bf16 %v276_v16, %v276_v16  ;;  %v370_v20 = vpack.c.bf16 %v367_v17, %v367_v17  ;;  %v548_v23 = vcombine.high %v545_v62, %v545_v62 }
 0x111   :  { %v825_v11 = vpack.c.bf16 %v819_v14, %v819_v14  ;;  %v460_v21 = vpack.c.bf16 %v457_v19, %v457_v19  ;;  %v639_v24 = vcombine.high %v636_v54, %v636_v54  ;;  %v730_v27 = vcombine.high %v727_v10, %v727_v10  ;;  %v1045_v30 = vld [vmem:[#allocation2 + $0x8] sm:$0xf] }
 0x112   :  { %v823_v13 = vpack.c.bf16 %v818_v3, %v818_v3  ;;  %v551_v25 = vpack.c.bf16 %v548_v23, %v548_v23  ;;  %v821_v29 = vcombine.high %v818_v3, %v818_v3  ;;  %v930_v31 = vld [vmem:[#allocation2 + $0x8] sm:$0xf]  ;;  %v1047_v33 = vmul.f32 %v1045_v30, %v1821_v4 }
 0x113   :  { %284 = vrot.lane.b32.xlu1 %v278_v47, %s1686_s6  ;;  %v642_v28 = vpack.c.bf16 %v639_v24, %v639_v24  ;;  %v733_v32 = vpack.c.bf16 %v730_v27, %v730_v27  ;;  %v932_v36 = vmul.f32 %v930_v31, %v1827_v6  ;;  %v1115_v37 = vld [vmem:[#allocation2 + $0x8] sm:$0xf]  ;;  %v1046_v42 = vmul.f32 %v1861_v38, %v1866_v39 }
 0x114   :  { %742 = vrot.lane.b32.xlu0 %v734_v51, %s1692_s14  ;;  %v824_v35 = vpack.c.bf16 %v821_v29, %v821_v29  ;;  %v1053_v41 = vpack.c.bf16 %v1047_v33, %v1047_v33  ;;  %v1117_v45 = vmul.f32 %v1115_v37, %v1830_v9  ;;  %v931_v4 = vmul.f32 %v1861_v38, %v1884_v46  ;;  %v1185_v53 = vld [vmem:[#allocation2 + $0x8] sm:$0xf] }
 0x115   :  { %v938_v44 = vpack.c.bf16 %v932_v36, %v932_v36  ;;  %v1051_v6 = vpack.c.bf16 %v1046_v42, %v1046_v42  ;;  %v1186_v47 = vmul.f32 %v1861_v38, %v1877_v43  ;;  %v1116_v9 = vmul.f32 %v1861_v38, %v1896_v52  ;;  %v1255_v61 = vld [vmem:[#allocation2 + $0x8] sm:$0xf] }
 0x116   :  { %v1123_v48 = vpack.c.bf16 %v1117_v45, %v1117_v45  ;;  %v934_v50 = vcombine.high %v931_v4, %v931_v4  ;;  %v936_v51 = vpack.c.bf16 %v931_v4, %v931_v4  ;;  %v1256_v43 = vmul.f32 %v1861_v38, %v1908_v59  ;;  %v1325_v3 = vld [vmem:[#allocation2 + $0x8] sm:$0xf] }
 0x117   :  { %465 = vrot.lane.b32.xlu1 %v459_v55, %s1688_s10  ;;  %v1191_v39 = vpack.c.bf16 %v1186_v47, %v1186_v47  ;;  %v1187_v55 = vmul.f32 %v1185_v53, %v1824_v5  ;;  %v1121_v54 = vpack.c.bf16 %v1116_v9, %v1116_v9  ;;  %v1326_v52 = vmul.f32 %v1861_v38, %v1890_v49 }
 0x118   :  { %143 = vrot.lane.b32.xlu0 %v137_v58, %s1687_s9  ;;  %v937_v46 = vpack.c.bf16 %v934_v50, %v934_v50  ;;  %v1261_v58 = vpack.c.bf16 %v1256_v43, %v1256_v43  ;;  %v1119_v62 = vcombine.high %v1116_v9, %v1116_v9  ;;  %v1257_v59 = vmul.f32 %v1255_v61, %v1850_v26 }
 0x119   :  { %v1193_v56 = vpack.c.bf16 %v1187_v55, %v1187_v55  ;;  %v1331_v5 = vpack.c.bf16 %v1326_v52, %v1326_v52  ;;  %v1327_v49 = vmul.f32 %v1325_v3, %v1845_v22  ;;  %v1259_v14 = vcombine.high %v1256_v43, %v1256_v43  ;;  %v2037_v3 = vld [vmem:[%s2193_s2 + $0xc] sm:$0xf] }
 0x11a   :  { %v1263_v10 = vpack.c.bf16 %v1257_v59, %v1257_v59  ;;  %v1466_v16 = vmul.f32 %v1861_v38, %v1915_v63  ;;  %v1329_v17 = vcombine.high %v1326_v52, %v1326_v52 }
 0x11b   :  { %647 = vrot.lane.b32.xlu1 %v641_v60, %s1690_s12  ;;  %v1049_v60 = vcombine.high %v1046_v42, %v1046_v42  ;;  %v1262_v22 = vpack.c.bf16 %v1259_v14, %v1259_v14 }
 0x11c   :  { %375 = vrot.lane.b32.xlu0 %v369_v0, %s1689_s11  ;;  %v1471_v19 = vpack.c.bf16 %v1466_v16, %v1466_v16  ;;  %v1332_v23 = vpack.c.bf16 %v1329_v17, %v1329_v17 }
 0x11d   :  { %v1052_v0 = vpack.c.bf16 %v1049_v60, %v1049_v60 }
 0x11f   :  { %145 = vrot.lane.b32.xlu1 %v138_v7, %s1687_s9  ;;  %v1122_v7 = vpack.c.bf16 %v1119_v62, %v1119_v62 }
 0x120   :  { %556 = vrot.lane.b32.xlu0 %v550_v12, %s1691_s13  ;;  %v1189_v12 = vcombine.high %v1186_v47, %v1186_v47 }
 0x122   :  { %v1192_v26 = vpack.c.bf16 %v1189_v12, %v1189_v12 }
 0x123   :  { %829 = vrot.lane.b32.xlu1 %v823_v13, %s1693_s17  ;;  %v1333_v13 = vpack.c.bf16 %v1327_v49, %v1327_v49 }
 0x124   :  { %738 = vrot.lane.b32.xlu0 %v732_v15, %s1692_s14  ;;  %v1396_v15 = vmul.f32 %v1861_v38, %v1918_v2 }
 0x127   :  { %833 = vrot.lane.b32.xlu1 %v825_v11, %s1693_s17  ;;  %v1401_v11 = vpack.c.bf16 %v1396_v15, %v1396_v15 }
 0x128   :  { %286 = vrot.lane.b32.xlu0 %v279_v18, %s1686_s6  ;;  %v1395_v18 = vld [vmem:[#allocation2 + $0x8] sm:$0xf] }
 0x129   :  { %v1397_v2 = vmul.f32 %v1395_v18, %v1856_v34  ;;  %v27_v34 = vld [vmem:[%s2194_s3] sm:$0xff] }
 0x12b   :  { %377 = vrot.lane.b32.xlu1 %v370_v20, %s1689_s11  ;;  %v1399_v20 = vcombine.high %v1396_v15, %v1396_v15  ;;  %v1403_v63 = vpack.c.bf16 %v1397_v2, %v1397_v2  ;;  %v926_v2 = vcombine.high %v1869_v40, %v1869_v40 }
 0x12c   :  { %467 = vrot.lane.b32.xlu0 %v460_v21, %s1688_s10  ;;  %v1465_v21 = vld [vmem:[#allocation2 + $0x8] sm:$0xf] }
 0x12d   :  { %v1402_v24 = vpack.c.bf16 %v1399_v20, %v1399_v20  ;;  %v1467_v38 = vmul.f32 %v1465_v21, %v1904_v57  ;;  %v2066_v20 = vld [vmem:[%s2193_s2 + $0x14] sm:$0xf] }
 0x12f   :  { %558 = vrot.lane.b32.xlu1 %v551_v25, %s1691_s13  ;;  %v1469_v25 = vcombine.high %v1466_v16, %v1466_v16  ;;  %v1473_v27 = vpack.c.bf16 %v1467_v38, %v1467_v38 }
 0x130   :  { %649 = vrot.lane.b32.xlu0 %v642_v28, %s1690_s12 }
 0x131   :  { %v1472_v28 = vpack.c.bf16 %v1469_v25, %v1469_v25 }
 0x133   :  { %740 = vrot.lane.b32.xlu1 %v733_v32, %s1692_s14 }
 0x134   :  { %831 = vrot.lane.b32.xlu0 %v824_v35, %s1693_s17 }
 0x137   :  { %1061 = vrot.lane.b32.xlu1 %v1053_v41, %s1686_s6 }
 0x138   :  { %946 = vrot.lane.b32.xlu0 %v938_v44, %s1687_s9 }
 0x13b   :  { %1057 = vrot.lane.b32.xlu1 %v1051_v6, %s1686_s6 }
 0x13c   :  { %1131 = vrot.lane.b32.xlu0 %v1123_v48, %s1689_s11 }
 0x13f   :  { %1197 = vrot.lane.b32.xlu1 %v1191_v39, %s1688_s10  ;;  %v2008_v39 = vld [vmem:[%s2193_s2 + $0x4] sm:$0xf] }
 0x140   :  { %942 = vrot.lane.b32.xlu0 %v936_v51, %s1687_s9 }
 0x143   :  { %944 = vrot.lane.b32.xlu1 %v937_v46, %s1687_s9 }
 0x144   :  { %1127 = vrot.lane.b32.xlu0 %v1121_v54, %s1689_s11 }
 0x147   :  { %1201 = vrot.lane.b32.xlu1 %v1193_v56, %s1688_s10  ;;  %v2022_v56 = vld [vmem:[%s2193_s2 + $0x8] sm:$0xf] }
 0x148   :  { %1267 = vrot.lane.b32.xlu0 %v1261_v58, %s1691_s13 }
 0x14b   :  { %1337 = vrot.lane.b32.xlu1 %v1331_v5, %s1690_s12 }
 0x14c   :  { %1059 = vrot.lane.b32.xlu0 %v1052_v0, %s1686_s6 }
 0x14f   :  { %1129 = vrot.lane.b32.xlu1 %v1122_v7, %s1689_s11 }
 0x150   :  { %1271 = vrot.lane.b32.xlu0 %v1263_v10, %s1691_s13 }
 0x153   :  { %1341 = vrot.lane.b32.xlu1 %v1333_v13, %s1690_s12 }
 0x154   :  { %1199 = vrot.lane.b32.xlu0 %v1192_v26, %s1688_s10  ;;  %v2052_v26 = vld [vmem:[%s2193_s2 + $0x10] sm:$0xf] }
 0x157   :  { %1269 = vrot.lane.b32.xlu1 %v1262_v22, %s1691_s13 }
 0x158   :  { %1407 = vrot.lane.b32.xlu0 %v1401_v11, %s1692_s14 }
 0x15b   :  { %1477 = vrot.lane.b32.xlu1 %v1471_v19, %s1693_s17 }
 0x15c   :  { %1339 = vrot.lane.b32.xlu0 %v1332_v23, %s1690_s12 }
 0x15f   :  { %1409 = vrot.lane.b32.xlu1 %v1402_v24, %s1692_s14 }
 0x160   :  { %1411 = vrot.lane.b32.xlu0 %v1403_v63, %s1692_s14  ;;  %v2080_v63 = vld [vmem:[%s2193_s2 + $0x18] sm:$0xf] }
 0x163   :  { %1481 = vrot.lane.b32.xlu1 %v1473_v27, %s1693_s17  ;;  %v929_v27 = vpack.c.bf16 %v926_v2, %v926_v2 }
 0x164   :  { %1479 = vrot.lane.b32.xlu0 %v1472_v28, %s1693_s17 }
 0x168   :  { %892 = vperm.xlu0 %1671, %v27_v34  }
 0x179   :  { %v289_v30 = vpop.permute.xlu1 %288 }
 0x17a   :  { %v148_v29 = vpop.permute.xlu0 %147 }
 0x17d   :  { %v470_v57 = vpop.permute.xlu1 %469 }
 0x17e   :  { %v380_v31 = vpop.permute.xlu0 %379 }
 0x181   :  { %v652_v32 = vpop.permute.xlu1 %651 }
 0x182   :  { %v561_v33 = vpop.permute.xlu0 %560 }
 0x185   :  { %v285_v35 = vpop.permute.xlu1 %284 }
 0x186   :  { %v1999_v36 = vpop.permute.xlu0 %742 }
 0x189   :  { %v466_v37 = vpop.permute.xlu1 %465 }
 0x18a   :  { %v144_v41 = vpop.permute.xlu0 %143 }
 0x18d   :  { %v648_v42 = vpop.permute.xlu1 %647 }
 0x18e   :  { %v376_v44 = vpop.permute.xlu0 %375 }
 0x191   :  { %v146_v45 = vpop.permute.xlu1 %145 }
 0x192   :  { %v557_v4 = vpop.permute.xlu0 %556  ;;  %v151_v6 = vsel %vm149_vm15, %v146_v45, %v148_v29  ;;  %v150_v47 = vsel %vm149_vm15, %v144_v41, %v146_v45  ;;  %v2089_v29 = vld [vmem:[%s2193_s2 + $0x1c] sm:$0xf] }
 0x193   :  { %1612 = vmatprep.subr.msk.bf16.mxu0 %vm156_vm6, %v151_v6  ;;  %v158_v48 = vsel %vm156_vm6, %v150_v47, 0 }
 0x194   :  { %164 = vmatpush1.bf16.msra.mxu0 %v158_v48 }
 0x195   :  { %v2010_v50 = vpop.permute.xlu1 %829 }
 0x196   :  { %v739_v9 = vpop.permute.xlu0 %738 }
 0x197   :  { %1613 = vmatmul.mubr.msk.bf16.vlgmr.msra.gmra.mrb[0].mxu0 %vm152_vm14, %v2008_v39 }
 0x198   :  { %334 = vmatprep.mubr.bf16.mxu0 %v1675_v1 }
 0x199   :  { %v834_v51 = vpop.permute.xlu1 %833 }
 0x19a   :  { %v287_v53 = vpop.permute.xlu0 %286 }
 0x19b   :  { %v291_v46 = vsel %vm290_vm0, %v285_v35, %v287_v53  ;;  %v292_v55 = vsel %vm290_vm0, %v287_v53, %v289_v30 }
 0x19c   :  { %v297_v43 = vsel %vm156_vm6, %v291_v46, 0  ;;  %1616 = vmatprep.subr.msk.bf16.mxu0 %vm156_vm6, %v292_v55 }
 0x19d   :  { %303 = vmatpush1.bf16.msra.mxu0 %v297_v43  ;;  %v378_v54 = vpop.permute.xlu1 %377 }
 0x19e   :  { %v468_v52 = vpop.permute.xlu0 %467  ;;  %v382_v58 = vsel %vm381_vm1, %v376_v44, %v378_v54  ;;  %v383_v60 = vsel %vm381_vm1, %v378_v54, %v380_v31 }
 0x19f   :  { %v472_v61 = vsel %vm471_vm2, %v466_v37, %v468_v52  ;;  %v473_v5 = vsel %vm471_vm2, %v468_v52, %v470_v57  ;;  %v388_v62 = vsel %vm156_vm6, %v382_v58, 0  ;;  %1618 = vmatprep.subr.msk.bf16.mxu1 %vm156_vm6, %v383_v60  ;;  %v928_v57 = vpack.c.bf16 %v1869_v40, %v1869_v40 }
 0x1a0   :  { %v478_v0 = vsel %vm156_vm6, %v472_v61, 0  ;;  %1617 = vmatmul.mubr.msk.bf16.vlgmr.msra.gmra.mrb[4].mxu0 %vm152_vm14, %v2022_v56  ;;  %1620 = vmatprep.subr.msk.bf16.mxu0 %vm156_vm6, %v473_v5 }
 0x1a1   :  { %394 = vmatpush1.bf16.msra.mxu1 %v388_v62  ;;  %484 = vmatpush1.bf16.msra.mxu0 %v478_v0  ;;  %v559_v59 = vpop.permute.xlu1 %558  ;;  %v998_v40 = vsel %vm156_vm6, %v928_v57, 0 }
 0x1a2   :  { %v650_v7 = vpop.permute.xlu0 %649  ;;  %v563_v49 = vsel %vm562_vm3, %v557_v4, %v559_v59  ;;  %v564_v10 = vsel %vm562_vm3, %v559_v59, %v561_v33  ;;  %515 = vmatprep.mubr.bf16.mxu0 %v1675_v1 }
 0x1a3   :  { %v655_v12 = vsel %vm653_vm4, %v650_v7, %v652_v32  ;;  %v569_v13 = vsel %vm156_vm6, %v563_v49, 0  ;;  %1622 = vmatprep.subr.msk.bf16.mxu1 %vm156_vm6, %v564_v10  ;;  %v654_v14 = vsel %vm653_vm4, %v648_v42, %v650_v7  ;;  %v2100_v32 = vld [vmem:[%s2193_s2 + $0x20] sm:$0xf] }
 0x1a4   :  { %1619 = vmatmul.mubr.msk.bf16.vlgmr.msra.gmra.mrb[4].mxu1 %vm152_vm14, %v2037_v3  ;;  %1624 = vmatprep.subr.msk.bf16.mxu0 %vm156_vm6, %v655_v12  ;;  %v660_v17 = vsel %vm156_vm6, %v654_v14, 0 }
 0x1a5   :  { %575 = vmatpush1.bf16.msra.mxu1 %v569_v13  ;;  %v741_v15 = vpop.permute.xlu1 %740  ;;  %606 = vmatprep.mubr.bf16.mxu1 %v1675_v1 }
 0x1a6   :  { %v832_v16 = vpop.permute.xlu0 %831  ;;  %v746_v22 = vsel %vm744_vm5, %v741_v15, %v1999_v36  ;;  %v745_v18 = vsel %vm744_vm5, %v739_v9, %v741_v15 }
 0x1a7   :  { %v837_v11 = vsel %vm835_vm7, %v832_v16, %v834_v51  ;;  %1626 = vmatprep.subr.msk.bf16.mxu1 %vm156_vm6, %v746_v22  ;;  %v751_v21 = vsel %vm156_vm6, %v745_v18, 0  ;;  %v836_v24 = vsel %vm835_vm7, %v2010_v50, %v832_v16 }
 0x1a8   :  { %1621 = vmatmul.mubr.msk.bf16.vlgmr.msra.gmra.mrb[8].mxu0 %vm152_vm14, %v2052_v26  ;;  %v842_v28 = vsel %vm156_vm6, %v836_v24, 0 }
 0x1a9   :  { %666 = vmatpush1.bf16.msra.mxu0 %v660_v17  ;;  %v1062_v19 = vpop.permute.xlu1 %1061  ;;  %697 = vmatprep.mubr.bf16.mxu0 %v1675_v1 }
 0x1aa   :  { %1628 = vmatprep.subr.msk.bf16.mxu0 %vm156_vm6, %v837_v11  ;;  %v947_v23 = vpop.permute.xlu0 %946 }
 0x1ac   :  { %1623 = vmatmul.mubr.msk.bf16.vlgmr.msra.gmra.mrb[8].mxu1 %vm152_vm14, %v2066_v20 }
 0x1ad   :  { %757 = vmatpush1.bf16.msra.mxu1 %v751_v21  ;;  %v1058_v38 = vpop.permute.xlu1 %1057  ;;  %788 = vmatprep.mubr.bf16.mxu1 %v1675_v1 }
 0x1ae   :  { %v1132_v25 = vpop.permute.xlu0 %1131 }
 0x1b0   :  { %1625 = vmatmul.mubr.msk.bf16.vlgmr.msra.gmra.mrb[12].mxu0 %vm152_vm14, %v2080_v63 }
 0x1b1   :  { %848 = vmatpush1.bf16.msra.mxu0 %v842_v28  ;;  %v1198_v34 = vpop.permute.xlu1 %1197  ;;  %879 = vmatprep.mubr.bf16.mxu0 %v1675_v1 }
 0x1b2   :  { %1634 = vmatprep.subr.msk.bf16.mxu0 %vm156_vm6, %v929_v27  ;;  %v943_v30 = vpop.permute.xlu0 %942 }
 0x1b4   :  { %1627 = vmatmul.mubr.msk.bf16.vlgmr.msra.gmra.mrb[12].mxu1 %vm152_vm14, %v2089_v29 }
 0x1b5   :  { %v945_v31 = vpop.permute.xlu1 %944  ;;  %988 = vmatprep.mubr.bf16.mxu1 %v1675_v1 }
 0x1b6   :  { %v1128_v33 = vpop.permute.xlu0 %1127  ;;  %v948_v35 = vsel %vm149_vm15, %v943_v30, %v945_v31  ;;  %v949_v36 = vsel %vm149_vm15, %v945_v31, %v947_v23 }
 0x1b7   :  { %v951_v37 = vsel %vm156_vm6, %v948_v35, 0  ;;  %1632 = vmatprep.subr.msk.bf16.mxu1 %vm156_vm6, %v949_v36 }
 0x1b8   :  { %1629 = vmatmul.mubr.msk.bf16.vlgmr.msra.gmra.mrb[16].mxu0 %vm152_vm14, %v2100_v32  ;;  %957 = vmatpush1.bf16.msra.mxu1 %v951_v37 }
 0x1b9   :  { %1004 = vmatpush1.bf16.msra.mxu0 %v998_v40  ;;  %v1202_v41 = vpop.permute.xlu1 %1201  ;;  %1035 = vmatprep.mubr.bf16.mxu0 %v1675_v1 }
 0x1ba   :  { %v1268_v42 = vpop.permute.xlu0 %1267 }
 0x1bc   :  { %1633 = vmatmul.mubr.msk.bf16.vlgmr.msra.gmra.mrb[16].mxu1 %vm152_vm14, %v2008_v39 }
 0x1bd   :  { %v1338_v44 = vpop.permute.xlu1 %1337  ;;  %1103 = vmatprep.mubr.bf16.mxu1 %v1675_v1 }
 0x1be   :  { %v1060_v45 = vpop.permute.xlu0 %1059 }
 0x1bf   :  { %v1063_v4 = vsel %vm290_vm0, %v1058_v38, %v1060_v45  ;;  %v1064_v6 = vsel %vm290_vm0, %v1060_v45, %v1062_v19 }
 0x1c0   :  { %v1066_v47 = vsel %vm156_vm6, %v1063_v4, 0  ;;  %1635 = vmatmul.mubr.msk.bf16.vlgmr.msra.gmra.mrb[20].mxu0 %vm152_vm14, %v1927_v8  ;;  %1636 = vmatprep.subr.msk.bf16.mxu1 %vm156_vm6, %v1064_v6 }
 0x1c1   :  { %1072 = vmatpush1.bf16.msra.mxu1 %v1066_v47  ;;  %v1130_v48 = vpop.permute.xlu1 %1129  ;;  %1173 = vmatprep.mubr.bf16.mxu0 %v1675_v1 }
 0x1c2   :  { %v1272_v39 = vpop.permute.xlu0 %1271  ;;  %v1133_v50 = vsel %vm381_vm1, %v1128_v33, %v1130_v48  ;;  %v1134_v9 = vsel %vm381_vm1, %v1130_v48, %v1132_v25 }
 0x1c3   :  { %v1136_v51 = vsel %vm156_vm6, %v1133_v50, 0  ;;  %1638 = vmatprep.subr.msk.bf16.mxu0 %vm156_vm6, %v1134_v9 }
 0x1c4   :  { %1637 = vmatmul.mubr.msk.bf16.vlgmr.msra.gmra.mrb[20].mxu1 %vm152_vm14, %v2022_v56  ;;  %1142 = vmatpush1.bf16.msra.mxu0 %v1136_v51 }
 0x1c5   :  { %v1342_v8 = vpop.permute.xlu1 %1341  ;;  %1243 = vmatprep.mubr.bf16.mxu1 %v1675_v1 }
 0x1c6   :  { %v1200_v53 = vpop.permute.xlu0 %1199 }
 0x1c7   :  { %v1203_v46 = vsel %vm471_vm2, %v1198_v34, %v1200_v53  ;;  %v1204_v55 = vsel %vm471_vm2, %v1200_v53, %v1202_v41 }
 0x1c8   :  { %v1206_v43 = vsel %vm156_vm6, %v1203_v46, 0  ;;  %1639 = vmatmul.mubr.msk.bf16.vlgmr.msra.gmra.mrb[24].mxu0 %vm152_vm14, %v2037_v3  ;;  %1640 = vmatprep.subr.msk.bf16.mxu1 %vm156_vm6, %v1204_v55 }
 0x1c9   :  { %1212 = vmatpush1.bf16.msra.mxu1 %v1206_v43  ;;  %v1270_v54 = vpop.permute.xlu1 %1269  ;;  %1313 = vmatprep.mubr.bf16.mxu0 %v1675_v1 }
 0x1ca   :  { %v1408_v56 = vpop.permute.xlu0 %1407  ;;  %v1273_v52 = vsel %vm562_vm3, %v1268_v42, %v1270_v54  ;;  %v1274_v58 = vsel %vm562_vm3, %v1270_v54, %v1272_v39 }
 0x1cb   :  { %v1276_v60 = vsel %vm156_vm6, %v1273_v52, 0  ;;  %1642 = vmatprep.subr.msk.bf16.mxu0 %vm156_vm6, %v1274_v58 }
 0x1cc   :  { %1641 = vmatmul.mubr.msk.bf16.vlgmr.msra.gmra.mrb[24].mxu1 %vm152_vm14, %v2052_v26  ;;  %1282 = vmatpush1.bf16.msra.mxu0 %v1276_v60 }
 0x1cd   :  { %v1478_v61 = vpop.permute.xlu1 %1477  ;;  %1383 = vmatprep.mubr.bf16.mxu1 %v1675_v1 }
 0x1ce   :  { %v1340_v5 = vpop.permute.xlu0 %1339 }
 0x1cf   :  { %v1343_v62 = vsel %vm653_vm4, %v1338_v44, %v1340_v5  ;;  %v1344_v0 = vsel %vm653_vm4, %v1340_v5, %v1342_v8 }
 0x1d0   :  { %v1346_v59 = vsel %vm156_vm6, %v1343_v62, 0  ;;  %1643 = vmatmul.mubr.msk.bf16.vlgmr.msra.gmra.mrb[28].mxu0 %vm152_vm14, %v2066_v20  ;;  %1644 = vmatprep.subr.msk.bf16.mxu1 %vm156_vm6, %v1344_v0 }
 0x1d1   :  { %1352 = vmatpush1.bf16.msra.mxu1 %v1346_v59  ;;  %v1410_v3 = vpop.permute.xlu1 %1409  ;;  %1453 = vmatprep.mubr.bf16.mxu0 %v1675_v1 }
 0x1d2   :  { %v1412_v7 = vpop.permute.xlu0 %1411  ;;  %v1413_v49 = vsel %vm744_vm5, %v1408_v56, %v1410_v3 }
 0x1d3   :  { %v1414_v10 = vsel %vm744_vm5, %v1410_v3, %v1412_v7  ;;  %v1416_v12 = vsel %vm156_vm6, %v1413_v49, 0 }
 0x1d4   :  { %1645 = vmatmul.mubr.msk.bf16.vlgmr.msra.gmra.mrb[28].mxu1 %vm152_vm14, %v2080_v63  ;;  %1646 = vmatprep.subr.msk.bf16.mxu0 %vm156_vm6, %v1414_v10 }
 0x1d5   :  { %1422 = vmatpush1.bf16.msra.mxu0 %v1416_v12  ;;  %v1482_v13 = vpop.permute.xlu1 %1481  ;;  %1523 = vmatprep.mubr.bf16.mxu1 %v1675_v1 }
 0x1d6   :  { %v1480_v14 = vpop.permute.xlu0 %1479 }
 0x1d7   :  { %v1483_v15 = vsel %vm835_vm7, %v1478_v61, %v1480_v14  ;;  %v1484_v26 = vsel %vm835_vm7, %v1480_v14, %v1482_v13 }
 0x1d8   :  { %v1486_v16 = vsel %vm156_vm6, %v1483_v15, 0  ;;  %1647 = vmatmul.mubr.msk.bf16.vlgmr.msra.gmra.mrb[32].mxu0 %vm152_vm14, %v2089_v29  ;;  %1648 = vmatprep.subr.msk.bf16.mxu1 %vm156_vm6, %v1484_v26 }
 0x1d9   :  { %1492 = vmatpush1.bf16.msra.mxu1 %v1486_v16 }
 0x1dc   :  { %1649 = vmatmul.mubr.msk.bf16.vlgmr.msra.gmra.mrb[32].mxu1 %vm152_vm14, %v2100_v32 }
 0x1e1   :  { %v247_v22 = vpop.f32.mrb[0].mxu1 }
 0x1e2   :  { %v249_v11 = vpop.f32.mrb[1].mxu1 }
 0x1e3   :  { %v251_v17 = vpop.f32.mrb[2].mxu1 }
 0x1e4   :  { %v252_v1 = vpop.f32.mrb[3].mxu1 }
 0x1e7   :  { %v893_v61 = vpop.permute.xlu0 %892 }
 0x26a   :  { %v197_v18 = vpop.f32.mrb[0].mxu0 }
 0x26b   :  { %v199_v19 = vpop.f32.mrb[1].mxu0  ;;  %v248_v20 = vadd.f32 %v247_v22, %v197_v18 }
 0x26c   :  { %v201_v23 = vpop.f32.mrb[2].mxu0  ;;  %v250_v2 = vadd.f32 %v249_v11, %v199_v19 }
 0x26d   :  { %v202_v21 = vpop.f32.mrb[3].mxu0 }
 0x273   :  { %v336_v24 = vpop.f32.mrb[4].mxu0 }
 0x274   :  { %v343_v38 = vadd.f32 %v336_v24, %v248_v20  ;;  %v338_v63 = vpop.f32.mrb[5].mxu0 }
 0x275   :  { %v344_v25 = vadd.f32 %v338_v63, %v250_v2  ;;  %v340_v27 = vpop.f32.mrb[6].mxu0 }
 0x276   :  { %v341_v28 = vpop.f32.mrb[7].mxu0 }
 0x277   :  { %v427_v34 = vpop.f32.mrb[4].mxu1 }
 0x278   :  { %v434_v29 = vadd.f32 %v427_v34, %v343_v38  ;;  %v429_v30 = vpop.f32.mrb[5].mxu1 }
 0x279   :  { %v435_v57 = vadd.f32 %v429_v30, %v344_v25  ;;  %v431_v31 = vpop.f32.mrb[6].mxu1 }
 0x27a   :  { %v432_v32 = vpop.f32.mrb[7].mxu1 }
 0x27b   :  { %v517_v33 = vpop.f32.mrb[8].mxu0 }
 0x27c   :  { %v524_v35 = vadd.f32 %v517_v33, %v434_v29  ;;  %v519_v36 = vpop.f32.mrb[9].mxu0 }
 0x27d   :  { %v525_v37 = vadd.f32 %v519_v36, %v435_v57  ;;  %v521_v40 = vpop.f32.mrb[10].mxu0 }
 0x27e   :  { %v522_v41 = vpop.f32.mrb[11].mxu0 }
 0x27f   :  { %v608_v42 = vpop.f32.mrb[8].mxu1 }
 0x280   :  { %v615_v44 = vadd.f32 %v608_v42, %v524_v35  ;;  %v610_v45 = vpop.f32.mrb[9].mxu1 }
 0x281   :  { %v616_v4 = vadd.f32 %v610_v45, %v525_v37  ;;  %v612_v6 = vpop.f32.mrb[10].mxu1 }
 0x282   :  { %v613_v47 = vpop.f32.mrb[11].mxu1 }
 0x283   :  { %v699_v48 = vpop.f32.mrb[12].mxu0 }
 0x284   :  { %v706_v39 = vadd.f32 %v699_v48, %v615_v44  ;;  %v701_v50 = vpop.f32.mrb[13].mxu0 }
 0x285   :  { %v707_v9 = vadd.f32 %v701_v50, %v616_v4  ;;  %v703_v51 = vpop.f32.mrb[14].mxu0 }
 0x286   :  { %v704_v8 = vpop.f32.mrb[15].mxu0 }
 0x287   :  { %v790_v53 = vpop.f32.mrb[12].mxu1 }
 0x288   :  { %v797_v46 = vadd.f32 %v790_v53, %v706_v39  ;;  %v792_v55 = vpop.f32.mrb[13].mxu1 }
 0x289   :  { %v798_v43 = vadd.f32 %v792_v55, %v707_v9  ;;  %v794_v54 = vpop.f32.mrb[14].mxu1 }
 0x28a   :  { %v795_v56 = vpop.f32.mrb[15].mxu1 }
 0x28b   :  { %v881_v52 = vpop.f32.mrb[16].mxu0 }
 0x28c   :  { %v888_v58 = vadd.f32 %v881_v52, %v797_v46  ;;  %v883_v60 = vpop.f32.mrb[17].mxu0 }
 0x28d   :  { %v889_v5 = vadd.f32 %v883_v60, %v798_v43  ;;  %v885_v62 = vpop.f32.mrb[18].mxu0 }
 0x28e   :  { %v2164_v0 = vadd.f32 %v893_v61, %v888_v58  ;;  %v886_v59 = vpop.f32.mrb[19].mxu0 }
 0x28f   :  { %v2166_v3 = vadd.f32 %v893_v61, %v889_v5  ;;  %v990_v7 = vpop.f32.mrb[16].mxu1 }
 0x290   :  { %v992_v49 = vpop.f32.mrb[17].mxu1 }
 0x291   :  { %v1536_v10 = vadd.f32 %v2166_v3, %v2164_v0  ;;  %v994_v12 = vpop.f32.mrb[18].mxu1 }
 0x292   :  { %v995_v13 = vpop.f32.mrb[19].mxu1 }
 0x293   :  { %v1037_v14 = vpop.f32.mrb[20].mxu0  ;;  %1537 = vadd.xlane.f32.xlu1 %v1536_v10 }
 0x294   :  { %v1038_v15 = vadd.f32 %v1037_v14, %v990_v7  ;;  %v1039_v26 = vpop.f32.mrb[21].mxu0 }
 0x295   :  { %v1040_v16 = vadd.f32 %v1039_v26, %v992_v49  ;;  %v1041_v22 = vpop.f32.mrb[22].mxu0 }
 0x296   :  { %v1042_v11 = vpop.f32.mrb[23].mxu0 }
 0x297   :  { %v1105_v17 = vpop.f32.mrb[20].mxu1 }
 0x298   :  { %v1112_v1 = vadd.f32 %v1105_v17, %v1038_v15  ;;  %v1107_v18 = vpop.f32.mrb[21].mxu1 }
 0x299   :  { %v1113_v19 = vadd.f32 %v1107_v18, %v1040_v16  ;;  %v1109_v20 = vpop.f32.mrb[22].mxu1 }
 0x29a   :  { %v1110_v23 = vpop.f32.mrb[23].mxu1 }
 0x29b   :  { %v1175_v2 = vpop.f32.mrb[24].mxu0 }
 0x29c   :  { %v1182_v21 = vadd.f32 %v1175_v2, %v1112_v1  ;;  %v1177_v24 = vpop.f32.mrb[25].mxu0 }
 0x29d   :  { %v1183_v38 = vadd.f32 %v1177_v24, %v1113_v19  ;;  %v1179_v63 = vpop.f32.mrb[26].mxu0 }
 0x29e   :  { %v1180_v25 = vpop.f32.mrb[27].mxu0 }
 0x29f   :  { %v1245_v27 = vpop.f32.mrb[24].mxu1 }
 0x2a0   :  { %v1252_v28 = vadd.f32 %v1245_v27, %v1182_v21  ;;  %v1247_v34 = vpop.f32.mrb[25].mxu1 }
 0x2a1   :  { %v1253_v29 = vadd.f32 %v1247_v34, %v1183_v38  ;;  %v1249_v30 = vpop.f32.mrb[26].mxu1 }
 0x2a2   :  { %v1250_v57 = vpop.f32.mrb[27].mxu1 }
 0x2a3   :  { %v1315_v31 = vpop.f32.mrb[28].mxu0 }
 0x2a4   :  { %v1322_v32 = vadd.f32 %v1315_v31, %v1252_v28  ;;  %v1317_v33 = vpop.f32.mrb[29].mxu0 }
 0x2a5   :  { %v1323_v35 = vadd.f32 %v1317_v33, %v1253_v29  ;;  %v1319_v36 = vpop.f32.mrb[30].mxu0 }
 0x2a6   :  { %v1320_v37 = vpop.f32.mrb[31].mxu0 }
 0x2a7   :  { %v1385_v40 = vpop.f32.mrb[28].mxu1 }
 0x2a8   :  { %v1392_v41 = vadd.f32 %v1385_v40, %v1322_v32  ;;  %v1387_v42 = vpop.f32.mrb[29].mxu1 }
 0x2a9   :  { %v1393_v44 = vadd.f32 %v1387_v42, %v1323_v35  ;;  %v1389_v45 = vpop.f32.mrb[30].mxu1 }
 0x2aa   :  { %v1390_v4 = vpop.f32.mrb[31].mxu1 }
 0x2ab   :  { %v1455_v6 = vpop.f32.mrb[32].mxu0 }
 0x2ac   :  { %v1462_v47 = vadd.f32 %v1455_v6, %v1392_v41  ;;  %v1457_v48 = vpop.f32.mrb[33].mxu0 }
 0x2ad   :  { %v1463_v39 = vadd.f32 %v1457_v48, %v1393_v44  ;;  %v1459_v50 = vpop.f32.mrb[34].mxu0 }
 0x2ae   :  { %v1460_v9 = vpop.f32.mrb[35].mxu0 }
 0x2af   :  { %v1525_v51 = vpop.f32.mrb[32].mxu1 }
 0x2b0   :  { %v1532_v8 = vadd.f32 %v1525_v51, %v1462_v47  ;;  %v1527_v53 = vpop.f32.mrb[33].mxu1 }
 0x2b1   :  { %v1533_v46 = vadd.f32 %v1527_v53, %v1463_v39  ;;  %v1529_v55 = vpop.f32.mrb[34].mxu1 }
 0x2b2   :  { %v1534_v43 = vadd.f32 %v1532_v8, %v893_v61  ;;  %v1530_v54 = vpop.f32.mrb[35].mxu1 }
 0x2b3   :  { %v1535_v56 = vadd.f32 %v1533_v46, %v893_v61  ;;  %v29_v61 = vld [vmem:[%s2195_s5] sm:$0xff] }
 0x2b5   :  { %v1540_v52 = vadd.f32 %v1535_v56, %v1534_v43 }
 0x2b7   :  { %1541 = vadd.xlane.f32.xlu0 %v1540_v52 }
 0x320   :  { %v1538_v58 = vpop.xlane.xlu1 %1537 }
 0x344   :  { %v1542_v60 = vpop.xlane.xlu0 %1541 }
 0x345   :  { %v1543_v5 = vadd.f32 %v1542_v60, %v1538_v58 }
 0x347   :  { %v1544_v62 = vmul.f32 0.001953125, %v1543_v5 }
 0x349   :  { %v1553_v59 = vsub.f32 %v1534_v43, %v1544_v62  ;;  %v1554_v7 = vsub.f32 %v1535_v56, %v1544_v62  ;;  %v1545_v49 = vsub.f32 %v2164_v0, %v1544_v62  ;;  %v1546_v10 = vsub.f32 %v2166_v3, %v1544_v62  ;;  %v28_v3 = vld [vmem:[%s2196_s4] sm:$0xff] }
 0x34b   :  { %v1555_v12 = vmul.f32 %v1553_v59, %v1553_v59  ;;  %v1556_v13 = vmul.f32 %v1554_v7, %v1554_v7  ;;  %v1547_v14 = vmul.f32 %v1545_v49, %v1545_v49  ;;  %v1548_v15 = vmul.f32 %v1546_v10, %v1546_v10 }
 0x34d   :  { %v1557_v26 = vadd.f32 %v1556_v13, %v1555_v12  ;;  %v1549_v16 = vadd.f32 %v1548_v15, %v1547_v14 }
 0x34f   :  { %1558 = vadd.xlane.f32.xlu1 %v1557_v26  ;;  %1550 = vadd.xlane.f32.xlu0 %v1549_v16 }
 0x360   :  { %1574 = vperm.xlu1 %1672, %v29_v61  }
 0x3dc   :  { %v1559_v22 = vpop.xlane.xlu1 %1558  ;;  %v1551_v11 = vpop.xlane.xlu0 %1550 }
 0x3dd   :  { %v1560_v17 = vadd.f32 %v1559_v22, %v1551_v11 }
 0x3df   :  { %v1561_v1 = vmul.f32 0.001953125, %v1560_v17 }
 0x3e0   :  { %v1575_v23 = vpop.permute.xlu1 %1574 }
 0x3e1   :  { %v1562_v0 = vadd.f32 1e-05, %v1561_v1 }
 0x3e3   :  { %1673 = vrsqrt.f32 %v1562_v0 }
 0x3ed   :  { %v1674_v18 = vpop.eup %1673 }
 0x3ee   :  { %v1564_v19 = vmul.f32 %v1674_v18, %v28_v3 }
 0x3f0   :  { %1567 = vperm.xlu0 %1671, %v1564_v19  }
 0x46f   :  { %v1568_v20 = vpop.permute.xlu0 %1567 }
 0x470   :  { %v1570_v2 = vmul.f32 %v1568_v20, %v1545_v49  ;;  %v1571_v21 = vmul.f32 %v1568_v20, %v1546_v10  ;;  %v1583_v24 = vmul.f32 %v1568_v20, %v1553_v59  ;;  %v1584_v38 = vmul.f32 %v1568_v20, %v1554_v7 }
 0x472   :  { %v1577_v63 = vadd.f32 %v1575_v23, %v1570_v2  ;;  %v1578_v25 = vadd.f32 %v1575_v23, %v1571_v21  ;;  %v1585_v27 = vadd.f32 %v1583_v24, %v1575_v23  ;;  %v1586_v28 = vadd.f32 %v1584_v38, %v1575_v23 }
 0x474   :  { %v1579_v34 = vmax.f32 %v1577_v63, 0.0  ;;  %v1580_v29 = vmax.f32 %v1578_v25, 0.0  ;;  %v1587_v30 = vmax.f32 %v1585_v27, 0.0  ;;  %v1588_v57 = vmax.f32 %v1586_v28, 0.0 }
 0x476   :  { %1581 = vst [vmem:[%s2197_s7] sm:$0xff] %v1579_v34  ;;  %1582 = vst [vmem:[%s2197_s7 + $0x8] sm:$0xff] %v1580_v29 }
 0x477   :  { %1650 = vst [vmem:[%s2197_s7 + $0x10] sm:$0xff] %v1587_v30  ;;  %1651 = vst [vmem:[%s2197_s7 + $0x18] sm:$0xff] %v1588_v57 }

// kernel: encoder_block_apply.3
= control target key start
LH: loop header
LB: loop body
LE: loop exit
PB: predicated region body
PF: predicated region fallthrough
CT: control target
= control target key end

     0   :  { %v105_v0 = vlaneseq  ;;  %v2045_v1 = vmov 0   ;;  %s2046_s17 = smov 1   ;;  %s2047_s19 = smov 2   ;;  %v2053_v20 = vmov 0.0   ;;  %vm71_vm0 = vcmask 277504   ;;  %s2784_s1 = inlined_call_operand.vmem [shape: f32[2,8,1], index: 1, kind: input, shape index: {}]   ;;  %s2785_s6 = inlined_call_operand.vmem [shape: f32[9,1,256], index: 6, kind: input, shape index: {}]   ;;  %s2786_s0 = inlined_call_operand.vmem [shape: f32[2,8,256], index: 0, kind: input, shape index: {}]   ;;  %s2787_s2 = inlined_call_operand.vmem [shape: bf16[9,8,8], index: 2, kind: input, shape index: {}]   ;;  %s2788_s3 = inlined_call_operand.vmem [shape: f32[8,1], index: 3, kind: input, shape index: {}]   ;;  %s2789_s5 = inlined_call_operand.vmem [shape: f32[8,1], index: 5, kind: input, shape index: {}]   ;;  %s2790_s4 = inlined_call_operand.vmem [shape: f32[8,1], index: 4, kind: input, shape index: {}]   ;;  %s2791_s8 = inlined_call_operand.vmem [shape: f32[2,8,256], index: 8, kind: output, shape index: {0}]   ;;  %s2792_s7 = inlined_call_operand.vmem [shape: f32[256,64], index: 7, kind: input, shape index: {}]   ;;  %s2793_s9 = inlined_call_operand.vmem [shape: f32[2,8,64], index: 9, kind: output, shape index: {1}]  }
   0x1   :  { %2011 = vset.pattern.permute.xlu0 %v2045_v1  ;;  %v79_v2 = vld [vmem:[%s2784_s1] sm:$0xff]  ;;  %199 = vmatprep.mubr.bf16.mxu0 %v2045_v1  ;;  %v1837_v4 = vld [vmem:[%s2784_s1 + $0x8] sm:$0xff]  ;;  %s2048_s22 = smov 16   ;;  %s2049_s25 = smov 17   ;;  %69 = vst [vmem:[#allocation2] sm:$0xff] %v2053_v20  ;;  %72 = vst.msk [vmem:[#allocation2 + $0x10] sm:$0xff] %vm71_vm0, %v2053_v20 }
   0x2   :  { %82 = vperm.xlu0 %2011, %v79_v2   ;;  %v106_v3 = vshrl.u32 %v105_v0, 7  ;;  %249 = vmatprep.mubr.bf16.mxu1 %v2045_v1  ;;  %v1809_v5 = vld [vmem:[%s2785_s6 + $0x2] sm:$0x3]  ;;  %v1810_v8 = vld [vmem:[%s2785_s6 + $0x4] sm:$0x3]  ;;  %s2050_s28 = smov 18  }
   0x3   :  { %2012 = vset.pattern.permute.xlu1 %v2045_v1  ;;  %v1811_v10 = vld [vmem:[%s2785_s6 + $0x6] sm:$0x3]  ;;  %v1812_v12 = vld [vmem:[%s2785_s6 + $0x8] sm:$0x3]  ;;  %v1813_v14 = vld [vmem:[%s2785_s6 + $0xa] sm:$0x3] }
   0x4   :  { %v2126_v6 = vsub.s32 0, %v106_v3  ;;  %v1814_v16 = vld [vmem:[%s2785_s6 + $0xc] sm:$0x3]  ;;  %v1815_v18 = vld [vmem:[%s2785_s6 + $0xe] sm:$0x3]  ;;  %s2051_s10 = smov 32  }
   0x5   :  { %s2052_s11 = smov 33   ;;  %v77_v21 = vld [vmem:[%s2786_s0] sm:$0xff]  ;;  %v78_v24 = vld [vmem:[%s2786_s0 + $0x8] sm:$0xff]  ;;  %v1835_v25 = vld [vmem:[%s2786_s0 + $0x10] sm:$0xff]  ;;  %v111_v26 = vsub.s32 1, %v106_v3  ;;  %vm75_vm1 = vcmask 146432  }
   0x6   :  { %885 = vperm.xlu0 %2011, %v1837_v4   ;;  %v124_v7 = vrot.slane %v1809_v5, %v2126_v6  ;;  %v262_v9 = vrot.slane %v1810_v8, %v2126_v6  ;;  %v350_v11 = vrot.slane %v1811_v10, %v2126_v6  ;;  %v438_v13 = vrot.slane %v1812_v12, %v2126_v6  ;;  %v1816_v28 = vld [vmem:[%s2785_s6 + $0x10] sm:$0x3]  ;;  %s2054_s21 = smov 34   ;;  %v1836_v39 = vld [vmem:[%s2786_s0 + $0x18] sm:$0xff]  ;;  %v52_v48 = vld [vmem:[%s2785_s6] sm:$0x3] }
   0x7   :  { %v525_v15 = vrot.slane %v1813_v14, %v2126_v6  ;;  %v612_v17 = vrot.slane %v1814_v16, %v2126_v6  ;;  %v700_v19 = vrot.slane %v1815_v18, %v2126_v6  ;;  %v788_v31 = vrot.slane %v1816_v28, %v2126_v6  ;;  %76 = vst.msk [vmem:[#allocation3 + $0x10] sm:$0xff] %vm75_vm1, %v2053_v20  ;;  %s2055_s6 = smov 126   ;;  %s2057_s24 = smov 112  }
   0x8   :  { %v128_v32 = vrot.slane %v1809_v5, %v111_v26  ;;  %v266_v33 = vrot.slane %v1810_v8, %v111_v26  ;;  %v354_v34 = vrot.slane %v1811_v10, %v111_v26  ;;  %v442_v35 = vrot.slane %v1812_v12, %v111_v26  ;;  %s2059_s26 = smov 110   ;;  %s2060_s27 = smov 96  }
   0x9   :  { %v529_v36 = vrot.slane %v1813_v14, %v111_v26  ;;  %v616_v37 = vrot.slane %v1814_v16, %v111_v26  ;;  %v704_v38 = vrot.slane %v1815_v18, %v111_v26  ;;  %v792_v41 = vrot.slane %v1816_v28, %v111_v26  ;;  %s2061_s30 = smov 95  }
   0xa   :  { %129 = vrot.lane.b32.xlu0 %v124_v7, %s2046_s17  ;;  %vm98_vm2 = vcmask 1047688   ;;  %vm93_vm3 = vcmask 138240   ;;  %v2207_v51 = vrot.slane %v52_v48, %v111_v26  ;;  %v108_v55 = vrot.slane %v52_v48, %v2126_v6 }
   0xb   :  { %vm160_vm4 = vcmask 1043456   ;;  %vm133_vm5 = vcmask 7168   ;;  %vm156_vm6 = vcmask 64512   ;;  %vm271_vm7 = vcmask 15360  }
   0xc   :  { %vm359_vm8 = vcmask 130048   ;;  %vm621_vm9 = vcmask 261120   ;;  %vm709_vm10 = vcmask 269312   ;;  %vm153_vm11 = vcmask 1039360  }
   0xd   :  { %vm291_vm12 = vcmask 1031168   ;;  %vm466_vm13 = vcmask 908288   ;;  %vm379_vm14 = vcmask 916480   ;;  %vm641_vm15 = vcmask 785408  }
   0xe   :  { %267 = vrot.lane.b32.xlu0 %v262_v9, %s2047_s19 }
  0x12   :  { %355 = vrot.lane.b32.xlu0 %v350_v11, %s2048_s22 }
  0x16   :  { %443 = vrot.lane.b32.xlu0 %v438_v13, %s2049_s25 }
  0x1a   :  { %530 = vrot.lane.b32.xlu0 %v525_v15, %s2050_s28 }
  0x1e   :  { %617 = vrot.lane.b32.xlu0 %v612_v17, %s2051_s10 }
  0x22   :  { %705 = vrot.lane.b32.xlu0 %v700_v19, %s2052_s11 }
  0x81   :  { %v83_v22 = vpop.permute.xlu0 %82 }
  0x82   :  { %v85_v23 = vadd.f32 %v83_v22, %v77_v21  ;;  %v86_v29 = vadd.f32 %v83_v22, %v78_v24 }
  0x84   :  { %89 = vrot.lane.b32.xlu1 %v85_v23, %s2049_s25 }
  0x85   :  { %v886_v27 = vpop.permute.xlu0 %885 }
  0x86   :  { %v888_v30 = vadd.f32 %v1835_v25, %v886_v27  ;;  %v889_v40 = vadd.f32 %v1836_v39, %v886_v27 }
  0x88   :  { %892 = vrot.lane.b32.xlu0 %v888_v30, %s2049_s25  ;;  %91 = vrot.lane.b32.xlu1 %v86_v29, %s2049_s25 }
  0x89   :  { %v2189_v42 = vpop.permute.xlu0 %129 }
  0x8c   :  { %793 = vrot.lane.b32.xlu0 %v788_v31, %s2054_s21  ;;  %131 = vrot.lane.b32.xlu1 %v128_v32, %s2046_s17 }
  0x8d   :  { %v2191_v43 = vpop.permute.xlu0 %267 }
  0x90   :  { %269 = vrot.lane.b32.xlu1 %v266_v33, %s2047_s19 }
  0x91   :  { %v2193_v44 = vpop.permute.xlu0 %355 }
  0x94   :  { %357 = vrot.lane.b32.xlu1 %v354_v34, %s2048_s22  ;;  %s2056_s22 = smov 127  }
  0x95   :  { %v2195_v45 = vpop.permute.xlu0 %443 }
  0x98   :  { %445 = vrot.lane.b32.xlu1 %v442_v35, %s2049_s25 }
  0x99   :  { %v2197_v46 = vpop.permute.xlu0 %530 }
  0x9c   :  { %532 = vrot.lane.b32.xlu1 %v529_v36, %s2050_s28 }
  0x9d   :  { %v2199_v47 = vpop.permute.xlu0 %617 }
  0xa0   :  { %619 = vrot.lane.b32.xlu1 %v616_v37, %s2051_s10  ;;  %v2295_v37 = vld [vmem:[%s2787_s2] sm:$0xf]  ;;  %s2062_s10 = smov 94  }
  0xa1   :  { %v2205_v50 = vpop.permute.xlu0 %705 }
  0xa4   :  { %707 = vrot.lane.b32.xlu1 %v704_v38, %s2052_s11 }
  0xa8   :  { %894 = vrot.lane.b32.xlu1 %v889_v40, %s2049_s25  ;;  %s2058_s25 = smov 111  }
  0xac   :  { %795 = vrot.lane.b32.xlu1 %v792_v41, %s2054_s21 }
  0xf6   :  { %v90_v49 = vpop.permute.xlu1 %89 }
  0xf7   :  { %99 = vst.msk [vmem:[#allocation2] sm:$0xff] %vm98_vm2, %v90_v49 }
  0xfa   :  { %v92_v52 = vpop.permute.xlu1 %91  ;;  %v2216_v56 = vpop.permute.xlu0 %892 }
  0xfb   :  { %v2210_v53 = vsel %vm93_vm3, %v90_v49, %v92_v52  ;;  %101 = vst.msk [vmem:[#allocation2 + $0x10] sm:$0xff] %vm93_vm3, %v92_v52 }
  0xfc   :  { %v116_v54 = vmul.f32 %v2207_v51, %v2210_v53 }
  0xfe   :  { %v2218_v57 = vld [vmem:[#allocation2] sm:$0xff]  ;;  %v2220_v58 = vpop.permute.xlu1 %131  ;;  %v118_v59 = vpack.c.bf16 %v116_v54, %v116_v54  ;;  %v2284_v32 = vpop.permute.xlu0 %793 }
  0xff   :  { %900 = vst.msk [vmem:[#allocation2] sm:$0xff] %vm98_vm2, %v2216_v56  ;;  %v276_v60 = vmul.f32 %v2191_v43, %v2218_v57  ;;  %v138_v61 = vmul.f32 %v2189_v42, %v2218_v57  ;;  %v115_v62 = vmul.f32 %v108_v55, %v2218_v57  ;;  %v364_v10 = vmul.f32 %v2193_v44, %v2218_v57 }
 0x100   :  { %1819 = vmatprep.subr.msk.bf16.mxu1 %vm160_vm4, %v118_v59  ;;  %v451_v11 = vmul.f32 %v2195_v45, %v2218_v57  ;;  %v538_v21 = vmul.f32 %v2197_v46, %v2218_v57  ;;  %v626_v22 = vmul.f32 %v2199_v47, %v2218_v57  ;;  %v2274_v28 = vsel %vm133_vm5, %v2189_v42, %v2220_v58 }
 0x101   :  { %v279_v63 = vpack.c.bf16 %v276_v60, %v276_v60  ;;  %v141_v0 = vpack.c.bf16 %v138_v61, %v138_v61  ;;  %v117_v4 = vpack.c.bf16 %v115_v62, %v115_v62  ;;  %v367_v14 = vpack.c.bf16 %v364_v10, %v364_v10 }
 0x102   :  { %v2230_v2 = vld [vmem:[#allocation2 + $0x10] sm:$0xff]  ;;  %v2232_v3 = vpop.permute.xlu1 %269  ;;  %v454_v15 = vpack.c.bf16 %v451_v11, %v451_v11  ;;  %v541_v26 = vpack.c.bf16 %v538_v21, %v538_v21  ;;  %v629_v27 = vpack.c.bf16 %v626_v22, %v626_v22  ;;  %v714_v31 = vmul.f32 %v2205_v50, %v2218_v57 }
 0x103   :  { %v140_v5 = vmul.f32 %v2220_v58, %v2230_v2  ;;  %v278_v6 = vmul.f32 %v2232_v3, %v2230_v2  ;;  %285 = vrot.lane.b32.xlu1 %v279_v63, %s2055_s6  ;;  %147 = vrot.lane.b32.xlu0 %v141_v0, %s2056_s22  ;;  %v212_v7 = vsel %vm160_vm4, %v117_v4, 0  ;;  %v139_v35 = vmul.f32 %v2274_v28, %v2210_v53 }
 0x104   :  { %218 = vmatpush1.bf16.msra.mxu1 %v212_v7  ;;  %v801_v38 = vmul.f32 %v2284_v32, %v2218_v57  ;;  %v2303_v39 = vsel %vm271_vm7, %v2191_v43, %v2232_v3  ;;  %v717_v41 = vpack.c.bf16 %v714_v31, %v714_v31  ;;  %vm729_vm2 = vcmask 777216  }
 0x105   :  { %v143_v8 = vpack.c.bf16 %v140_v5, %v140_v5  ;;  %v281_v9 = vpack.c.bf16 %v278_v6, %v278_v6  ;;  %v142_v48 = vpack.c.bf16 %v139_v35, %v139_v35  ;;  %v277_v54 = vmul.f32 %v2303_v39, %v2210_v53 }
 0x106   :  { %v2245_v12 = vpop.permute.xlu1 %357  ;;  %v2253_v17 = vld [vmem:[#allocation2] sm:$0xff] }
 0x107   :  { %151 = vrot.lane.b32.xlu0 %v143_v8, %s2056_s22  ;;  %289 = vrot.lane.b32.xlu1 %v281_v9, %s2055_s6  ;;  %v366_v13 = vmul.f32 %v2245_v12, %v2230_v2  ;;  %v2266_v24 = vmul.f32 %v2253_v17, %v108_v55  ;;  %v804_v55 = vpack.c.bf16 %v801_v38, %v801_v38 }
 0x108   :  { %1820 = vmatmul.mubr.msk.bf16.vlgmr.msra.gmra.mrb[0].mxu1 %vm156_vm6, %v2295_v37  ;;  %v2319_v59 = vsel %vm359_vm8, %v2193_v44, %v2245_v12  ;;  %v280_v62 = vpack.c.bf16 %v277_v54, %v277_v54  ;;  %v1021_v21 = vmul.f32 %v2253_v17, %v2191_v43  ;;  %v910_v22 = vmul.f32 %v2253_v17, %v2189_v42 }
 0x109   :  { %v369_v19 = vpack.c.bf16 %v366_v13, %v366_v13  ;;  %423 = vmatprep.mubr.bf16.mxu1 %v2045_v1  ;;  %v365_v4 = vmul.f32 %v2319_v59, %v2210_v53  ;;  %v1153_v31 = vmul.f32 %v2253_v17, %v2195_v45 }
 0x10a   :  { %v2251_v16 = vpop.permute.xlu1 %445 }
 0x10b   :  { %v453_v18 = vmul.f32 %v2251_v16, %v2230_v2  ;;  %373 = vrot.lane.b32.xlu0 %v367_v14, %s2057_s24  ;;  %460 = vrot.lane.b32.xlu1 %v454_v15, %s2058_s25  ;;  %v368_v8 = vpack.c.bf16 %v365_v4, %v365_v4 }
 0x10d   :  { %v456_v20 = vpack.c.bf16 %v453_v18, %v453_v18 }
 0x10e   :  { %v2263_v23 = vpop.permute.xlu1 %532 }
 0x10f   :  { %377 = vrot.lane.b32.xlu0 %v369_v19, %s2057_s24  ;;  %464 = vrot.lane.b32.xlu1 %v456_v20, %s2058_s25  ;;  %v540_v25 = vmul.f32 %v2263_v23, %v2230_v2 }
 0x111   :  { %v543_v33 = vpack.c.bf16 %v540_v25, %v540_v25 }
 0x112   :  { %v2276_v29 = vpop.permute.xlu1 %619 }
 0x113   :  { %v628_v30 = vmul.f32 %v2276_v29, %v2230_v2  ;;  %547 = vrot.lane.b32.xlu0 %v541_v26, %s2059_s26  ;;  %635 = vrot.lane.b32.xlu1 %v629_v27, %s2060_s27  ;;  %v2347_v6 = vsel %vm621_vm9, %v2199_v47, %v2276_v29  ;;  %v1024_v26 = vpack.c.bf16 %v1021_v21, %v1021_v21 }
 0x115   :  { %v631_v34 = vpack.c.bf16 %v628_v30, %v628_v30 }
 0x116   :  { %v2288_v36 = vpop.permute.xlu1 %707 }
 0x117   :  { %551 = vrot.lane.b32.xlu0 %v543_v33, %s2059_s26  ;;  %639 = vrot.lane.b32.xlu1 %v631_v34, %s2060_s27  ;;  %v716_v40 = vmul.f32 %v2288_v36, %v2230_v2  ;;  %v2357_v10 = vsel %vm709_vm10, %v2205_v50, %v2288_v36  ;;  %v1087_v33 = vmul.f32 %v2253_v17, %v2193_v44 }
 0x118   :  { %v715_v15 = vmul.f32 %v2357_v10, %v2210_v53 }
 0x119   :  { %v719_v57 = vpack.c.bf16 %v716_v40, %v716_v40  ;;  %v1090_v34 = vpack.c.bf16 %v1087_v33, %v1087_v33  ;;  %v1219_v40 = vmul.f32 %v2253_v17, %v2197_v46 }
 0x11a   :  { %v895_v49 = vpop.permute.xlu1 %894  ;;  %v718_v19 = vpack.c.bf16 %v715_v15, %v715_v15 }
 0x11b   :  { %v2310_v52 = vsel %vm93_vm3, %v2216_v56, %v895_v49  ;;  %902 = vst.msk [vmem:[#allocation2 + $0x10] sm:$0xff] %vm93_vm3, %v895_v49  ;;  %723 = vrot.lane.b32.xlu0 %v717_v41, %s2061_s30  ;;  %149 = vrot.lane.b32.xlu1 %v142_v48, %s2056_s22  ;;  %v2324_v56 = vsel %vm93_vm3, %v2195_v45, %v2251_v16  ;;  %vm1673_vm3 = vcmask 523264  }
 0x11c   :  { %v452_v0 = vmul.f32 %v2324_v56, %v2210_v53  ;;  %v2338_v5 = vmul.f32 %v2310_v52, %v2207_v51  ;;  %v627_v51 = vmul.f32 %v2347_v6, %v2210_v53  ;;  %v1222_v41 = vpack.c.bf16 %v1219_v40, %v1219_v40 }
 0x11d   :  { %v1022_v48 = vmul.f32 %v2310_v52, %v2303_v39 }
 0x11e   :  { %v2326_v60 = vpop.permute.xlu1 %795  ;;  %v455_v7 = vpack.c.bf16 %v452_v0, %v452_v0  ;;  %v630_v13 = vpack.c.bf16 %v627_v51, %v627_v51  ;;  %v1286_v0 = vmul.f32 %v2310_v52, %v2347_v6 }
 0x11f   :  { %v803_v61 = vmul.f32 %v2326_v60, %v2230_v2  ;;  %810 = vrot.lane.b32.xlu1 %v804_v55, %s2062_s10  ;;  %727 = vrot.lane.b32.xlu0 %v719_v57, %s2061_s30  ;;  %v2343_v2 = vsel %vm75_vm1, %v2197_v46, %v2263_v23  ;;  %v2362_v11 = vsel %vm71_vm0, %v2284_v32, %v2326_v60  ;;  %vm553_vm0 = vcmask 900096  }
 0x120   :  { %v539_v9 = vmul.f32 %v2343_v2, %v2210_v53  ;;  %v802_v18 = vmul.f32 %v2362_v11, %v2210_v53  ;;  %v913_v53 = vpack.c.bf16 %v910_v22, %v910_v22  ;;  %v1025_v49 = vpack.c.bf16 %v1022_v48, %v1022_v48 }
 0x121   :  { %v806_v63 = vpack.c.bf16 %v803_v61, %v803_v61  ;;  %v1088_v46 = vmul.f32 %v2310_v52, %v2319_v59  ;;  %v1154_v57 = vmul.f32 %v2310_v52, %v2324_v56  ;;  %vm816_vm1 = vcmask 769024  }
 0x122   :  { %v542_v14 = vpack.c.bf16 %v539_v9, %v539_v9  ;;  %v805_v20 = vpack.c.bf16 %v802_v18, %v802_v18  ;;  %v2376_v25 = vld [vmem:[#allocation2 + $0x10] sm:$0xff] }
 0x123   :  { %287 = vrot.lane.b32.xlu0 %v280_v62, %s2055_s6  ;;  %814 = vrot.lane.b32.xlu1 %v806_v63, %s2062_s10  ;;  %v1023_v27 = vmul.f32 %v2376_v25, %v2232_v3  ;;  %v912_v30 = vmul.f32 %v2376_v25, %v2220_v58  ;;  %v1156_v3 = vpack.c.bf16 %v1153_v31, %v1153_v31 }
 0x124   :  { %v911_v58 = vmul.f32 %v2310_v52, %v2274_v28  ;;  %v1089_v35 = vmul.f32 %v2376_v25, %v2245_v12  ;;  %v1155_v44 = vmul.f32 %v2376_v25, %v2251_v16  ;;  %v1285_v12 = vmul.f32 %v2253_v17, %v2199_v47 }
 0x125   :  { %v1026_v43 = vpack.c.bf16 %v1023_v27, %v1023_v27  ;;  %v915_v42 = vpack.c.bf16 %v912_v30, %v912_v30  ;;  %v1221_v54 = vmul.f32 %v2376_v25, %v2263_v23  ;;  %v1091_v47 = vpack.c.bf16 %v1088_v46, %v1088_v46 }
 0x126   :  { %v914_v45 = vpack.c.bf16 %v911_v58, %v911_v58  ;;  %v1092_v38 = vpack.c.bf16 %v1089_v35, %v1089_v35  ;;  %v1158_v28 = vpack.c.bf16 %v1155_v44, %v1155_v44  ;;  %v1288_v16 = vpack.c.bf16 %v1285_v12, %v1285_v12 }
 0x127   :  { %462 = vrot.lane.b32.xlu0 %v455_v7, %s2058_s25  ;;  %375 = vrot.lane.b32.xlu1 %v368_v8, %s2057_s24  ;;  %v1224_v55 = vpack.c.bf16 %v1221_v54, %v1221_v54  ;;  %v1287_v39 = vmul.f32 %v2376_v25, %v2276_v29  ;;  %v1157_v61 = vpack.c.bf16 %v1154_v57, %v1154_v57 }
 0x128   :  { %v1220_v23 = vmul.f32 %v2310_v52, %v2343_v2  ;;  %v1351_v62 = vmul.f32 %v2253_v17, %v2205_v50  ;;  %v1417_v29 = vmul.f32 %v2253_v17, %v2284_v32  ;;  %v1289_v2 = vpack.c.bf16 %v1286_v0, %v1286_v0 }
 0x129   :  { %v1290_v59 = vpack.c.bf16 %v1287_v39, %v1287_v39  ;;  %v1352_v50 = vmul.f32 %v2310_v52, %v2357_v10  ;;  %v1353_v7 = vmul.f32 %v2376_v25, %v2288_v36  ;;  %v1419_v17 = vmul.f32 %v2376_v25, %v2326_v60  ;;  %v32_v36 = vld [vmem:[%s2788_s3] sm:$0xff] }
 0x12a   :  { %v1223_v56 = vpack.c.bf16 %v1220_v23, %v1220_v23  ;;  %v1354_v63 = vpack.c.bf16 %v1351_v62, %v1351_v62  ;;  %v1420_v4 = vpack.c.bf16 %v1417_v29, %v1417_v29  ;;  %v1418_v8 = vmul.f32 %v2310_v52, %v2362_v11 }
 0x12b   :  { %637 = vrot.lane.b32.xlu0 %v630_v13, %s2060_s27  ;;  %549 = vrot.lane.b32.xlu1 %v542_v14, %s2059_s26  ;;  %v1355_v32 = vpack.c.bf16 %v1352_v50, %v1352_v50  ;;  %v1356_v6 = vpack.c.bf16 %v1353_v7, %v1353_v7  ;;  %v1422_v51 = vpack.c.bf16 %v1419_v17, %v1419_v17 }
 0x12c   :  { %v1421_v9 = vpack.c.bf16 %v1418_v8, %v1418_v8 }
 0x12f   :  { %725 = vrot.lane.b32.xlu1 %v718_v19, %s2061_s30  ;;  %812 = vrot.lane.b32.xlu0 %v805_v20, %s2062_s10 }
 0x133   :  { %1030 = vrot.lane.b32.xlu1 %v1024_v26, %s2055_s6  ;;  %919 = vrot.lane.b32.xlu0 %v913_v53, %s2056_s22 }
 0x137   :  { %1034 = vrot.lane.b32.xlu1 %v1026_v43, %s2055_s6  ;;  %923 = vrot.lane.b32.xlu0 %v915_v42, %s2056_s22  ;;  %v2460_v43 = vld [vmem:[%s2787_s2 + $0x4] sm:$0xf] }
 0x13b   :  { %1162 = vrot.lane.b32.xlu1 %v1156_v3, %s2058_s25  ;;  %1096 = vrot.lane.b32.xlu0 %v1090_v34, %s2057_s24 }
 0x13f   :  { %921 = vrot.lane.b32.xlu1 %v914_v45, %s2056_s22  ;;  %1100 = vrot.lane.b32.xlu0 %v1092_v38, %s2057_s24  ;;  %v2474_v45 = vld [vmem:[%s2787_s2 + $0x8] sm:$0xf] }
 0x143   :  { %1166 = vrot.lane.b32.xlu1 %v1158_v28, %s2058_s25  ;;  %1228 = vrot.lane.b32.xlu0 %v1222_v41, %s2059_s26 }
 0x147   :  { %1294 = vrot.lane.b32.xlu1 %v1288_v16, %s2060_s27  ;;  %1032 = vrot.lane.b32.xlu0 %v1025_v49, %s2055_s6  ;;  %v2489_v49 = vld [vmem:[%s2787_s2 + $0xc] sm:$0xf] }
 0x14b   :  { %1098 = vrot.lane.b32.xlu1 %v1091_v47, %s2057_s24  ;;  %1232 = vrot.lane.b32.xlu0 %v1224_v55, %s2059_s26 }
 0x14f   :  { %1298 = vrot.lane.b32.xlu1 %v1290_v59, %s2060_s27  ;;  %1164 = vrot.lane.b32.xlu0 %v1157_v61, %s2058_s25  ;;  %v2504_v61 = vld [vmem:[%s2787_s2 + $0x10] sm:$0xf] }
 0x153   :  { %1230 = vrot.lane.b32.xlu1 %v1223_v56, %s2059_s26  ;;  %1360 = vrot.lane.b32.xlu0 %v1354_v63, %s2061_s30 }
 0x157   :  { %1426 = vrot.lane.b32.xlu1 %v1420_v4, %s2062_s10  ;;  %1296 = vrot.lane.b32.xlu0 %v1289_v2, %s2060_s27  ;;  %v2518_v4 = vld [vmem:[%s2787_s2 + $0x14] sm:$0xf] }
 0x15b   :  { %1362 = vrot.lane.b32.xlu1 %v1355_v32, %s2061_s30  ;;  %1364 = vrot.lane.b32.xlu0 %v1356_v6, %s2061_s30  ;;  %v2530_v32 = vld [vmem:[%s2787_s2 + $0x18] sm:$0xf] }
 0x15f   :  { %1430 = vrot.lane.b32.xlu1 %v1422_v51, %s2062_s10  ;;  %1428 = vrot.lane.b32.xlu0 %v1421_v9, %s2062_s10  ;;  %v908_v9 = vpack.c.bf16 %v2338_v5, %v2338_v5  ;;  %v2552_v5 = vld [vmem:[%s2787_s2 + $0x20] sm:$0xf] }
 0x163   :  { %873 = vperm.xlu0 %2011, %v32_v36   ;;  %v2541_v36 = vld [vmem:[%s2787_s2 + $0x1c] sm:$0xf] }
 0x175   :  { %v148_v60 = vpop.permute.xlu0 %147  ;;  %v286_v10 = vpop.permute.xlu1 %285 }
 0x179   :  { %v152_v13 = vpop.permute.xlu0 %151  ;;  %v290_v14 = vpop.permute.xlu1 %289 }
 0x17d   :  { %v374_v52 = vpop.permute.xlu0 %373  ;;  %v461_v11 = vpop.permute.xlu1 %460 }
 0x181   :  { %v378_v15 = vpop.permute.xlu0 %377  ;;  %v465_v18 = vpop.permute.xlu1 %464 }
 0x185   :  { %v548_v19 = vpop.permute.xlu0 %547  ;;  %v636_v20 = vpop.permute.xlu1 %635 }
 0x189   :  { %v552_v21 = vpop.permute.xlu0 %551  ;;  %v640_v22 = vpop.permute.xlu1 %639 }
 0x18d   :  { %v2451_v25 = vpop.permute.xlu0 %723  ;;  %v150_v26 = vpop.permute.xlu1 %149 }
 0x18e   :  { %v155_v53 = vsel %vm153_vm11, %v150_v26, %v152_v13  ;;  %v154_v27 = vsel %vm153_vm11, %v148_v60, %v150_v26  ;;  %v907_v13 = vpack.c.bf16 %v2266_v24, %v2266_v24 }
 0x18f   :  { %1817 = vmatprep.subr.msk.bf16.mxu0 %vm160_vm4, %v155_v53  ;;  %v162_v30 = vsel %vm160_vm4, %v154_v27, 0 }
 0x190   :  { %168 = vmatpush1.bf16.msra.mxu0 %v162_v30  ;;  %v975_v24 = vsel %vm160_vm4, %v907_v13, 0 }
 0x191   :  { %v728_v42 = vpop.permute.xlu0 %727  ;;  %v2462_v31 = vpop.permute.xlu1 %810 }
 0x193   :  { %1818 = vmatmul.mubr.msk.bf16.vlgmr.msra.gmra.mrb[0].mxu0 %vm156_vm6, %v2460_v43 }
 0x194   :  { %335 = vmatprep.mubr.bf16.mxu0 %v2045_v1 }
 0x195   :  { %v288_v33 = vpop.permute.xlu0 %287  ;;  %v815_v3 = vpop.permute.xlu1 %814 }
 0x196   :  { %v292_v34 = vsel %vm291_vm12, %v286_v10, %v288_v33  ;;  %v293_v58 = vsel %vm291_vm12, %v288_v33, %v290_v14 }
 0x197   :  { %v298_v35 = vsel %vm160_vm4, %v292_v34, 0  ;;  %1821 = vmatprep.subr.msk.bf16.mxu0 %vm160_vm4, %v293_v58 }
 0x198   :  { %304 = vmatpush1.bf16.msra.mxu0 %v298_v35 }
 0x199   :  { %v463_v38 = vpop.permute.xlu0 %462  ;;  %v376_v44 = vpop.permute.xlu1 %375 }
 0x19a   :  { %v467_v40 = vsel %vm466_vm13, %v461_v11, %v463_v38  ;;  %v468_v28 = vsel %vm466_vm13, %v463_v38, %v465_v18  ;;  %v380_v41 = vsel %vm379_vm14, %v374_v52, %v376_v44  ;;  %v381_v12 = vsel %vm379_vm14, %v376_v44, %v378_v15 }
 0x19b   :  { %v473_v48 = vsel %vm160_vm4, %v467_v40, 0  ;;  %v386_v16 = vsel %vm160_vm4, %v380_v41, 0  ;;  %1822 = vmatmul.mubr.msk.bf16.vlgmr.msra.gmra.mrb[4].mxu0 %vm156_vm6, %v2474_v45  ;;  %1823 = vmatprep.subr.msk.bf16.mxu1 %vm160_vm4, %v381_v12 }
 0x19c   :  { %1825 = vmatprep.subr.msk.bf16.mxu0 %vm160_vm4, %v468_v28  ;;  %392 = vmatpush1.bf16.msra.mxu1 %v386_v16 }
 0x19d   :  { %479 = vmatpush1.bf16.msra.mxu0 %v473_v48  ;;  %v638_v46 = vpop.permute.xlu0 %637  ;;  %v550_v54 = vpop.permute.xlu1 %549  ;;  %510 = vmatprep.mubr.bf16.mxu0 %v2045_v1 }
 0x19e   :  { %v643_v47 = vsel %vm641_vm15, %v638_v46, %v640_v22  ;;  %v554_v55 = vsel %vm553_vm0, %v548_v19, %v550_v54  ;;  %v555_v39 = vsel %vm553_vm0, %v550_v54, %v552_v21  ;;  %v642_v59 = vsel %vm641_vm15, %v636_v20, %v638_v46 }
 0x19f   :  { %v560_v57 = vsel %vm160_vm4, %v554_v55, 0  ;;  %1824 = vmatmul.mubr.msk.bf16.vlgmr.msra.gmra.mrb[4].mxu1 %vm156_vm6, %v2489_v49  ;;  %1827 = vmatprep.subr.msk.bf16.mxu1 %vm160_vm4, %v555_v39  ;;  %v648_v63 = vsel %vm160_vm4, %v642_v59, 0 }
 0x1a0   :  { %1829 = vmatprep.subr.msk.bf16.mxu0 %vm160_vm4, %v643_v47  ;;  %566 = vmatpush1.bf16.msra.mxu1 %v560_v57 }
 0x1a1   :  { %v813_v23 = vpop.permute.xlu0 %812  ;;  %v726_v62 = vpop.permute.xlu1 %725  ;;  %597 = vmatprep.mubr.bf16.mxu1 %v2045_v1 }
 0x1a2   :  { %v818_v29 = vsel %vm816_vm1, %v813_v23, %v815_v3  ;;  %v731_v56 = vsel %vm729_vm2, %v726_v62, %v728_v42  ;;  %v730_v0 = vsel %vm729_vm2, %v2451_v25, %v726_v62  ;;  %v817_v17 = vsel %vm816_vm1, %v2462_v31, %v813_v23 }
 0x1a3   :  { %1826 = vmatmul.mubr.msk.bf16.vlgmr.msra.gmra.mrb[8].mxu0 %vm156_vm6, %v2504_v61  ;;  %1831 = vmatprep.subr.msk.bf16.mxu1 %vm160_vm4, %v731_v56  ;;  %v736_v7 = vsel %vm160_vm4, %v730_v0, 0  ;;  %v823_v51 = vsel %vm160_vm4, %v817_v17, 0 }
 0x1a4   :  { %654 = vmatpush1.bf16.msra.mxu0 %v648_v63  ;;  %685 = vmatprep.mubr.bf16.mxu0 %v2045_v1 }
 0x1a5   :  { %1833 = vmatprep.subr.msk.bf16.mxu0 %vm160_vm4, %v818_v29  ;;  %v920_v2 = vpop.permute.xlu0 %919  ;;  %v1031_v50 = vpop.permute.xlu1 %1030 }
 0x1a7   :  { %1828 = vmatmul.mubr.msk.bf16.vlgmr.msra.gmra.mrb[8].mxu1 %vm156_vm6, %v2518_v4 }
 0x1a8   :  { %742 = vmatpush1.bf16.msra.mxu1 %v736_v7  ;;  %773 = vmatprep.mubr.bf16.mxu1 %v2045_v1 }
 0x1a9   :  { %v924_v6 = vpop.permute.xlu0 %923  ;;  %v1035_v8 = vpop.permute.xlu1 %1034 }
 0x1ab   :  { %1830 = vmatmul.mubr.msk.bf16.vlgmr.msra.gmra.mrb[12].mxu0 %vm156_vm6, %v2530_v32 }
 0x1ac   :  { %829 = vmatpush1.bf16.msra.mxu0 %v823_v51  ;;  %860 = vmatprep.mubr.bf16.mxu0 %v2045_v1 }
 0x1ad   :  { %1840 = vmatprep.subr.msk.bf16.mxu0 %vm160_vm4, %v908_v9  ;;  %v1097_v60 = vpop.permute.xlu0 %1096  ;;  %v1163_v10 = vpop.permute.xlu1 %1162 }
 0x1af   :  { %1832 = vmatmul.mubr.msk.bf16.vlgmr.msra.gmra.mrb[12].mxu1 %vm156_vm6, %v2541_v36 }
 0x1b0   :  { %965 = vmatprep.mubr.bf16.mxu1 %v2045_v1 }
 0x1b1   :  { %v1101_v14 = vpop.permute.xlu0 %1100  ;;  %v922_v52 = vpop.permute.xlu1 %921 }
 0x1b2   :  { %v925_v11 = vsel %vm153_vm11, %v920_v2, %v922_v52  ;;  %v926_v15 = vsel %vm153_vm11, %v922_v52, %v924_v6 }
 0x1b3   :  { %v928_v18 = vsel %vm160_vm4, %v925_v11, 0  ;;  %1834 = vmatmul.mubr.msk.bf16.vlgmr.msra.gmra.mrb[16].mxu0 %vm156_vm6, %v2552_v5  ;;  %1838 = vmatprep.subr.msk.bf16.mxu1 %vm160_vm4, %v926_v15 }
 0x1b4   :  { %981 = vmatpush1.bf16.msra.mxu0 %v975_v24  ;;  %934 = vmatpush1.bf16.msra.mxu1 %v928_v18 }
 0x1b5   :  { %v1229_v19 = vpop.permute.xlu0 %1228  ;;  %v1167_v20 = vpop.permute.xlu1 %1166  ;;  %1012 = vmatprep.mubr.bf16.mxu0 %v2045_v1 }
 0x1b7   :  { %1839 = vmatmul.mubr.msk.bf16.vlgmr.msra.gmra.mrb[16].mxu1 %vm156_vm6, %v2460_v43 }
 0x1b8   :  { %1076 = vmatprep.mubr.bf16.mxu1 %v2045_v1 }
 0x1b9   :  { %v1033_v21 = vpop.permute.xlu0 %1032  ;;  %v1295_v22 = vpop.permute.xlu1 %1294 }
 0x1ba   :  { %v1036_v25 = vsel %vm291_vm12, %v1031_v50, %v1033_v21  ;;  %v1037_v26 = vsel %vm291_vm12, %v1033_v21, %v1035_v8 }
 0x1bb   :  { %v1039_v53 = vsel %vm160_vm4, %v1036_v25, 0  ;;  %1841 = vmatmul.mubr.msk.bf16.vlgmr.msra.gmra.mrb[20].mxu0 %vm156_vm6, %v2295_v37  ;;  %1842 = vmatprep.subr.msk.bf16.mxu1 %vm160_vm4, %v1037_v26 }
 0x1bc   :  { %1045 = vmatpush1.bf16.msra.mxu1 %v1039_v53  ;;  %1142 = vmatprep.mubr.bf16.mxu0 %v2045_v1 }
 0x1bd   :  { %v1233_v27 = vpop.permute.xlu0 %1232  ;;  %v1099_v30 = vpop.permute.xlu1 %1098 }
 0x1be   :  { %v1102_v43 = vsel %vm379_vm14, %v1097_v60, %v1099_v30  ;;  %v1103_v42 = vsel %vm379_vm14, %v1099_v30, %v1101_v14 }
 0x1bf   :  { %v1105_v31 = vsel %vm160_vm4, %v1102_v43, 0  ;;  %1843 = vmatmul.mubr.msk.bf16.vlgmr.msra.gmra.mrb[20].mxu1 %vm156_vm6, %v2474_v45  ;;  %1844 = vmatprep.subr.msk.bf16.mxu0 %vm160_vm4, %v1103_v42 }
 0x1c0   :  { %1111 = vmatpush1.bf16.msra.mxu0 %v1105_v31  ;;  %1208 = vmatprep.mubr.bf16.mxu1 %v2045_v1 }
 0x1c1   :  { %v1165_v37 = vpop.permute.xlu0 %1164  ;;  %v1299_v33 = vpop.permute.xlu1 %1298 }
 0x1c2   :  { %v1168_v3 = vsel %vm466_vm13, %v1163_v10, %v1165_v37  ;;  %v1169_v34 = vsel %vm466_vm13, %v1165_v37, %v1167_v20 }
 0x1c3   :  { %v1171_v58 = vsel %vm160_vm4, %v1168_v3, 0  ;;  %1845 = vmatmul.mubr.msk.bf16.vlgmr.msra.gmra.mrb[24].mxu0 %vm156_vm6, %v2489_v49  ;;  %1846 = vmatprep.subr.msk.bf16.mxu1 %vm160_vm4, %v1169_v34 }
 0x1c4   :  { %1177 = vmatpush1.bf16.msra.mxu1 %v1171_v58  ;;  %1274 = vmatprep.mubr.bf16.mxu0 %v2045_v1 }
 0x1c5   :  { %v1361_v35 = vpop.permute.xlu0 %1360  ;;  %v1231_v45 = vpop.permute.xlu1 %1230 }
 0x1c6   :  { %v1234_v38 = vsel %vm553_vm0, %v1229_v19, %v1231_v45  ;;  %v1235_v44 = vsel %vm553_vm0, %v1231_v45, %v1233_v27 }
 0x1c7   :  { %v1237_v40 = vsel %vm160_vm4, %v1234_v38, 0  ;;  %1847 = vmatmul.mubr.msk.bf16.vlgmr.msra.gmra.mrb[24].mxu1 %vm156_vm6, %v2504_v61  ;;  %1848 = vmatprep.subr.msk.bf16.mxu0 %vm160_vm4, %v1235_v44 }
 0x1c8   :  { %1243 = vmatpush1.bf16.msra.mxu0 %v1237_v40  ;;  %1340 = vmatprep.mubr.bf16.mxu1 %v2045_v1 }
 0x1c9   :  { %v1297_v28 = vpop.permute.xlu0 %1296  ;;  %v1427_v41 = vpop.permute.xlu1 %1426 }
 0x1ca   :  { %v1300_v12 = vsel %vm641_vm15, %v1295_v22, %v1297_v28  ;;  %v1301_v48 = vsel %vm641_vm15, %v1297_v28, %v1299_v33 }
 0x1cb   :  { %v1303_v16 = vsel %vm160_vm4, %v1300_v12, 0  ;;  %1849 = vmatmul.mubr.msk.bf16.vlgmr.msra.gmra.mrb[28].mxu0 %vm156_vm6, %v2518_v4  ;;  %1850 = vmatprep.subr.msk.bf16.mxu1 %vm160_vm4, %v1301_v48 }
 0x1cc   :  { %1309 = vmatpush1.bf16.msra.mxu1 %v1303_v16  ;;  %1406 = vmatprep.mubr.bf16.mxu0 %v2045_v1 }
 0x1cd   :  { %v1365_v49 = vpop.permute.xlu0 %1364  ;;  %v1363_v46 = vpop.permute.xlu1 %1362 }
 0x1ce   :  { %v1366_v54 = vsel %vm729_vm2, %v1361_v35, %v1363_v46  ;;  %v1367_v47 = vsel %vm729_vm2, %v1363_v46, %v1365_v49 }
 0x1cf   :  { %v1369_v55 = vsel %vm160_vm4, %v1366_v54, 0  ;;  %1851 = vmatmul.mubr.msk.bf16.vlgmr.msra.gmra.mrb[28].mxu1 %vm156_vm6, %v2530_v32  ;;  %1852 = vmatprep.subr.msk.bf16.mxu0 %vm160_vm4, %v1367_v47 }
 0x1d0   :  { %1375 = vmatpush1.bf16.msra.mxu0 %v1369_v55  ;;  %1472 = vmatprep.mubr.bf16.mxu1 %v2045_v1 }
 0x1d1   :  { %v1429_v39 = vpop.permute.xlu0 %1428  ;;  %v1431_v57 = vpop.permute.xlu1 %1430 }
 0x1d2   :  { %v1432_v59 = vsel %vm816_vm1, %v1427_v41, %v1429_v39  ;;  %v1433_v61 = vsel %vm816_vm1, %v1429_v39, %v1431_v57 }
 0x1d3   :  { %v1435_v23 = vsel %vm160_vm4, %v1432_v59, 0  ;;  %1853 = vmatmul.mubr.msk.bf16.vlgmr.msra.gmra.mrb[32].mxu0 %vm156_vm6, %v2541_v36  ;;  %1854 = vmatprep.subr.msk.bf16.mxu1 %vm160_vm4, %v1433_v61 }
 0x1d4   :  { %1441 = vmatpush1.bf16.msra.mxu1 %v1435_v23 }
 0x1d7   :  { %1855 = vmatmul.mubr.msk.bf16.vlgmr.msra.gmra.mrb[32].mxu1 %vm156_vm6, %v2552_v5 }
 0x1db   :  { %v251_v62 = vpop.f32.mrb[0].mxu1 }
 0x1dc   :  { %v253_v29 = vpop.f32.mrb[1].mxu1 }
 0x1dd   :  { %v255_v1 = vpop.f32.mrb[2].mxu1 }
 0x1de   :  { %v256_v56 = vpop.f32.mrb[3].mxu1 }
 0x1e2   :  { %v874_v28 = vpop.permute.xlu0 %873 }
 0x266   :  { %v201_v63 = vpop.f32.mrb[0].mxu0 }
 0x267   :  { %v203_v0 = vpop.f32.mrb[1].mxu0  ;;  %v252_v4 = vadd.f32 %v251_v62, %v201_v63 }
 0x268   :  { %v205_v2 = vpop.f32.mrb[2].mxu0  ;;  %v254_v50 = vadd.f32 %v253_v29, %v203_v0 }
 0x269   :  { %v206_v7 = vpop.f32.mrb[3].mxu0 }
 0x26e   :  { %v337_v17 = vpop.f32.mrb[4].mxu0 }
 0x26f   :  { %v344_v32 = vadd.f32 %v337_v17, %v252_v4  ;;  %v339_v6 = vpop.f32.mrb[5].mxu0 }
 0x270   :  { %v345_v8 = vadd.f32 %v339_v6, %v254_v50  ;;  %v341_v51 = vpop.f32.mrb[6].mxu0 }
 0x271   :  { %v342_v9 = vpop.f32.mrb[7].mxu0 }
 0x272   :  { %v425_v36 = vpop.f32.mrb[4].mxu1 }
 0x273   :  { %v432_v60 = vadd.f32 %v425_v36, %v344_v32  ;;  %v427_v10 = vpop.f32.mrb[5].mxu1 }
 0x274   :  { %v433_v13 = vadd.f32 %v427_v10, %v345_v8  ;;  %v429_v5 = vpop.f32.mrb[6].mxu1 }
 0x275   :  { %v430_v14 = vpop.f32.mrb[7].mxu1 }
 0x276   :  { %v512_v52 = vpop.f32.mrb[8].mxu0 }
 0x277   :  { %v519_v11 = vadd.f32 %v512_v52, %v432_v60  ;;  %v514_v15 = vpop.f32.mrb[9].mxu0 }
 0x278   :  { %v520_v18 = vadd.f32 %v514_v15, %v433_v13  ;;  %v516_v24 = vpop.f32.mrb[10].mxu0 }
 0x279   :  { %v517_v19 = vpop.f32.mrb[11].mxu0 }
 0x27a   :  { %v599_v20 = vpop.f32.mrb[8].mxu1 }
 0x27b   :  { %v606_v21 = vadd.f32 %v599_v20, %v519_v11  ;;  %v601_v22 = vpop.f32.mrb[9].mxu1 }
 0x27c   :  { %v607_v25 = vadd.f32 %v601_v22, %v520_v18  ;;  %v603_v26 = vpop.f32.mrb[10].mxu1 }
 0x27d   :  { %v604_v53 = vpop.f32.mrb[11].mxu1 }
 0x27e   :  { %v687_v27 = vpop.f32.mrb[12].mxu0 }
 0x27f   :  { %v694_v30 = vadd.f32 %v687_v27, %v606_v21  ;;  %v689_v43 = vpop.f32.mrb[13].mxu0 }
 0x280   :  { %v695_v42 = vadd.f32 %v689_v43, %v607_v25  ;;  %v691_v31 = vpop.f32.mrb[14].mxu0 }
 0x281   :  { %v692_v37 = vpop.f32.mrb[15].mxu0 }
 0x282   :  { %v775_v33 = vpop.f32.mrb[12].mxu1 }
 0x283   :  { %v782_v3 = vadd.f32 %v775_v33, %v694_v30  ;;  %v777_v34 = vpop.f32.mrb[13].mxu1 }
 0x284   :  { %v783_v58 = vadd.f32 %v777_v34, %v695_v42  ;;  %v779_v35 = vpop.f32.mrb[14].mxu1 }
 0x285   :  { %v780_v45 = vpop.f32.mrb[15].mxu1 }
 0x286   :  { %v862_v38 = vpop.f32.mrb[16].mxu0 }
 0x287   :  { %v869_v44 = vadd.f32 %v862_v38, %v782_v3  ;;  %v864_v40 = vpop.f32.mrb[17].mxu0 }
 0x288   :  { %v870_v41 = vadd.f32 %v864_v40, %v783_v58  ;;  %v866_v12 = vpop.f32.mrb[18].mxu0 }
 0x289   :  { %v2616_v48 = vadd.f32 %v874_v28, %v869_v44  ;;  %v867_v16 = vpop.f32.mrb[19].mxu0 }
 0x28a   :  { %v2618_v49 = vadd.f32 %v874_v28, %v870_v41  ;;  %v967_v46 = vpop.f32.mrb[16].mxu1 }
 0x28b   :  { %v969_v54 = vpop.f32.mrb[17].mxu1 }
 0x28c   :  { %v1485_v47 = vadd.f32 %v2618_v49, %v2616_v48  ;;  %v971_v55 = vpop.f32.mrb[18].mxu1 }
 0x28d   :  { %v972_v39 = vpop.f32.mrb[19].mxu1 }
 0x28e   :  { %v1014_v57 = vpop.f32.mrb[20].mxu0  ;;  %1486 = vadd.xlane.f32.xlu1 %v1485_v47 }
 0x28f   :  { %v1015_v59 = vadd.f32 %v1014_v57, %v967_v46  ;;  %v1016_v61 = vpop.f32.mrb[21].mxu0 }
 0x290   :  { %v1017_v23 = vadd.f32 %v1016_v61, %v969_v54  ;;  %v1018_v62 = vpop.f32.mrb[22].mxu0 }
 0x291   :  { %v1019_v29 = vpop.f32.mrb[23].mxu0 }
 0x292   :  { %v1078_v1 = vpop.f32.mrb[20].mxu1 }
 0x293   :  { %v1085_v56 = vadd.f32 %v1078_v1, %v1015_v59  ;;  %v1080_v63 = vpop.f32.mrb[21].mxu1 }
 0x294   :  { %v1086_v0 = vadd.f32 %v1080_v63, %v1017_v23  ;;  %v1082_v4 = vpop.f32.mrb[22].mxu1 }
 0x295   :  { %v1083_v2 = vpop.f32.mrb[23].mxu1 }
 0x296   :  { %v1144_v50 = vpop.f32.mrb[24].mxu0 }
 0x297   :  { %v1151_v7 = vadd.f32 %v1144_v50, %v1085_v56  ;;  %v1146_v17 = vpop.f32.mrb[25].mxu0 }
 0x298   :  { %v1152_v32 = vadd.f32 %v1146_v17, %v1086_v0  ;;  %v1148_v6 = vpop.f32.mrb[26].mxu0 }
 0x299   :  { %v1149_v8 = vpop.f32.mrb[27].mxu0 }
 0x29a   :  { %v1210_v51 = vpop.f32.mrb[24].mxu1 }
 0x29b   :  { %v1217_v9 = vadd.f32 %v1210_v51, %v1151_v7  ;;  %v1212_v36 = vpop.f32.mrb[25].mxu1 }
 0x29c   :  { %v1218_v60 = vadd.f32 %v1212_v36, %v1152_v32  ;;  %v1214_v10 = vpop.f32.mrb[26].mxu1  ;;  %v2630_v36 = vld [vmem:[#allocation3 + $0x10] sm:$0xff] }
 0x29d   :  { %v1215_v13 = vpop.f32.mrb[27].mxu1 }
 0x29e   :  { %v1276_v5 = vpop.f32.mrb[28].mxu0 }
 0x29f   :  { %v1283_v14 = vadd.f32 %v1276_v5, %v1217_v9  ;;  %v1278_v52 = vpop.f32.mrb[29].mxu0 }
 0x2a0   :  { %v1284_v11 = vadd.f32 %v1278_v52, %v1218_v60  ;;  %v1280_v15 = vpop.f32.mrb[30].mxu0 }
 0x2a1   :  { %v1281_v18 = vpop.f32.mrb[31].mxu0  ;;  %v1531_v15 = vld [vmem:[%s2792_s7 + $0x88] sm:$0xff] }
 0x2a2   :  { %v1342_v24 = vpop.f32.mrb[28].mxu1  ;;  %v1514_v18 = vld [vmem:[%s2792_s7] sm:$0xff] }
 0x2a3   :  { %v1349_v19 = vadd.f32 %v1342_v24, %v1283_v14  ;;  %v1344_v20 = vpop.f32.mrb[29].mxu1 }
 0x2a4   :  { %v1350_v21 = vadd.f32 %v1344_v20, %v1284_v11  ;;  %v1346_v22 = vpop.f32.mrb[30].mxu1  ;;  %v1530_v11 = vld [vmem:[%s2792_s7 + $0x80] sm:$0xff]  ;;  %v1532_v20 = vld [vmem:[%s2792_s7 + $0x90] sm:$0xff] }
 0x2a5   :  { %v1347_v25 = vpop.f32.mrb[31].mxu1  ;;  %v1929_v24 = vpack.c.bf16 %v1531_v15, %v1530_v11  ;;  %v1533_v22 = vld [vmem:[%s2792_s7 + $0x98] sm:$0xff] }
 0x2a6   :  { %v1408_v26 = vpop.f32.mrb[32].mxu0  ;;  %v1516_v25 = vld [vmem:[%s2792_s7 + $0x10] sm:$0xff] }
 0x2a7   :  { %v1415_v53 = vadd.f32 %v1408_v26, %v1349_v19  ;;  %v1410_v27 = vpop.f32.mrb[33].mxu0  ;;  %v1515_v19 = vld [vmem:[%s2792_s7 + $0x8] sm:$0xff]  ;;  %v1517_v26 = vld [vmem:[%s2792_s7 + $0x18] sm:$0xff]  ;;  %1930 = vmatprep.subr.bf16.mxu0 %v1929_v24  ;;  %1962 = vmatprep.subr.bf16.mxu1 %v1929_v24 }
 0x2a8   :  { %v1416_v30 = vadd.f32 %v1410_v27, %v1350_v21  ;;  %v1412_v43 = vpop.f32.mrb[34].mxu0  ;;  %v1931_v21 = vpack.c.bf16 %v1515_v19, %v1514_v18  ;;  %v1933_v27 = vpack.c.bf16 %v1533_v22, %v1532_v20 }
 0x2a9   :  { %v1413_v42 = vpop.f32.mrb[35].mxu0  ;;  %v1535_v43 = vld [vmem:[%s2792_s7 + $0xa8] sm:$0xff] }
 0x2aa   :  { %v1474_v31 = vpop.f32.mrb[32].mxu1  ;;  %1932 = vmatpush3.bf16.msra.mxu0 %v1931_v21  ;;  %1964 = vmatpush3.bf16.msra.mxu1 %v1931_v21  ;;  %v1935_v42 = vpack.c.bf16 %v1517_v26, %v1516_v25 }
 0x2ab   :  { %v1481_v37 = vadd.f32 %v1474_v31, %v1415_v53  ;;  %v1476_v33 = vpop.f32.mrb[33].mxu1  ;;  %1934 = vmatprep.subr.bf16.mxu0 %v1933_v27  ;;  %1966 = vmatprep.subr.bf16.mxu1 %v1933_v27 }
 0x2ac   :  { %v1482_v3 = vadd.f32 %v1476_v33, %v1416_v30  ;;  %v1478_v34 = vpop.f32.mrb[34].mxu1  ;;  %v1534_v30 = vld [vmem:[%s2792_s7 + $0xa0] sm:$0xff]  ;;  %v1519_v33 = vld [vmem:[%s2792_s7 + $0x28] sm:$0xff] }
 0x2ad   :  { %v1483_v58 = vadd.f32 %v1481_v37, %v874_v28  ;;  %v1479_v35 = vpop.f32.mrb[35].mxu1  ;;  %v1937_v31 = vpack.c.bf16 %v1535_v43, %v1534_v30  ;;  %v1518_v37 = vld [vmem:[%s2792_s7 + $0x20] sm:$0xff]  ;;  %v1537_v34 = vld [vmem:[%s2792_s7 + $0xb8] sm:$0xff] }
 0x2ae   :  { %v1484_v45 = vadd.f32 %v1482_v3, %v874_v28  ;;  %v34_v28 = vld [vmem:[%s2789_s5] sm:$0xff]  ;;  %v1536_v3 = vld [vmem:[%s2792_s7 + $0xb0] sm:$0xff]  ;;  %1936 = vmatpush3.bf16.msra.mxu0 %v1935_v42  ;;  %1968 = vmatpush3.bf16.msra.mxu1 %v1935_v42 }
 0x2af   :  { %1938 = vmatprep.subr.bf16.mxu0 %v1937_v31  ;;  %1970 = vmatprep.subr.bf16.mxu1 %v1937_v31  ;;  %v1941_v35 = vpack.c.bf16 %v1537_v34, %v1536_v3 }
 0x2b0   :  { %v1489_v38 = vadd.f32 %v1484_v45, %v1483_v58 }
 0x2b2   :  { %1490 = vadd.xlane.f32.xlu0 %v1489_v38  ;;  %v1521_v38 = vld [vmem:[%s2792_s7 + $0x38] sm:$0xff] }
 0x31b   :  { %v1487_v44 = vpop.xlane.xlu1 %1486 }
 0x33f   :  { %v1491_v40 = vpop.xlane.xlu0 %1490 }
 0x340   :  { %v1492_v41 = vadd.f32 %v1491_v40, %v1487_v44  ;;  %v1538_v44 = vld [vmem:[%s2792_s7 + $0xc0] sm:$0xff]  ;;  %v1539_v40 = vld [vmem:[%s2792_s7 + $0xc8] sm:$0xff] }
 0x342   :  { %v1493_v12 = vmul.f32 0.001953125, %v1492_v41 }
 0x344   :  { %v1502_v16 = vsub.f32 %v1483_v58, %v1493_v12  ;;  %v1503_v46 = vsub.f32 %v1484_v45, %v1493_v12  ;;  %v1494_v54 = vsub.f32 %v2616_v48, %v1493_v12  ;;  %v1495_v47 = vsub.f32 %v2618_v49, %v1493_v12  ;;  %v33_v49 = vld [vmem:[%s2790_s4] sm:$0xff]  ;;  %v1520_v45 = vld [vmem:[%s2792_s7 + $0x30] sm:$0xff] }
 0x345   :  { %v1939_v58 = vpack.c.bf16 %v1519_v33, %v1518_v37  ;;  %v1943_v41 = vpack.c.bf16 %v1521_v38, %v1520_v45  ;;  %v1945_v12 = vpack.c.bf16 %v1539_v40, %v1538_v44 }
 0x346   :  { %v1504_v55 = vmul.f32 %v1502_v16, %v1502_v16  ;;  %v1505_v39 = vmul.f32 %v1503_v46, %v1503_v46  ;;  %v1496_v57 = vmul.f32 %v1494_v54, %v1494_v54  ;;  %v1497_v59 = vmul.f32 %v1495_v47, %v1495_v47 }
 0x347   :  { %1940 = vmatpush3.bf16.msra.mxu0 %v1939_v58  ;;  %1972 = vmatpush3.bf16.msra.mxu1 %v1939_v58 }
 0x348   :  { %v1506_v61 = vadd.f32 %v1505_v39, %v1504_v55  ;;  %v1498_v23 = vadd.f32 %v1497_v59, %v1496_v57  ;;  %1942 = vmatprep.subr.bf16.mxu0 %v1941_v35  ;;  %1974 = vmatprep.subr.bf16.mxu1 %v1941_v35  ;;  %v1541_v55 = vld [vmem:[%s2792_s7 + $0xd8] sm:$0xff]  ;;  %v1524_v39 = vld [vmem:[%s2792_s7 + $0x50] sm:$0xff] }
 0x349   :  { %v1525_v59 = vld [vmem:[%s2792_s7 + $0x58] sm:$0xff] }
 0x34a   :  { %1507 = vadd.xlane.f32.xlu1 %v1506_v61  ;;  %1499 = vadd.xlane.f32.xlu0 %v1498_v23  ;;  %v1542_v61 = vld [vmem:[%s2792_s7 + $0xe0] sm:$0xff]  ;;  %v1543_v23 = vld [vmem:[%s2792_s7 + $0xe8] sm:$0xff] }
 0x34b   :  { %1944 = vmatpush3.bf16.msra.mxu0 %v1943_v41  ;;  %1976 = vmatpush3.bf16.msra.mxu1 %v1943_v41 }
 0x34c   :  { %1946 = vmatprep.subr.bf16.mxu0 %v1945_v12  ;;  %1978 = vmatprep.subr.bf16.mxu1 %v1945_v12 }
 0x35b   :  { %1555 = vperm.xlu1 %2012, %v34_v28   ;;  %v1951_v28 = vpack.c.bf16 %v1525_v59, %v1524_v39 }
 0x3d7   :  { %v1508_v62 = vpop.xlane.xlu1 %1507  ;;  %v1500_v29 = vpop.xlane.xlu0 %1499 }
 0x3d8   :  { %v1509_v1 = vadd.f32 %v1508_v62, %v1500_v29  ;;  %v1953_v62 = vpack.c.bf16 %v1543_v23, %v1542_v61 }
 0x3da   :  { %v1510_v56 = vmul.f32 0.001953125, %v1509_v1 }
 0x3db   :  { %v1556_v2 = vpop.permute.xlu1 %1555 }
 0x3dc   :  { %v1511_v48 = vadd.f32 1e-05, %v1510_v56  ;;  %v1526_v56 = vld [vmem:[%s2792_s7 + $0x60] sm:$0xff] }
 0x3de   :  { %2043 = vrsqrt.f32 %v1511_v48  ;;  %v1527_v48 = vld [vmem:[%s2792_s7 + $0x68] sm:$0xff] }
 0x3e8   :  { %v2044_v63 = vpop.eup %2043 }
 0x3e9   :  { %v1513_v0 = vmul.f32 %v2044_v63, %v33_v49 }
 0x3eb   :  { %1548 = vperm.xlu0 %2011, %v1513_v0  }
 0x46a   :  { %v1549_v4 = vpop.permute.xlu0 %1548 }
 0x46b   :  { %v1551_v50 = vmul.f32 %v1549_v4, %v1494_v54  ;;  %v1552_v7 = vmul.f32 %v1549_v4, %v1495_v47  ;;  %v1675_v17 = vmul.f32 %v1549_v4, %v1502_v16  ;;  %v1676_v32 = vmul.f32 %v1549_v4, %v1503_v46  ;;  %v1522_v16 = vld [vmem:[%s2792_s7 + $0x40] sm:$0xff]  ;;  %v1523_v46 = vld [vmem:[%s2792_s7 + $0x48] sm:$0xff]  ;;  %v1540_v47 = vld [vmem:[%s2792_s7 + $0xd0] sm:$0xff] }
 0x46c   :  { %v1947_v54 = vpack.c.bf16 %v1523_v46, %v1522_v16  ;;  %v1949_v57 = vpack.c.bf16 %v1541_v55, %v1540_v47 }
 0x46d   :  { %v1558_v6 = vadd.f32 %v1556_v2, %v1551_v50  ;;  %v1559_v8 = vadd.f32 %v1556_v2, %v1552_v7  ;;  %v1677_v51 = vadd.f32 %v1675_v17, %v1556_v2  ;;  %v1678_v9 = vadd.f32 %v1676_v32, %v1556_v2  ;;  %v1544_v50 = vld [vmem:[%s2792_s7 + $0xf0] sm:$0xff]  ;;  %v1545_v7 = vld [vmem:[%s2792_s7 + $0xf8] sm:$0xff] }
 0x46e   :  { %1948 = vmatpush3.bf16.msra.mxu0 %v1947_v54  ;;  %1980 = vmatpush3.bf16.msra.mxu1 %v1947_v54  ;;  %v1955_v2 = vpack.c.bf16 %v1527_v48, %v1526_v56  ;;  %v1528_v17 = vld [vmem:[%s2792_s7 + $0x70] sm:$0xff]  ;;  %v1957_v15 = vpack.c.bf16 %v1545_v7, %v1544_v50 }
 0x46f   :  { %v2632_v60 = vmax.f32 %v1558_v6, 0.0  ;;  %v2634_v10 = vmax.f32 %v1559_v8, 0.0  ;;  %v2636_v13 = vmax.f32 %v1677_v51, 0.0  ;;  %v2638_v5 = vmax.f32 %v1678_v9, 0.0  ;;  %1950 = vmatprep.subr.bf16.mxu0 %v1949_v57  ;;  %1982 = vmatprep.subr.bf16.mxu1 %v1949_v57  ;;  %v1529_v9 = vld [vmem:[%s2792_s7 + $0x78] sm:$0xff] }
 0x470   :  { %v1959_v19 = vpack.c.bf16 %v1529_v9, %v1528_v17 }
 0x471   :  { %1562 = vst [vmem:[%s2791_s8] sm:$0xff] %v2632_v60  ;;  %1563 = vst [vmem:[%s2791_s8 + $0x8] sm:$0xff] %v2634_v10  ;;  %v2013_v14 = vpack.i.bf16 %v2630_v36, %v2634_v10  ;;  %v2018_v52 = vpack.i.bf16 %v2630_v36, %v2638_v5  ;;  %v2023_v53 = vpack.i.bf16 %v2636_v13, %v2632_v60 }
 0x472   :  { %1856 = vst [vmem:[%s2791_s8 + $0x10] sm:$0xff] %v2636_v13  ;;  %1857 = vst [vmem:[%s2791_s8 + $0x18] sm:$0xff] %v2638_v5  ;;  %1952 = vmatpush3.bf16.msra.mxu0 %v1951_v28  ;;  %1984 = vmatpush3.bf16.msra.mxu1 %v1951_v28 }
 0x473   :  { %2014 = vrot.lane.b32.xlu1 %v2013_v14, %s2056_s22  ;;  %2019 = vrot.lane.b32.xlu0 %v2018_v52, %s2056_s22 }
 0x474   :  { %1954 = vmatprep.subr.bf16.mxu0 %v1953_v62  ;;  %1986 = vmatprep.subr.bf16.mxu1 %v1953_v62 }
 0x476   :  { %1956 = vmatpush3.bf16.msra.mxu0 %v1955_v2  ;;  %1988 = vmatpush3.bf16.msra.mxu1 %v1955_v2 }
 0x477   :  { %2024 = vrot.lane.b32.xlu1 %v2023_v53, %s2056_s22  ;;  %1958 = vmatprep.subr.bf16.mxu0 %v1957_v15 }
 0x478   :  { %1990 = vmatprep.subr.bf16.mxu1 %v1957_v15 }
 0x47a   :  { %1960 = vmatpush3.bf16.msra.mxu0 %v1959_v19  ;;  %1992 = vmatpush3.bf16.msra.mxu1 %v1959_v19 }
 0x4e5   :  { %v2015_v29 = vpop.permute.xlu1 %2014  ;;  %v2020_v1 = vpop.permute.xlu0 %2019 }
 0x4e6   :  { %v2017_v49 = vunpack.i.h.bf16 %v2015_v29  ;;  %v2016_v63 = vunpack.i.l.bf16 %v2015_v29  ;;  %v2022_v0 = vunpack.i.h.bf16 %v2020_v1  ;;  %v2021_v4 = vunpack.i.l.bf16 %v2020_v1 }
 0x4e8   :  { %v1586_v32 = vmax.f32 %v2630_v36, %v2017_v49  ;;  %v1580_v6 = vsel %vm153_vm11, %v2016_v63, %v2017_v49  ;;  %v1705_v8 = vmax.f32 %v2630_v36, %v2022_v0  ;;  %v1699_v51 = vsel %vm153_vm11, %v2021_v4, %v2022_v0 }
 0x4e9   :  { %v1584_v14 = vmax.f32 %v2634_v10, %v1580_v6  ;;  %v2025_v52 = vpop.permute.xlu1 %2024  ;;  %v1703_v11 = vmax.f32 %v2638_v5, %v1699_v51 }
 0x4ea   :  { %v2027_v18 = vunpack.i.h.bf16 %v2025_v52  ;;  %v2026_v24 = vunpack.i.l.bf16 %v2025_v52 }
 0x4eb   :  { %v2028_v20 = vpack.i.bf16 %v1586_v32, %v1584_v14  ;;  %v2033_v21 = vpack.i.bf16 %v1705_v8, %v1703_v11 }
 0x4ec   :  { %v1698_v36 = vsel %vm153_vm11, %v2027_v18, %v2021_v4  ;;  %v1579_v22 = vsel %vm153_vm11, %v2026_v24, %v2016_v63 }
 0x4ed   :  { %2029 = vrot.lane.b32.xlu0 %v2028_v20, %s2057_s24  ;;  %2034 = vrot.lane.b32.xlu1 %v2033_v21, %s2057_s24  ;;  %v1583_v10 = vmax.f32 %v2632_v60, %v1579_v22  ;;  %v1702_v5 = vmax.f32 %v2636_v13, %v1698_v36 }
 0x4ef   :  { %v2038_v25 = vpack.i.bf16 %v1702_v5, %v1583_v10 }
 0x4f1   :  { %2039 = vrot.lane.b32.xlu0 %v2038_v25, %s2057_s24 }
 0x55f   :  { %v2030_v26 = vpop.permute.xlu0 %2029  ;;  %v2035_v53 = vpop.permute.xlu1 %2034 }
 0x560   :  { %v2032_v27 = vunpack.i.h.bf16 %v2030_v26  ;;  %v2031_v30 = vunpack.i.l.bf16 %v2030_v26  ;;  %v2037_v43 = vunpack.i.h.bf16 %v2035_v53  ;;  %v2036_v42 = vunpack.i.l.bf16 %v2035_v53 }
 0x562   :  { %v1598_v31 = vsel %vm379_vm14, %v2031_v30, %v2032_v27  ;;  %v1716_v37 = vsel %vm379_vm14, %v2036_v42, %v2037_v43 }
 0x563   :  { %v1602_v33 = vmax.f32 %v1584_v14, %v1598_v31  ;;  %v2040_v3 = vpop.permute.xlu0 %2039  ;;  %v1720_v60 = vmax.f32 %v1703_v11, %v1716_v37 }
 0x564   :  { %v2042_v34 = vunpack.i.h.bf16 %v2040_v3  ;;  %v2041_v13 = vunpack.i.l.bf16 %v2040_v3 }
 0x565   :  { %1667 = vmatprep.mubr.f32.mxu0 %v1602_v33  ;;  %1785 = vmatprep.mubr.f32.mxu1 %v1720_v60 }
 0x566   :  { %v1715_v58 = vsel %vm379_vm14, %v2042_v34, %v2036_v42  ;;  %v1597_v35 = vsel %vm379_vm14, %v2041_v13, %v2031_v30 }
 0x567   :  { %v1719_v45 = vmax.f32 %v1702_v5, %v1715_v58  ;;  %v1601_v38 = vmax.f32 %v1583_v10, %v1597_v35 }
 0x569   :  { %1668 = vmatmul.mubr.f32.vlgmr.msra.gmra.mrb[36].mxu0 %v1601_v38  ;;  %1786 = vmatmul.mubr.f32.vlgmr.msra.gmra.mrb[36].mxu1 %v1719_v45 }
 0x63c   :  { %v1891_v44 = vpop.f32.mrb[36].mxu0  ;;  %v1926_v40 = vpop.f32.mrb[36].mxu1 }
 0x63d   :  { %v1892_v41 = vpop.f32.mrb[37].mxu0  ;;  %v1927_v12 = vpop.f32.mrb[37].mxu1 }
 0x63e   :  { %v1893_v16 = vadd.f32 %v1892_v41, %v1891_v44  ;;  %v1928_v46 = vadd.f32 %v1927_v12, %v1926_v40 }
 0x640   :  { %1674 = vst.msk [vmem:[%s2793_s9] sm:$0xff] %vm1673_vm3, %v1893_v16  ;;  %1858 = vst.msk [vmem:[%s2793_s9 + $0x8] sm:$0xff] %vm1673_vm3, %v1928_v46 }

</bundles_post_ra>
